<compile_context>
chip_gen: v5e
topology: v5e:2x2
jax: 0.10.0
libtpu: 0.0.40
codegen_flags: <defaults>
</compile_context>

<pallas_src>
import numpy as np
import jax
import jax.numpy as jnp
from jax.experimental import pallas as pl
from jax.experimental.pallas import tpu as pltpu

POOL_OUT = 112            # AdaptiveAvgPool2d target
EMB = 512                 # ArcFace embedding dim


def adaptive_pool_matrix(in_size, out_size):
    """Row-stochastic matrix reproducing torch.nn.AdaptiveAvgPool1d windows."""
    P = np.zeros((out_size, in_size), dtype=np.float32)
    for i in range(out_size):
        start = (i * in_size) // out_size
        end = -((-(i + 1) * in_size) // out_size)      # ceil((i+1)*in/out)
        P[i, start:end] = 1.0 / (end - start)
    return jnp.asarray(P)


# ----------------------------------------------------------------------------
# Fused per-sample kernel: pool (P_h @ x_c @ P_w^T per channel, into VMEM
# scratch) -> synthetic facenet (MLP + mean + projection + L2 norm).
# ----------------------------------------------------------------------------
def fused_kernel(x_ref, ph_ref, pwT_ref, w1_ref, b1_ref, w2_ref, b2_ref,
                 o_ref, pooled_ref):
    C = x_ref.shape[1]                    # 3, static -> unrolled at trace time
    # --- adaptive average pooling, kept entirely in VMEM (f32 for pool parity) ---
    for c in range(C):
        xc = x_ref[0, c, :, :]                                            # (236, 236)
        t = jnp.dot(ph_ref[...], xc, preferred_element_type=jnp.float32)  # (112, 236)
        p = jnp.dot(t, pwT_ref[...], preferred_element_type=jnp.float32)  # (112, 112)
        pooled_ref[c * POOL_OUT:(c + 1) * POOL_OUT, :] = p                # rows multiple of 8

    # --- synthetic facenet: bf16 MXU inputs, f32 accumulation / elementwise ---
    pooled = pooled_ref[...].astype(jnp.bfloat16)                         # (336, 112)
    h = jnp.dot(pooled, w1_ref[...],
                preferred_element_type=jnp.float32) + b1_ref[...]         # (336, 512)
    h = jnp.maximum(h, 0.0)
    hm = jnp.mean(h, axis=0, keepdims=True)                               # (1, 512)
    e = jnp.dot(hm.astype(jnp.bfloat16), w2_ref[...],
                preferred_element_type=jnp.float32) + b2_ref[...]         # (1, 512)
    inv_norm = jax.lax.rsqrt(jnp.sum(e * e, axis=1, keepdims=True) + 1e-12)
    o_ref[0] = e * inv_norm                                               # (1, 512) lane-dense


def extract_feats_batched(x, params, ph, pwT):
    """x: (N, 3, 256, 256) -> (N, 512) L2-normalized embeddings (one fused pass)."""
    w1, b1, w2, b2 = params
    xc = x[:, :, 11:247, 8:244].astype(jnp.float32)       # crop -> (N, 3, 236, 236)
    N, C, H, W = xc.shape
    feats = pl.pallas_call(
        fused_kernel,
        out_shape=jax.ShapeDtypeStruct((N, 1, EMB), jnp.float32),
        grid=(N,),
        in_specs=[
            pl.BlockSpec((1, C, H, W), lambda i: (i, 0, 0, 0)),     # per-sample image
            pl.BlockSpec((POOL_OUT, H), lambda i: (0, 0)),          # P_h
            pl.BlockSpec((W, POOL_OUT), lambda i: (0, 0)),          # P_w^T
            pl.BlockSpec((POOL_OUT, EMB), lambda i: (0, 0)),        # W1 (bf16)
            pl.BlockSpec((1, EMB), lambda i: (0, 0)),               # b1
            pl.BlockSpec((EMB, EMB), lambda i: (0, 0)),             # W2 (bf16)
            pl.BlockSpec((1, EMB), lambda i: (0, 0)),               # b2
        ],
        out_specs=pl.BlockSpec((1, 1, EMB), lambda i: (i, 0, 0)),
        scratch_shapes=[pltpu.VMEM((C * POOL_OUT, POOL_OUT), jnp.float32)],
        compiler_params=pltpu.CompilerParams(dimension_semantics=("parallel",)),
    )(xc, ph, pwT, w1, b1, w2, b2)
    return feats.reshape(N, EMB)


def id_loss_forward(y_hat, y, params):
    B = y_hat.shape[0]
    crop_h = 247 - 11
    crop_w = 244 - 8
    ph = adaptive_pool_matrix(crop_h, POOL_OUT)           # (112, 236)
    pwT = adaptive_pool_matrix(crop_w, POOL_OUT).T        # (236, 112)
    # Batch y_hat and y into a single extract_feats pass (one pallas_call, 2B grid).
    x = jnp.concatenate([y_hat, y], axis=0)
    feats = extract_feats_batched(x, params, ph, pwT)
    y_hat_feats = feats[:B]
    y_feats = jax.lax.stop_gradient(feats[B:])            # .detach()
    # loss = 1 - (y_hat_feats * y_feats).sum(1).mean(0)  -- tiny, keep in plain jnp
    return 1.0 - jnp.mean(jnp.sum(y_hat_feats * y_feats, axis=1))


def init_facenet_params():
    """Deterministic synthetic facenet parameters (bf16 weights, f32 biases)."""
    k1, k2 = jax.random.split(jax.random.PRNGKey(42))
    w1 = (jax.random.normal(k1, (POOL_OUT, EMB), jnp.float32)
          * (1.0 / np.sqrt(POOL_OUT))).astype(jnp.bfloat16)
    b1 = jnp.zeros((1, EMB), jnp.float32)
    w2 = (jax.random.normal(k2, (EMB, EMB), jnp.float32)
          * (1.0 / np.sqrt(EMB))).astype(jnp.bfloat16)
    b2 = jnp.zeros((1, EMB), jnp.float32)
    return (w1, b1, w2, b2)


if __name__ == "__main__":
    # crop indices [11:247, 8:244] imply 256x256 inputs; keep batch small.
    B, C, H, W = 2, 3, 256, 256
    ka, kb = jax.random.split(jax.random.PRNGKey(0))
    y_hat = jax.random.normal(ka, (B, C, H, W), jnp.float32)
    y = jax.random.normal(kb, (B, C, H, W), jnp.float32)

    params = init_facenet_params()
    loss = jax.jit(id_loss_forward)(y_hat, y, params)
    jax.block_until_ready(loss)
    print("KERNEL_OK")
</pallas_src>

<mosaic_0001>
module attributes {stable_mosaic.version = 11 : i64} {
  func.func @fused_kernel(%arg0: i32, %arg1: memref<1x3x236x236xf32, #tpu.memory_space<vmem>>, %arg2: memref<112x236xf32, #tpu.memory_space<vmem>>, %arg3: memref<236x112xf32, #tpu.memory_space<vmem>>, %arg4: memref<112x512xbf16, #tpu.memory_space<vmem>>, %arg5: memref<1x512xf32, #tpu.memory_space<vmem>>, %arg6: memref<512x512xbf16, #tpu.memory_space<vmem>>, %arg7: memref<1x512xf32, #tpu.memory_space<vmem>>, %arg8: memref<1x1x512xf32, #tpu.memory_space<vmem>>, %arg9: memref<336x112xf32, #tpu.memory_space<vmem>>) attributes {dimension_semantics = [#tpu.dimension_semantics<parallel>], iteration_bounds = array<i64: 4>, scalar_prefetch = 0 : i64, scratch_operands = 1 : i64, tpu.core_type = #tpu.core_type<tc>, window_params = [{transform_indices = @transform_0, window_bounds = array<i64: 1, 3, 236, 236>}, {pipeline_mode = #tpu.pipeline_mode<synchronous>, transform_indices = @transform_1, window_bounds = array<i64: 112, 236>}, {pipeline_mode = #tpu.pipeline_mode<synchronous>, transform_indices = @transform_2, window_bounds = array<i64: 236, 112>}, {pipeline_mode = #tpu.pipeline_mode<synchronous>, transform_indices = @transform_3, window_bounds = array<i64: 112, 512>}, {pipeline_mode = #tpu.pipeline_mode<synchronous>, transform_indices = @transform_4, window_bounds = array<i64: 1, 512>}, {pipeline_mode = #tpu.pipeline_mode<synchronous>, transform_indices = @transform_5, window_bounds = array<i64: 512, 512>}, {pipeline_mode = #tpu.pipeline_mode<synchronous>, transform_indices = @transform_6, window_bounds = array<i64: 1, 512>}, {transform_indices = @transform_7, window_bounds = array<i64: 1, 1, 512>}]} {
    %c0 = arith.constant 0 : index
    %c0_0 = arith.constant 0 : index
    %c0_1 = arith.constant 0 : index
    %c0_2 = arith.constant 0 : index
    %0 = vector.load %arg1[%c0, %c0_0, %c0_1, %c0_2] : memref<1x3x236x236xf32, #tpu.memory_space<vmem>>, vector<1x1x236x236xf32>
    %1 = vector.shape_cast %0 : vector<1x1x236x236xf32> to vector<236x236xf32>
    %c0_3 = arith.constant 0 : index
    %c0_4 = arith.constant 0 : index
    %2 = vector.load %arg2[%c0_3, %c0_4] : memref<112x236xf32, #tpu.memory_space<vmem>>, vector<112x236xf32>
    %cst = arith.constant dense<0.000000e+00> : vector<112x236xf32>
    %3 = tpu.matmul %2, %1, %cst {dimension_numbers = #tpu.dot_dimension_numbers<[1], [0], [0], [1], [0, 0, 1, 1], [], []>} : vector<112x236xf32>, vector<236x236xf32>, vector<112x236xf32> -> vector<112x236xf32>
    %c0_5 = arith.constant 0 : index
    %c0_6 = arith.constant 0 : index
    %4 = vector.load %arg3[%c0_5, %c0_6] : memref<236x112xf32, #tpu.memory_space<vmem>>, vector<236x112xf32>
    %cst_7 = arith.constant dense<0.000000e+00> : vector<112x112xf32>
    %5 = tpu.matmul %3, %4, %cst_7 {dimension_numbers = #tpu.dot_dimension_numbers<[1], [0], [0], [1], [0, 0, 1, 1], [], []>} : vector<112x236xf32>, vector<236x112xf32>, vector<112x112xf32> -> vector<112x112xf32>
    %c0_8 = arith.constant 0 : index
    %c0_9 = arith.constant 0 : index
    %6 = vector.load %arg9[%c0_8, %c0_9] : memref<336x112xf32, #tpu.memory_space<vmem>>, vector<112x112xf32>
    tpu.vector_store %arg9[%c0_8, %c0_9], %5 {strides = array<i32>} : memref<336x112xf32, #tpu.memory_space<vmem>>, vector<112x112xf32>,
    %c0_10 = arith.constant 0 : index
    %c1 = arith.constant 1 : index
    %c0_11 = arith.constant 0 : index
    %c0_12 = arith.constant 0 : index
    %7 = vector.load %arg1[%c0_10, %c1, %c0_11, %c0_12] : memref<1x3x236x236xf32, #tpu.memory_space<vmem>>, vector<1x1x236x236xf32>
    %8 = vector.shape_cast %7 : vector<1x1x236x236xf32> to vector<236x236xf32>
    %c0_13 = arith.constant 0 : index
    %c0_14 = arith.constant 0 : index
    %9 = vector.load %arg2[%c0_13, %c0_14] : memref<112x236xf32, #tpu.memory_space<vmem>>, vector<112x236xf32>
    %cst_15 = arith.constant dense<0.000000e+00> : vector<112x236xf32>
    %10 = tpu.matmul %9, %8, %cst_15 {dimension_numbers = #tpu.dot_dimension_numbers<[1], [0], [0], [1], [0, 0, 1, 1], [], []>} : vector<112x236xf32>, vector<236x236xf32>, vector<112x236xf32> -> vector<112x236xf32>
    %c0_16 = arith.constant 0 : index
    %c0_17 = arith.constant 0 : index
    %11 = vector.load %arg3[%c0_16, %c0_17] : memref<236x112xf32, #tpu.memory_space<vmem>>, vector<236x112xf32>
    %cst_18 = arith.constant dense<0.000000e+00> : vector<112x112xf32>
    %12 = tpu.matmul %10, %11, %cst_18 {dimension_numbers = #tpu.dot_dimension_numbers<[1], [0], [0], [1], [0, 0, 1, 1], [], []>} : vector<112x236xf32>, vector<236x112xf32>, vector<112x112xf32> -> vector<112x112xf32>
    %c112 = arith.constant 112 : index
    %c0_19 = arith.constant 0 : index
    %13 = vector.load %arg9[%c112, %c0_19] : memref<336x112xf32, #tpu.memory_space<vmem>>, vector<112x112xf32>
    tpu.vector_store %arg9[%c112, %c0_19], %12 {strides = array<i32>} : memref<336x112xf32, #tpu.memory_space<vmem>>, vector<112x112xf32>,
    %c0_20 = arith.constant 0 : index
    %c2 = arith.constant 2 : index
    %c0_21 = arith.constant 0 : index
    %c0_22 = arith.constant 0 : index
    %14 = vector.load %arg1[%c0_20, %c2, %c0_21, %c0_22] : memref<1x3x236x236xf32, #tpu.memory_space<vmem>>, vector<1x1x236x236xf32>
    %15 = vector.shape_cast %14 : vector<1x1x236x236xf32> to vector<236x236xf32>
    %c0_23 = arith.constant 0 : index
    %c0_24 = arith.constant 0 : index
    %16 = vector.load %arg2[%c0_23, %c0_24] : memref<112x236xf32, #tpu.memory_space<vmem>>, vector<112x236xf32>
    %cst_25 = arith.constant dense<0.000000e+00> : vector<112x236xf32>
    %17 = tpu.matmul %16, %15, %cst_25 {dimension_numbers = #tpu.dot_dimension_numbers<[1], [0], [0], [1], [0, 0, 1, 1], [], []>} : vector<112x236xf32>, vector<236x236xf32>, vector<112x236xf32> -> vector<112x236xf32>
    %c0_26 = arith.constant 0 : index
    %c0_27 = arith.constant 0 : index
    %18 = vector.load %arg3[%c0_26, %c0_27] : memref<236x112xf32, #tpu.memory_space<vmem>>, vector<236x112xf32>
    %cst_28 = arith.constant dense<0.000000e+00> : vector<112x112xf32>
    %19 = tpu.matmul %17, %18, %cst_28 {dimension_numbers = #tpu.dot_dimension_numbers<[1], [0], [0], [1], [0, 0, 1, 1], [], []>} : vector<112x236xf32>, vector<236x112xf32>, vector<112x112xf32> -> vector<112x112xf32>
    %c224 = arith.constant 224 : index
    %c0_29 = arith.constant 0 : index
    %20 = vector.load %arg9[%c224, %c0_29] : memref<336x112xf32, #tpu.memory_space<vmem>>, vector<112x112xf32>
    tpu.vector_store %arg9[%c224, %c0_29], %19 {strides = array<i32>} : memref<336x112xf32, #tpu.memory_space<vmem>>, vector<112x112xf32>,
    %c0_30 = arith.constant 0 : index
    %c0_31 = arith.constant 0 : index
    %21 = vector.load %arg9[%c0_30, %c0_31] : memref<336x112xf32, #tpu.memory_space<vmem>>, vector<336x112xf32>
    %22 = arith.truncf %21 : vector<336x112xf32> to vector<336x112xbf16>
    %c0_32 = arith.constant 0 : index
    %c0_33 = arith.constant 0 : index
    %23 = vector.load %arg4[%c0_32, %c0_33] : memref<112x512xbf16, #tpu.memory_space<vmem>>, vector<112x512xbf16>
    %cst_34 = arith.constant dense<0.000000e+00> : vector<336x512xf32>
    %24 = tpu.matmul %22, %23, %cst_34 {dimension_numbers = #tpu.dot_dimension_numbers<[1], [0], [0], [1], [0, 0, 1, 1], [], []>} : vector<336x112xbf16>, vector<112x512xbf16>, vector<336x512xf32> -> vector<336x512xf32>
    %c0_35 = arith.constant 0 : index
    %c0_36 = arith.constant 0 : index
    %25 = vector.load %arg5[%c0_35, %c0_36] : memref<1x512xf32, #tpu.memory_space<vmem>>, vector<1x512xf32>
    %26 = vector.broadcast %25 : vector<1x512xf32> to vector<336x512xf32>
    %27 = arith.addf %24, %26 : vector<336x512xf32>
    %cst_37 = arith.constant 0.000000e+00 : f32
    %28 = vector.broadcast %cst_37 : f32 to vector<336x512xf32>
    %29 = arith.maximumf %27, %28 : vector<336x512xf32>
    %cst_38 = arith.constant dense<0.000000e+00> : vector<512xf32>
    %30 = vector.multi_reduction <add>, %29, %cst_38 [0] : vector<336x512xf32> to vector<512xf32>
    %31 = vector.shape_cast %30 : vector<512xf32> to vector<1x512xf32>
    %cst_39 = arith.constant 3.360000e+02 : f32
    %32 = vector.broadcast %cst_39 : f32 to vector<1x512xf32>
    %33 = arith.divf %31, %32 : vector<1x512xf32>
    %34 = arith.truncf %33 : vector<1x512xf32> to vector<1x512xbf16>
    %c0_40 = arith.constant 0 : index
    %c0_41 = arith.constant 0 : index
    %35 = vector.load %arg6[%c0_40, %c0_41] : memref<512x512xbf16, #tpu.memory_space<vmem>>, vector<512x512xbf16>
    %cst_42 = arith.constant dense<0.000000e+00> : vector<1x512xf32>
    %36 = tpu.matmul %34, %35, %cst_42 {dimension_numbers = #tpu.dot_dimension_numbers<[1], [0], [0], [1], [0, 0, 1, 1], [], []>} : vector<1x512xbf16>, vector<512x512xbf16>, vector<1x512xf32> -> vector<1x512xf32>
    %c0_43 = arith.constant 0 : index
    %c0_44 = arith.constant 0 : index
    %37 = vector.load %arg7[%c0_43, %c0_44] : memref<1x512xf32, #tpu.memory_space<vmem>>, vector<1x512xf32>
    %38 = arith.addf %36, %37 : vector<1x512xf32>
    %39 = arith.mulf %38, %38 : vector<1x512xf32>
    %cst_45 = arith.constant dense<0.000000e+00> : vector<1xf32>
    %40 = vector.multi_reduction <add>, %39, %cst_45 [1] : vector<1x512xf32> to vector<1xf32>
    %41 = vector.shape_cast %40 : vector<1xf32> to vector<1x1xf32>
    %cst_46 = arith.constant 9.99999996E-13 : f32
    %42 = vector.broadcast %cst_46 : f32 to vector<1x1xf32>
    %43 = arith.addf %41, %42 : vector<1x1xf32>
    %44 = math.rsqrt %43 : vector<1x1xf32>
    %45 = vector.broadcast %44 : vector<1x1xf32> to vector<1x512xf32>
    %46 = arith.mulf %38, %45 : vector<1x512xf32>
    %c0_47 = arith.constant 0 : index
    %c0_48 = arith.constant 0 : index
    %c0_49 = arith.constant 0 : index
    %47 = vector.load %arg8[%c0_47, %c0_48, %c0_49] : memref<1x1x512xf32, #tpu.memory_space<vmem>>, vector<1x1x512xf32>
    %48 = vector.shape_cast %47 : vector<1x1x512xf32> to vector<1x512xf32>
    %49 = vector.shape_cast %46 : vector<1x512xf32> to vector<1x1x512xf32>
    tpu.vector_store %arg8[%c0_47, %c0_48, %c0_49], %49 {strides = array<i32>} : memref<1x1x512xf32, #tpu.memory_space<vmem>>, vector<1x1x512xf32>,
    return
  }
  func.func @transform_0(%arg0: i32) -> (i32, i32, i32, i32) {
    %c0_i32 = arith.constant 0 : i32
    %c0_i32_0 = arith.constant 0 : i32
    %c0_i32_1 = arith.constant 0 : i32
    %c0_i32_2 = arith.constant 0 : i32
    return %arg0, %c0_i32, %c0_i32_0, %c0_i32_1 : i32, i32, i32, i32
  }
  func.func @transform_1(%arg0: i32) -> (i32, i32) {
    %c0_i32 = arith.constant 0 : i32
    %c0_i32_0 = arith.constant 0 : i32
    %c0_i32_1 = arith.constant 0 : i32
    return %c0_i32, %c0_i32_0 : i32, i32
  }
  func.func @transform_2(%arg0: i32) -> (i32, i32) {
    %c0_i32 = arith.constant 0 : i32
    %c0_i32_0 = arith.constant 0 : i32
    %c0_i32_1 = arith.constant 0 : i32
    return %c0_i32, %c0_i32_0 : i32, i32
  }
  func.func @transform_3(%arg0: i32) -> (i32, i32) {
    %c0_i32 = arith.constant 0 : i32
    %c0_i32_0 = arith.constant 0 : i32
    %c0_i32_1 = arith.constant 0 : i32
    return %c0_i32, %c0_i32_0 : i32, i32
  }
  func.func @transform_4(%arg0: i32) -> (i32, i32) {
    %c0_i32 = arith.constant 0 : i32
    %c0_i32_0 = arith.constant 0 : i32
    %c0_i32_1 = arith.constant 0 : i32
    return %c0_i32, %c0_i32_0 : i32, i32
  }
  func.func @transform_5(%arg0: i32) -> (i32, i32) {
    %c0_i32 = arith.constant 0 : i32
    %c0_i32_0 = arith.constant 0 : i32
    %c0_i32_1 = arith.constant 0 : i32
    return %c0_i32, %c0_i32_0 : i32, i32
  }
  func.func @transform_6(%arg0: i32) -> (i32, i32) {
    %c0_i32 = arith.constant 0 : i32
    %c0_i32_0 = arith.constant 0 : i32
    %c0_i32_1 = arith.constant 0 : i32
    return %c0_i32, %c0_i32_0 : i32, i32
  }
  func.func @transform_7(%arg0: i32) -> (i32, i32, i32) {
    %c0_i32 = arith.constant 0 : i32
    %c0_i32_0 = arith.constant 0 : i32
    %c0_i32_1 = arith.constant 0 : i32
    return %arg0, %c0_i32, %c0_i32_0 : i32, i32, i32
  }
}

</mosaic_0001>

<bundles_post_ra>
// kernel: id_loss_forward.1
= control target key start
LH: loop header
LB: loop body
LE: loop exit
PB: predicated region body
PF: predicated region fallthrough
CT: control target
= control target key end

     0   :  { %s5428_s24 = smov 0   ;;  %s8105_s0 = inlined_call_operand.vmem [shape: f32[4,3,236,236], index: 0, kind: input, shape index: {}]   ;;  %s8106_s1 = inlined_call_operand.vmem [shape: f32[112,236], index: 1, kind: input, shape index: {}]   ;;  %s8107_s2 = inlined_call_operand.vmem [shape: f32[236,112], index: 2, kind: input, shape index: {}]   ;;  %s8108_s3 = inlined_call_operand.vmem [shape: bf16[112,512], index: 3, kind: input, shape index: {}]   ;;  %s8109_s4 = inlined_call_operand.vmem [shape: f32[1,512], index: 4, kind: input, shape index: {}]   ;;  %s8110_s5 = inlined_call_operand.vmem [shape: bf16[512,512], index: 5, kind: input, shape index: {}]   ;;  %s8111_s6 = inlined_call_operand.vmem [shape: f32[1,512], index: 6, kind: input, shape index: {}]   ;;  %s8112_s7 = inlined_call_operand.vmem [shape: f32[4,1,512], index: 7, kind: output, shape index: {}]  }
   0x1 LB: > { %s4237_s25 = sadd.s32 4294967295, %s5385_s24   ;;  %p4241_p0 = scmp.ge.s32.totalorder %s5385_s24, 1  ;;  %s5385_s24 = sphi %s5428_s24, %s17_s24  }
   0x2   : > { %p237_p1 = scmp.lt.s32.totalorder %s5385_s24, 5 }
   0x4   : > { %p238_p2 = pnand %p4241_p0, %p237_p1 }
   0x5   : > { %p268_p3 = scmp.lt.s32.totalorder (!%p238_p2), %s4237_s25, 3 }
   0x6   : > { %241 = sbr.rel (%p238_p2) target bundleno = 1645 (0x66d), region = 48 }
   0xb   : > { %s8114_s25 = smov (!%p268_p3, %s4237_s25), 3  ;;  %vm409_vm0 = vcmask 1043456   ;;  %v5503_v54 = vld [vmem:[%s8106_s1 + $0x8] sm:$0xff]  ;;  %vm366_vm1 = vcmask 883712   ;;  %v5511_v58 = vld [vmem:[%s8106_s1] sm:$0xff]  ;;  %v5523_v62 = vld [vmem:[%s8106_s1 + $0x18] sm:$0xff] }
   0xc   : > { %s5365_s26 = smul.u32 1440, %s8114_s25  ;;  %v5530_v63 = vld [vmem:[%s8106_s1 + $0x10] sm:$0xff]  ;;  %vm845_vm2 = vcmask 916480   ;;  %vm4141_vm4 = vcmask 1040384   ;;  %s4243_s19 = sshll.u32 %s8114_s25, 2  ;;  %vm4174_vm8 = vcmask 1042434  }
   0xd   : > { %vm4176_vm9 = vcmask 1041408   ;;  %s276_s22 = scalar_lea.vmem %s8112_s7, %s4243_s19 }
   0xe   : > { %s5442_s29 = scalar_lea.vmem %s8105_s0, %s5365_s26 }
   0xf   : > { %v309_v0 = vld [vmem:[%s5442_s29 + $0xf8] sm:$0xff]  ;;  %v307_v1 = vld [vmem:[%s5442_s29 + $0xe8] sm:$0xff]  ;;  %v308_v3 = vld [vmem:[%s5442_s29 + $0xf0] sm:$0xff] }
  0x10   : > { %534 = vmatpush.msra.mxu2 %v309_v0  ;;  %v337_v2 = vld [vmem:[%s5442_s29 + $0x1d8] sm:$0xf]  ;;  %416 = vmatpush.msra.mxu0 %v308_v3  ;;  %v335_v5 = vld [vmem:[%s5442_s29 + $0x1c8] sm:$0xff]  ;;  %v306_v6 = vld [vmem:[%s5442_s29 + $0xe0] sm:$0xff] }
  0x11   : > { %v305_v4 = vld [vmem:[%s5442_s29 + $0xd8] sm:$0xff]  ;;  %4259 = vmatpush.msk.msra.mxu3 %vm409_vm0, %v337_v2  ;;  %v304_v8 = vld [vmem:[%s5442_s29 + $0xd0] sm:$0xff]  ;;  %v303_v9 = vld [vmem:[%s5442_s29 + $0xc8] sm:$0xff] }
  0x12   : > { %535 = vmatpush.msra.mxu2 %v307_v1  ;;  %v333_v7 = vld [vmem:[%s5442_s29 + $0x1b8] sm:$0xff]  ;;  %417 = vmatpush.msra.mxu0 %v306_v6  ;;  %v331_v10 = vld [vmem:[%s5442_s29 + $0x1a8] sm:$0xff]  ;;  %v302_v11 = vld [vmem:[%s5442_s29 + $0xc0] sm:$0xff] }
  0x13   : > { %596 = vmatpush.msra.mxu3 %v335_v5  ;;  %v301_v12 = vld [vmem:[%s5442_s29 + $0xb8] sm:$0xff]  ;;  %v336_v13 = vld [vmem:[%s5442_s29 + $0x1d0] sm:$0xf]  ;;  %v299_v16 = vld [vmem:[%s5442_s29 + $0xa8] sm:$0xff] }
  0x14   : > { %536 = vmatpush.msra.mxu2 %v305_v4  ;;  %418 = vmatpush.msra.mxu0 %v304_v8  ;;  %v329_v14 = vld [vmem:[%s5442_s29 + $0x198] sm:$0xff]  ;;  %v300_v15 = vld [vmem:[%s5442_s29 + $0xb0] sm:$0xff]  ;;  %v334_v17 = vld [vmem:[%s5442_s29 + $0x1c0] sm:$0xff] }
  0x15   : > { %597 = vmatpush.msra.mxu3 %v333_v7  ;;  %4244 = vmatpush.msk.msra.mxu1 %vm409_vm0, %v336_v13  ;;  %v327_v18 = vld [vmem:[%s5442_s29 + $0x188] sm:$0xff]  ;;  %v298_v19 = vld [vmem:[%s5442_s29 + $0xa0] sm:$0xff]  ;;  %v332_v20 = vld [vmem:[%s5442_s29 + $0x1b0] sm:$0xff] }
  0x16   : > { %537 = vmatpush.msra.mxu2 %v303_v9  ;;  %419 = vmatpush.msra.mxu0 %v302_v11  ;;  %v297_v21 = vld [vmem:[%s5442_s29 + $0x98] sm:$0xff]  ;;  %v330_v22 = vld [vmem:[%s5442_s29 + $0x1a0] sm:$0xff]  ;;  %v296_v24 = vld [vmem:[%s5442_s29 + $0x90] sm:$0xff] }
  0x17   : > { %598 = vmatpush.msra.mxu3 %v331_v10  ;;  %478 = vmatpush.msra.mxu1 %v334_v17  ;;  %v325_v23 = vld [vmem:[%s5442_s29 + $0x178] sm:$0xff]  ;;  %v295_v25 = vld [vmem:[%s5442_s29 + $0x88] sm:$0xff]  ;;  %v328_v26 = vld [vmem:[%s5442_s29 + $0x190] sm:$0xff] }
  0x18   : > { %538 = vmatpush.msra.mxu2 %v301_v12  ;;  %420 = vmatpush.msra.mxu0 %v300_v15  ;;  %v323_v27 = vld [vmem:[%s5442_s29 + $0x168] sm:$0xff]  ;;  %v294_v28 = vld [vmem:[%s5442_s29 + $0x80] sm:$0xff]  ;;  %v293_v29 = vld [vmem:[%s5442_s29 + $0x78] sm:$0xff] }
  0x19   : > { %599 = vmatpush.msra.mxu3 %v329_v14  ;;  %479 = vmatpush.msra.mxu1 %v332_v20  ;;  %v326_v30 = vld [vmem:[%s5442_s29 + $0x180] sm:$0xff]  ;;  %v321_v31 = vld [vmem:[%s5442_s29 + $0x158] sm:$0xff]  ;;  %v292_v32 = vld [vmem:[%s5442_s29 + $0x70] sm:$0xff] }
  0x1a   : > { %539 = vmatpush.msra.mxu2 %v299_v16  ;;  %421 = vmatpush.msra.mxu0 %v298_v19  ;;  %v291_v33 = vld [vmem:[%s5442_s29 + $0x68] sm:$0xff]  ;;  %v324_v34 = vld [vmem:[%s5442_s29 + $0x170] sm:$0xff]  ;;  %v290_v36 = vld [vmem:[%s5442_s29 + $0x60] sm:$0xff] }
  0x1b   : > { %600 = vmatpush.msra.mxu3 %v327_v18  ;;  %480 = vmatpush.msra.mxu1 %v330_v22  ;;  %v319_v35 = vld [vmem:[%s5442_s29 + $0x148] sm:$0xff]  ;;  %v289_v37 = vld [vmem:[%s5442_s29 + $0x58] sm:$0xff]  ;;  %v322_v38 = vld [vmem:[%s5442_s29 + $0x160] sm:$0xff] }
  0x1c   : > { %540 = vmatpush.msra.mxu2 %v297_v21  ;;  %422 = vmatpush.msra.mxu0 %v296_v24  ;;  %v317_v39 = vld [vmem:[%s5442_s29 + $0x138] sm:$0xff]  ;;  %v288_v40 = vld [vmem:[%s5442_s29 + $0x50] sm:$0xff]  ;;  %v287_v41 = vld [vmem:[%s5442_s29 + $0x48] sm:$0xff] }
  0x1d   : > { %601 = vmatpush.msra.mxu3 %v325_v23  ;;  %481 = vmatpush.msra.mxu1 %v328_v26  ;;  %v320_v42 = vld [vmem:[%s5442_s29 + $0x150] sm:$0xff]  ;;  %v315_v43 = vld [vmem:[%s5442_s29 + $0x128] sm:$0xff]  ;;  %v286_v44 = vld [vmem:[%s5442_s29 + $0x40] sm:$0xff] }
  0x1e   : > { %541 = vmatpush.msra.mxu2 %v295_v25  ;;  %423 = vmatpush.msra.mxu0 %v294_v28  ;;  %v285_v45 = vld [vmem:[%s5442_s29 + $0x38] sm:$0xff]  ;;  %v318_v46 = vld [vmem:[%s5442_s29 + $0x140] sm:$0xff]  ;;  %v284_v48 = vld [vmem:[%s5442_s29 + $0x30] sm:$0xff] }
  0x1f   : > { %602 = vmatpush.msra.mxu3 %v323_v27  ;;  %482 = vmatpush.msra.mxu1 %v326_v30  ;;  %v313_v47 = vld [vmem:[%s5442_s29 + $0x118] sm:$0xff]  ;;  %v283_v49 = vld [vmem:[%s5442_s29 + $0x28] sm:$0xff]  ;;  %v316_v50 = vld [vmem:[%s5442_s29 + $0x130] sm:$0xff] }
  0x20   : > { %542 = vmatpush.msra.mxu2 %v293_v29  ;;  %424 = vmatpush.msra.mxu0 %v292_v32  ;;  %v311_v51 = vld [vmem:[%s5442_s29 + $0x108] sm:$0xff]  ;;  %v282_v52 = vld [vmem:[%s5442_s29 + $0x20] sm:$0xff]  ;;  %v281_v53 = vld [vmem:[%s5442_s29 + $0x18] sm:$0xff] }
  0x21   : > { %603 = vmatpush.msra.mxu3 %v321_v31  ;;  %483 = vmatpush.msra.mxu1 %v324_v34  ;;  %v280_v55 = vld [vmem:[%s5442_s29 + $0x10] sm:$0xff]  ;;  %v314_v56 = vld [vmem:[%s5442_s29 + $0x120] sm:$0xff]  ;;  %v279_v57 = vld [vmem:[%s5442_s29 + $0x8] sm:$0xff] }
  0x22   : > { %543 = vmatpush.msra.mxu2 %v291_v33  ;;  %425 = vmatpush.msra.mxu0 %v290_v36  ;;  %v278_v59 = vld [vmem:[%s5442_s29] sm:$0xff]  ;;  %v312_v60 = vld [vmem:[%s5442_s29 + $0x110] sm:$0xff]  ;;  %v681_v0 = vld [vmem:[%s8107_s2 + $0xe8] sm:$0xf] }
  0x23   : > { %604 = vmatpush.msra.mxu3 %v319_v35  ;;  %484 = vmatpush.msra.mxu1 %v322_v38  ;;  %v310_v61 = vld [vmem:[%s5442_s29 + $0x100] sm:$0xff]  ;;  %v5542_v1 = vld [vmem:[%s8106_s1 + $0x28] sm:$0xff]  ;;  %v5558_v3 = vld [vmem:[%s8107_s2 + $0x78] sm:$0xff] }
  0x24   : > { %544 = vmatpush.msra.mxu2 %v289_v37  ;;  %426 = vmatpush.msra.mxu0 %v288_v40  ;;  %v5550_v2 = vld [vmem:[%s8106_s1 + $0x20] sm:$0xff]  ;;  %v5570_v5 = vld [vmem:[%s8106_s1 + $0x38] sm:$0xff]  ;;  %v5578_v6 = vld [vmem:[%s8106_s1 + $0x30] sm:$0xff] }
  0x25   : > { %605 = vmatpush.msra.mxu3 %v317_v39  ;;  %485 = vmatpush.msra.mxu1 %v320_v42  ;;  %v5565_v4 = vld [vmem:[%s8107_s2 + $0xe0] sm:$0xff]  ;;  %v5586_v7 = vld [vmem:[%s8107_s2 + $0x70] sm:$0xff]  ;;  %v5593_v8 = vld [vmem:[%s8107_s2 + $0xd8] sm:$0xff] }
  0x26   : > { %545 = vmatpush.msra.mxu2 %v287_v41  ;;  %427 = vmatpush.msra.mxu0 %v286_v44  ;;  %v5598_v9 = vld [vmem:[%s8106_s1 + $0x48] sm:$0xff]  ;;  %v5606_v10 = vld [vmem:[%s8106_s1 + $0x40] sm:$0xff]  ;;  %v5621_v12 = vld [vmem:[%s8107_s2 + $0xd0] sm:$0xff] }
  0x27   : > { %606 = vmatpush.msra.mxu3 %v315_v43  ;;  %486 = vmatpush.msra.mxu1 %v318_v46  ;;  %v5614_v11 = vld [vmem:[%s8107_s2 + $0x68] sm:$0xff]  ;;  %v5626_v13 = vld [vmem:[%s8106_s1 + $0x58] sm:$0xff]  ;;  %v5634_v14 = vld [vmem:[%s8106_s1 + $0x50] sm:$0xff] }
  0x28   : > { %546 = vmatpush.msra.mxu2 %v285_v45  ;;  %428 = vmatpush.msra.mxu0 %v284_v48  ;;  %v5642_v15 = vld [vmem:[%s8107_s2 + $0x60] sm:$0xff]  ;;  %v5649_v16 = vld [vmem:[%s8107_s2 + $0xc8] sm:$0xff]  ;;  %v5670_v19 = vld [vmem:[%s8107_s2 + $0x58] sm:$0xff] }
  0x29   : > { %607 = vmatpush.msra.mxu3 %v313_v47  ;;  %487 = vmatpush.msra.mxu1 %v316_v50  ;;  %v5654_v17 = vld [vmem:[%s8106_s1 + $0x68] sm:$0xff]  ;;  %v5662_v18 = vld [vmem:[%s8106_s1 + $0x60] sm:$0xff]  ;;  %v4347_v20 = vld [vmem:[%s5442_s29 + $0x3b0] sm:$0xf] }
  0x2a   : > { %547 = vmatpush.msra.mxu2 %v283_v49  ;;  %429 = vmatpush.msra.mxu0 %v282_v52  ;;  %v5678_v21 = vld [vmem:[%s8107_s2 + $0xc0] sm:$0xff]  ;;  %v4319_v22 = vld [vmem:[%s5442_s29 + $0x2d0] sm:$0xff]  ;;  %v5685_v24 = vld [vmem:[%s8106_s1 + $0x78] sm:$0xff] }
  0x2b   : > { %608 = vmatpush.msra.mxu3 %v311_v51  ;;  %488 = vmatpush.msra.mxu1 %v314_v56  ;;  %v4345_v23 = vld [vmem:[%s5442_s29 + $0x3a0] sm:$0xff]  ;;  %v5694_v25 = vld [vmem:[%s8106_s1 + $0x70] sm:$0xff]  ;;  %v5710_v29 = vld [vmem:[%s8106_s1 + $0x88] sm:$0xff] }
  0x2c   : > { %548 = vmatpush.msra.mxu2 %v281_v53  ;;  %4260 = vmatmul.msk.f32.vlgmr.msra.gmra.mxu3 %vm366_vm1, %v5503_v54  ;;  %v5702_v26 = vld [vmem:[%s8107_s2 + $0x50] sm:$0xff]  ;;  %v4317_v27 = vld [vmem:[%s5442_s29 + $0x2c0] sm:$0xff]  ;;  %v5718_v32 = vld [vmem:[%s8107_s2 + $0x48] sm:$0xff] }
  0x2d   : > { %430 = vmatpush.msra.mxu0 %v280_v55  ;;  %489 = vmatpush.msra.mxu1 %v312_v60  ;;  %v4343_v28 = vld [vmem:[%s5442_s29 + $0x390] sm:$0xff]  ;;  %v4341_v31 = vld [vmem:[%s5442_s29 + $0x380] sm:$0xff]  ;;  %v5723_v33 = vld [vmem:[%s8107_s2 + $0xb8] sm:$0xff] }
  0x2e   : > { %549 = vmatpush.msra.mxu2 %v279_v57  ;;  %4274 = vmatpush.msk.msrb.mxu3 %vm409_vm0, %v681_v0  ;;  %v4315_v30 = vld [vmem:[%s5442_s29 + $0x2b0] sm:$0xff]  ;;  %v4313_v34 = vld [vmem:[%s5442_s29 + $0x2a0] sm:$0xff]  ;;  %v5748_v42 = vld [vmem:[%s8106_s1 + $0x98] sm:$0xff] }
  0x2f   : > { %550 = vmatmul.f32.vlgmr.msra.gmra.mxu2 %v5511_v58  ;;  %431 = vmatpush.msra.mxu0 %v278_v59  ;;  %v4339_v35 = vld [vmem:[%s5442_s29 + $0x370] sm:$0xff]  ;;  %v5734_v36 = vld [vmem:[%s8106_s1 + $0x80] sm:$0xff]  ;;  %v5781_v55 = vld [vmem:[%s8107_s2 + $0x38] sm:$0xff] }
  0x30   : > { %432 = vmatmul.f32.vlgmr.msra.gmra.mxu0 %v5511_v58  ;;  %490 = vmatpush.msra.mxu1 %v310_v61  ;;  %v4311_v37 = vld [vmem:[%s5442_s29 + $0x290] sm:$0xff]  ;;  %v4337_v38 = vld [vmem:[%s5442_s29 + $0x360] sm:$0xff]  ;;  %v5786_v56 = vld [vmem:[%s8106_s1 + $0xa8] sm:$0xff] }
  0x31   : > { %4245 = vmatmul.msk.f32.vlgmr.msra.gmra.mxu1 %vm366_vm1, %v5503_v54  ;;  %789 = vmatpush.msrb.mxu3 %v5565_v4  ;;  %v4309_v39 = vld [vmem:[%s5442_s29 + $0x280] sm:$0xff]  ;;  %v4335_v40 = vld [vmem:[%s5442_s29 + $0x350] sm:$0xff]  ;;  %v673_v59 = vld [vmem:[%s8107_s2 + $0xa8] sm:$0xff] }
  0x32   : > { %727 = vmatpush.msrb.mxu1 %v5558_v3  ;;  %4349 = vmatpush.msk.msrb.mxu2 %vm409_vm0, %v4347_v20  ;;  %v4307_v41 = vld [vmem:[%s5442_s29 + $0x270] sm:$0xff]  ;;  %v4333_v43 = vld [vmem:[%s5442_s29 + $0x340] sm:$0xff] }
  0x33   : > { %790 = vmatpush.msrb.mxu3 %v5593_v8  ;;  %997 = vmatpush.msrb.mxu0 %v4319_v22  ;;  %v5754_v44 = vld [vmem:[%s8107_s2 + $0x40] sm:$0xff]  ;;  %v674_v46 = vld [vmem:[%s8107_s2 + $0xb0] sm:$0xff] }
  0x34   : > { %4261 = vmatmul.msk.f32.gmra.mxu3 %vm366_vm1, %v5523_v62  ;;  %728 = vmatpush.msrb.mxu1 %v5586_v7  ;;  %v4305_v45 = vld [vmem:[%s5442_s29 + $0x260] sm:$0xff]  ;;  %v4331_v47 = vld [vmem:[%s5442_s29 + $0x330] sm:$0xff] }
  0x35   : > { %791 = vmatpush.msrb.mxu3 %v5621_v12  ;;  %1059 = vmatpush.msrb.mxu2 %v4345_v23  ;;  %v5767_v48 = vld [vmem:[%s8106_s1 + $0x90] sm:$0xff]  ;;  %v4329_v50 = vld [vmem:[%s5442_s29 + $0x320] sm:$0xff] }
  0x36   : > { %729 = vmatpush.msrb.mxu1 %v5614_v11  ;;  %998 = vmatpush.msrb.mxu0 %v4317_v27  ;;  %v4303_v49 = vld [vmem:[%s5442_s29 + $0x250] sm:$0xff]  ;;  %v4301_v51 = vld [vmem:[%s5442_s29 + $0x240] sm:$0xff] }
  0x37   : > { %553 = vmatmul.f32.gmra.mxu2 %v5530_v63  ;;  %792 = vmatpush.msrb.mxu3 %v5649_v16  ;;  %v4327_v52 = vld [vmem:[%s5442_s29 + $0x310] sm:$0xff]  ;;  %v4325_v57 = vld [vmem:[%s5442_s29 + $0x300] sm:$0xff] }
  0x38   : > { %435 = vmatmul.f32.gmra.mxu0 %v5530_v63  ;;  %730 = vmatpush.msrb.mxu1 %v5642_v15  ;;  %v4299_v53 = vld [vmem:[%s5442_s29 + $0x230] sm:$0xff]  ;;  %v4297_v60 = vld [vmem:[%s5442_s29 + $0x220] sm:$0xff] }
  0x39   : > { %4246 = vmatmul.msk.f32.gmra.mxu1 %vm366_vm1, %v5523_v62  ;;  %793 = vmatpush.msrb.mxu3 %v5678_v21  ;;  %v4323_v61 = vld [vmem:[%s5442_s29 + $0x2f0] sm:$0xff]  ;;  %v5800_v0 = vld [vmem:[%s8106_s1 + $0xa0] sm:$0xff] }
  0x3a   : > { %731 = vmatpush.msrb.mxu1 %v5670_v19  ;;  %1060 = vmatpush.msrb.mxu2 %v4343_v28  ;;  %v4295_v20 = vld [vmem:[%s5442_s29 + $0x210] sm:$0xff]  ;;  %v4321_v22 = vld [vmem:[%s5442_s29 + $0x2e0] sm:$0xff] }
  0x3b   : > { %794 = vmatpush.msrb.mxu3 %v5723_v33  ;;  %999 = vmatpush.msrb.mxu0 %v4315_v30  ;;  %v4293_v23 = vld [vmem:[%s5442_s29 + $0x200] sm:$0xff]  ;;  %v658_v27 = vld [vmem:[%s8107_s2 + $0x30] sm:$0xff] }
  0x3c   : > { %4262 = vmatmul.msk.f32.gmra.mxu3 %vm366_vm1, %v5542_v1  ;;  %732 = vmatpush.msrb.mxu1 %v5702_v26  ;;  %v4291_v28 = vld [vmem:[%s5442_s29 + $0x1f0] sm:$0xff]  ;;  %v672_v30 = vld [vmem:[%s8107_s2 + $0xa0] sm:$0xff] }
  0x3d   : > { %1061 = vmatpush.msrb.mxu2 %v4341_v31  ;;  %1000 = vmatpush.msrb.mxu0 %v4313_v34  ;;  %v5819_v31 = vld [vmem:[%s8106_s1 + $0xb8] sm:$0xff]  ;;  %v4289_v34 = vld [vmem:[%s5442_s29 + $0x1e0] sm:$0xff] }
  0x3e   : > { %733 = vmatpush.msrb.mxu1 %v5718_v32  ;;  %795 = vmatpush.msrb.mxu3 %v674_v46  ;;  %v4348_v46 = vld [vmem:[%s5442_s29 + $0x3b8] sm:$0xf] }
  0x3f   : > { %556 = vmatmul.f32.gmra.mxu2 %v5550_v2  ;;  %1001 = vmatpush.msrb.mxu0 %v4311_v37  ;;  %v657_v37 = vld [vmem:[%s8107_s2 + $0x28] sm:$0xff] }
  0x40   : > { %438 = vmatmul.f32.gmra.mxu0 %v5550_v2  ;;  %1062 = vmatpush.msrb.mxu2 %v4339_v35  ;;  %v5827_v35 = vld [vmem:[%s8106_s1 + $0xb0] sm:$0xff] }
  0x41   : > { %4247 = vmatmul.msk.f32.gmra.mxu1 %vm366_vm1, %v5542_v1  ;;  %1002 = vmatpush.msrb.mxu0 %v4309_v39  ;;  %v5843_v39 = vld [vmem:[%s8106_s1 + $0xc8] sm:$0xff] }
  0x42   : > { %1063 = vmatpush.msrb.mxu2 %v4337_v38  ;;  %734 = vmatpush.msrb.mxu1 %v5754_v44  ;;  %v671_v38 = vld [vmem:[%s8107_s2 + $0x98] sm:$0xff] }
  0x43   : > { %1003 = vmatpush.msrb.mxu0 %v4307_v41  ;;  %796 = vmatpush.msrb.mxu3 %v673_v59  ;;  %v668_v41 = vld [vmem:[%s8107_s2 + $0x80] sm:$0xff] }
  0x44   : > { %4263 = vmatmul.msk.f32.gmra.mxu3 %vm366_vm1, %v5570_v5  ;;  %1064 = vmatpush.msrb.mxu2 %v4335_v40  ;;  %v5869_v40 = vld [vmem:[%s8106_s1 + $0xd8] sm:$0xff] }
  0x45   : > { %1004 = vmatpush.msrb.mxu0 %v4305_v45  ;;  %735 = vmatpush.msrb.mxu1 %v5781_v55  ;;  %v652_v45 = vld [vmem:[%s8107_s2] sm:$0xff] }
  0x46   : > { %1065 = vmatpush.msrb.mxu2 %v4333_v43  ;;  %797 = vmatpush.msrb.mxu3 %v672_v30  ;;  %v5887_v43 = vld [vmem:[%s8106_s1 + $0xd0] sm:$0xff] }
  0x47   : > { %559 = vmatmul.f32.gmra.mxu2 %v5578_v6  ;;  %1005 = vmatpush.msrb.mxu0 %v4303_v49 }
  0x48   : > { %441 = vmatmul.f32.gmra.mxu0 %v5578_v6  ;;  %1066 = vmatpush.msrb.mxu2 %v4331_v47 }
  0x49   : > { %4248 = vmatmul.msk.f32.gmra.mxu1 %vm366_vm1, %v5570_v5  ;;  %1006 = vmatpush.msrb.mxu0 %v4301_v51 }
  0x4a   : > { %1067 = vmatpush.msrb.mxu2 %v4329_v50  ;;  %736 = vmatpush.msrb.mxu1 %v658_v27 }
  0x4b   : > { %1007 = vmatpush.msrb.mxu0 %v4299_v53  ;;  %798 = vmatpush.msrb.mxu3 %v671_v38  ;;  %v4320_v53 = vld [vmem:[%s5442_s29 + $0x2d8] sm:$0xff] }
  0x4c   : > { %4264 = vmatmul.msk.f32.gmra.mxu3 %vm366_vm1, %v5598_v9  ;;  %1068 = vmatpush.msrb.mxu2 %v4327_v52 }
  0x4d   : > { %1008 = vmatpush.msrb.mxu0 %v4297_v60  ;;  %737 = vmatpush.msrb.mxu1 %v657_v37 }
  0x4e   : > { %1069 = vmatpush.msrb.mxu2 %v4325_v57  ;;  %v4346_v57 = vld [vmem:[%s5442_s29 + $0x3a8] sm:$0xff] }
  0x4f   : > { %562 = vmatmul.f32.gmra.mxu2 %v5606_v10  ;;  %1009 = vmatpush.msrb.mxu0 %v4295_v20 }
  0x50   : > { %444 = vmatmul.f32.gmra.mxu0 %v5606_v10  ;;  %1070 = vmatpush.msrb.mxu2 %v4323_v61 }
  0x51   : > { %4249 = vmatmul.msk.f32.gmra.mxu1 %vm366_vm1, %v5598_v9  ;;  %1010 = vmatpush.msrb.mxu0 %v4293_v23  ;;  %v4318_v23 = vld [vmem:[%s5442_s29 + $0x2c8] sm:$0xff] }
  0x52   : > { %1071 = vmatpush.msrb.mxu2 %v4321_v22 }
  0x53   : > { %1011 = vmatpush.msrb.mxu0 %v4291_v28  ;;  %v4344_v28 = vld [vmem:[%s5442_s29 + $0x398] sm:$0xff] }
  0x54   : > { %4265 = vmatmul.msk.f32.gmra.mxu3 %vm366_vm1, %v5626_v13 }
  0x55   : > { %1012 = vmatpush.msrb.mxu0 %v4289_v34 }
  0x57   : > { %565 = vmatmul.f32.gmra.mxu2 %v5634_v14  ;;  %1308 = vmatpush.msra.mxu0 %v5558_v3  ;;  %v5852_v3 = vld [vmem:[%s8106_s1 + $0xc0] sm:$0xff] }
  0x58   : > { %447 = vmatmul.f32.gmra.mxu0 %v5634_v14 }
  0x59   : > { %4250 = vmatmul.msk.f32.gmra.mxu1 %vm366_vm1, %v5626_v13  ;;  %1309 = vmatpush.msra.mxu0 %v5586_v7  ;;  %v670_v7 = vld [vmem:[%s8107_s2 + $0x90] sm:$0xff] }
  0x5a   : > { %799 = vmatpush.msrb.mxu3 %v670_v7 }
  0x5b   : > { %1310 = vmatpush.msra.mxu0 %v5614_v11  ;;  %v656_v11 = vld [vmem:[%s8107_s2 + $0x20] sm:$0xff] }
  0x5c   : > { %4266 = vmatmul.msk.f32.gmra.mxu3 %vm366_vm1, %v5654_v17  ;;  %738 = vmatpush.msrb.mxu1 %v656_v11 }
  0x5d   : > { %1311 = vmatpush.msra.mxu0 %v5642_v15  ;;  %v669_v15 = vld [vmem:[%s8107_s2 + $0x88] sm:$0xff] }
  0x5e   : > { %800 = vmatpush.msrb.mxu3 %v669_v15 }
  0x5f   : > { %568 = vmatmul.f32.gmra.mxu2 %v5662_v18  ;;  %1312 = vmatpush.msra.mxu0 %v5670_v19  ;;  %v655_v19 = vld [vmem:[%s8107_s2 + $0x18] sm:$0xff] }
  0x60   : > { %450 = vmatmul.f32.gmra.mxu0 %v5662_v18  ;;  %739 = vmatpush.msrb.mxu1 %v655_v19 }
  0x61   : > { %4251 = vmatmul.msk.f32.gmra.mxu1 %vm366_vm1, %v5654_v17  ;;  %1313 = vmatpush.msra.mxu0 %v5702_v26  ;;  %v654_v26 = vld [vmem:[%s8107_s2 + $0x10] sm:$0xff] }
  0x62   : > { %801 = vmatpush.msrb.mxu3 %v668_v41  ;;  %740 = vmatpush.msrb.mxu1 %v654_v26 }
  0x63   : > { %1314 = vmatpush.msra.mxu0 %v5718_v32  ;;  %v653_v32 = vld [vmem:[%s8107_s2 + $0x8] sm:$0xff] }
  0x64   : > { %4267 = vmatmul.msk.f32.gmra.mxu3 %vm366_vm1, %v5685_v24  ;;  %741 = vmatpush.msrb.mxu1 %v653_v32 }
  0x65   : > { %1315 = vmatpush.msra.mxu0 %v5754_v44  ;;  %4364 = vmatpush.msk.msra.mxu3 %vm409_vm0, %v4348_v46 }
  0x66   : > { %742 = vmatpush.msrb.mxu1 %v652_v45 }
  0x67   : > { %571 = vmatmul.f32.gmra.mxu2 %v5694_v25  ;;  %1316 = vmatpush.msra.mxu0 %v5781_v55 }
  0x68   : > { %453 = vmatmul.f32.gmra.mxu0 %v5694_v25  ;;  %1115 = vmatpush.msra.mxu1 %v4320_v53 }
  0x69   : > { %4252 = vmatmul.msk.f32.gmra.mxu1 %vm366_vm1, %v5685_v24  ;;  %1317 = vmatpush.msra.mxu0 %v658_v27 }
  0x6a   : > { %1177 = vmatpush.msra.mxu3 %v4346_v57  ;;  %1116 = vmatpush.msra.mxu1 %v4318_v23 }
  0x6b   : > { %1318 = vmatpush.msra.mxu0 %v657_v37 }
  0x6c   : > { %4268 = vmatmul.msk.f32.gmra.mxu3 %vm366_vm1, %v5710_v29 }
  0x6d   : > { %1319 = vmatpush.msra.mxu0 %v656_v11  ;;  %1178 = vmatpush.msra.mxu3 %v4344_v28  ;;  %v4316_v11 = vld [vmem:[%s5442_s29 + $0x2b8] sm:$0xff] }
  0x6e   : > { %1117 = vmatpush.msra.mxu1 %v4316_v11 }
  0x6f   : > { %574 = vmatmul.f32.gmra.mxu2 %v5734_v36  ;;  %1320 = vmatpush.msra.mxu0 %v655_v19  ;;  %v4342_v19 = vld [vmem:[%s5442_s29 + $0x388] sm:$0xff] }
  0x70   : > { %456 = vmatmul.f32.gmra.mxu0 %v5734_v36  ;;  %1179 = vmatpush.msra.mxu3 %v4342_v19 }
  0x71   : > { %4253 = vmatmul.msk.f32.gmra.mxu1 %vm366_vm1, %v5710_v29  ;;  %1321 = vmatpush.msra.mxu0 %v654_v26  ;;  %v4314_v26 = vld [vmem:[%s5442_s29 + $0x2a8] sm:$0xff] }
  0x72   : > { %1118 = vmatpush.msra.mxu1 %v4314_v26  ;;  %v4306_v26 = vld [vmem:[%s5442_s29 + $0x268] sm:$0xff] }
  0x73   : > { %1322 = vmatpush.msra.mxu0 %v653_v32 }
  0x74   : > { %4269 = vmatmul.msk.f32.gmra.mxu3 %vm366_vm1, %v5748_v42 }
  0x75   : > { %1323 = vmatpush.msra.mxu0 %v652_v45 }
  0x77   : > { %577 = vmatmul.f32.gmra.mxu2 %v5767_v48 }
  0x78   : > { %459 = vmatmul.f32.gmra.mxu0 %v5767_v48 }
  0x79   : > { %4254 = vmatmul.msk.f32.gmra.mxu1 %vm366_vm1, %v5748_v42 }
  0x7c   : > { %4270 = vmatmul.msk.f32.gmra.mxu3 %vm366_vm1, %v5786_v56 }
  0x7f   : > { %580 = vmatmul.f32.gmra.mxu2 %v5800_v0 }
  0x80   : > { %462 = vmatmul.f32.gmra.mxu0 %v5800_v0 }
  0x81   : > { %4255 = vmatmul.msk.f32.gmra.mxu1 %vm366_vm1, %v5786_v56 }
  0x84   : > { %4271 = vmatmul.msk.f32.gmra.mxu3 %vm366_vm1, %v5819_v31 }
  0x87   : > { %583 = vmatmul.f32.gmra.mxu2 %v5827_v35 }
  0x88   : > { %465 = vmatmul.f32.gmra.mxu0 %v5827_v35 }
  0x89   : > { %4256 = vmatmul.msk.f32.gmra.mxu1 %vm366_vm1, %v5819_v31 }
  0x8c   : > { %4272 = vmatmul.msk.f32.gmra.mxu3 %vm366_vm1, %v5843_v39 }
  0x8f   : > { %586 = vmatmul.f32.gmra.mxu2 %v5852_v3 }
  0x90   : > { %468 = vmatmul.f32.gmra.mxu0 %v5852_v3 }
  0x91   : > { %4257 = vmatmul.msk.f32.gmra.mxu1 %vm366_vm1, %v5843_v39 }
  0x94   : > { %4273 = vmatmul.msk.f32.gmra.mxu3 %vm366_vm1, %v5869_v40 }
  0x97   : > { %589 = vmatmul.f32.gmra.mxu2 %v5887_v43 }
  0x98   : > { %471 = vmatmul.f32.gmra.mxu0 %v5887_v43 }
  0x99   : > { %4258 = vmatmul.msk.f32.gmra.mxu1 %vm366_vm1, %v5869_v40 }
  0x9f   : > { %4350 = vmatmul.msk.f32.vlgmr.msrb.gmra.mxu2 %vm366_vm1, %v5503_v54 }
  0xa0   : > { %1013 = vmatmul.f32.vlgmr.msrb.gmra.mxu0 %v5511_v58 }
  0xa7   : > { %4351 = vmatmul.msk.f32.gmra.mxu2 %vm366_vm1, %v5523_v62 }
  0xa8   : > { %1016 = vmatmul.f32.gmra.mxu0 %v5530_v63 }
  0xad   : > { %v433_v44 = vpop.f32.mrf.mxu0 }
  0xae   : > { %v492_v49 = vpop.f32.mrf.mxu1 }
  0xaf   : > { %4352 = vmatmul.msk.f32.gmra.mxu2 %vm366_vm1, %v5542_v1  ;;  %v610_v47 = vpop.f32.mrf.mxu3  ;;  %v493_v50 = vadd.f32 %v492_v49, %v433_v44  ;;  %v4340_v49 = vld [vmem:[%s5442_s29 + $0x378] sm:$0xff] }
  0xb0   : > { %1019 = vmatmul.f32.gmra.mxu0 %v5550_v2  ;;  %1180 = vmatpush.msra.mxu3 %v4340_v49 }
  0xb1   : > { %743 = vmatmul.f32.vlgmr.msrb.gmra.mxu1 %v493_v50 }
  0xb2   : > { %v551_v51 = vpop.f32.mrf.mxu2 }
  0xb3   : > { %v611_v52 = vadd.f32 %v610_v47, %v551_v51  ;;  %v4312_v51 = vld [vmem:[%s5442_s29 + $0x298] sm:$0xff] }
  0xb4   : > { %1119 = vmatpush.msra.mxu1 %v4312_v51 }
  0xb5   : > { %4275 = vmatmul.msk.f32.vlgmr.msrb.gmra.mxu3 %vm366_vm1, %v611_v52  ;;  %v436_v55 = vpop.f32.mrf.mxu0 }
  0xb6   : > { %v495_v60 = vpop.f32.mrf.mxu1 }
  0xb7   : > { %4353 = vmatmul.msk.f32.gmra.mxu2 %vm366_vm1, %v5570_v5  ;;  %v613_v59 = vpop.f32.mrf.mxu3  ;;  %v496_v61 = vadd.f32 %v495_v60, %v436_v55  ;;  %v4338_v60 = vld [vmem:[%s5442_s29 + $0x368] sm:$0xff] }
  0xb8   : > { %1022 = vmatmul.f32.gmra.mxu0 %v5578_v6  ;;  %1181 = vmatpush.msra.mxu3 %v4338_v60 }
  0xb9   : > { %746 = vmatmul.f32.gmra.mxu1 %v496_v61 }
  0xba   : > { %v554_v20 = vpop.f32.mrf.mxu2 }
  0xbb   : > { %v614_v22 = vadd.f32 %v613_v59, %v554_v20  ;;  %v4310_v20 = vld [vmem:[%s5442_s29 + $0x288] sm:$0xff] }
  0xbc   : > { %1120 = vmatpush.msra.mxu1 %v4310_v20 }
  0xbd   : > { %4276 = vmatmul.msk.f32.gmra.mxu3 %vm366_vm1, %v614_v22  ;;  %v439_v27 = vpop.f32.mrf.mxu0 }
  0xbe   : > { %v498_v34 = vpop.f32.mrf.mxu1 }
  0xbf   : > { %4354 = vmatmul.msk.f32.gmra.mxu2 %vm366_vm1, %v5598_v9  ;;  %v616_v30 = vpop.f32.mrf.mxu3  ;;  %v499_v37 = vadd.f32 %v498_v34, %v439_v27  ;;  %v4308_v34 = vld [vmem:[%s5442_s29 + $0x278] sm:$0xff] }
  0xc0   : > { %1025 = vmatmul.f32.gmra.mxu0 %v5606_v10  ;;  %1121 = vmatpush.msra.mxu1 %v4308_v34 }
  0xc1   : > { %749 = vmatmul.f32.gmra.mxu1 %v499_v37  ;;  %v4336_v37 = vld [vmem:[%s5442_s29 + $0x358] sm:$0xff] }
  0xc2   : > { %v557_v38 = vpop.f32.mrf.mxu2  ;;  %1182 = vmatpush.msra.mxu3 %v4336_v37  ;;  %1122 = vmatpush.msra.mxu1 %v4306_v26  ;;  %v4300_v37 = vld [vmem:[%s5442_s29 + $0x238] sm:$0xff] }
  0xc3   : > { %v617_v7 = vadd.f32 %v616_v30, %v557_v38 }
  0xc5   : > { %4277 = vmatmul.msk.f32.gmra.mxu3 %vm366_vm1, %v617_v7  ;;  %v442_v15 = vpop.f32.mrf.mxu0 }
  0xc6   : > { %v501_v32 = vpop.f32.mrf.mxu1 }
  0xc7   : > { %4355 = vmatmul.msk.f32.gmra.mxu2 %vm366_vm1, %v5626_v13  ;;  %v619_v41 = vpop.f32.mrf.mxu3  ;;  %v502_v45 = vadd.f32 %v501_v32, %v442_v15  ;;  %v4334_v32 = vld [vmem:[%s5442_s29 + $0x348] sm:$0xff] }
  0xc8   : > { %1028 = vmatmul.f32.gmra.mxu0 %v5634_v14  ;;  %1183 = vmatpush.msra.mxu3 %v4334_v32  ;;  %v4324_v32 = vld [vmem:[%s5442_s29 + $0x2f8] sm:$0xff] }
  0xc9   : > { %752 = vmatmul.f32.gmra.mxu1 %v502_v45 }
  0xca   : > { %v560_v44 = vpop.f32.mrf.mxu2 }
  0xcb   : > { %v620_v46 = vadd.f32 %v619_v41, %v560_v44 }
  0xcd   : > { %4278 = vmatmul.msk.f32.gmra.mxu3 %vm366_vm1, %v620_v46  ;;  %v445_v47 = vpop.f32.mrf.mxu0 }
  0xce   : > { %v504_v52 = vpop.f32.mrf.mxu1 }
  0xcf   : > { %4356 = vmatmul.msk.f32.gmra.mxu2 %vm366_vm1, %v5654_v17  ;;  %v622_v50 = vpop.f32.mrf.mxu3  ;;  %v505_v53 = vadd.f32 %v504_v52, %v445_v47  ;;  %v4332_v52 = vld [vmem:[%s5442_s29 + $0x338] sm:$0xff] }
  0xd0   : > { %1031 = vmatmul.f32.gmra.mxu0 %v5662_v18  ;;  %1184 = vmatpush.msra.mxu3 %v4332_v52 }
  0xd1   : > { %755 = vmatmul.f32.gmra.mxu1 %v505_v53 }
  0xd2   : > { %v563_v55 = vpop.f32.mrf.mxu2 }
  0xd3   : > { %v623_v57 = vadd.f32 %v622_v50, %v563_v55  ;;  %v4304_v50 = vld [vmem:[%s5442_s29 + $0x258] sm:$0xff] }
  0xd4   : > { %1123 = vmatpush.msra.mxu1 %v4304_v50  ;;  %v4294_v50 = vld [vmem:[%s5442_s29 + $0x208] sm:$0xff] }
  0xd5   : > { %4279 = vmatmul.msk.f32.gmra.mxu3 %vm366_vm1, %v623_v57  ;;  %v448_v59 = vpop.f32.mrf.mxu0 }
  0xd6   : > { %v507_v22 = vpop.f32.mrf.mxu1 }
  0xd7   : > { %4357 = vmatmul.msk.f32.gmra.mxu2 %vm366_vm1, %v5685_v24  ;;  %v625_v61 = vpop.f32.mrf.mxu3  ;;  %v508_v23 = vadd.f32 %v507_v22, %v448_v59  ;;  %v4330_v22 = vld [vmem:[%s5442_s29 + $0x328] sm:$0xff] }
  0xd8   : > { %1034 = vmatmul.f32.gmra.mxu0 %v5694_v25  ;;  %1185 = vmatpush.msra.mxu3 %v4330_v22 }
  0xd9   : > { %758 = vmatmul.f32.gmra.mxu1 %v508_v23 }
  0xda   : > { %v566_v27 = vpop.f32.mrf.mxu2 }
  0xdb   : > { %v626_v28 = vadd.f32 %v625_v61, %v566_v27  ;;  %v4302_v61 = vld [vmem:[%s5442_s29 + $0x248] sm:$0xff] }
  0xdc   : > { %1124 = vmatpush.msra.mxu1 %v4302_v61 }
  0xdd   : > { %4280 = vmatmul.msk.f32.gmra.mxu3 %vm366_vm1, %v626_v28  ;;  %v451_v30 = vpop.f32.mrf.mxu0 }
  0xde   : > { %v510_v7 = vpop.f32.mrf.mxu1  ;;  %1125 = vmatpush.msra.mxu1 %v4300_v37 }
  0xdf   : > { %4358 = vmatmul.msk.f32.gmra.mxu2 %vm366_vm1, %v5710_v29  ;;  %v628_v38 = vpop.f32.mrf.mxu3  ;;  %v511_v11 = vadd.f32 %v510_v7, %v451_v30  ;;  %v4328_v7 = vld [vmem:[%s5442_s29 + $0x318] sm:$0xff] }
  0xe0   : > { %1037 = vmatmul.f32.gmra.mxu0 %v5734_v36  ;;  %1186 = vmatpush.msra.mxu3 %v4328_v7 }
  0xe1   : > { %761 = vmatmul.f32.gmra.mxu1 %v511_v11  ;;  %v4326_v11 = vld [vmem:[%s5442_s29 + $0x308] sm:$0xff] }
  0xe2   : > { %v569_v15 = vpop.f32.mrf.mxu2  ;;  %1187 = vmatpush.msra.mxu3 %v4326_v11 }
  0xe3   : > { %v629_v19 = vadd.f32 %v628_v38, %v569_v15  ;;  %v4298_v15 = vld [vmem:[%s5442_s29 + $0x228] sm:$0xff] }
  0xe4   : > { %1126 = vmatpush.msra.mxu1 %v4298_v15  ;;  %1188 = vmatpush.msra.mxu3 %v4324_v32 }
  0xe5   : > { %4281 = vmatmul.msk.f32.gmra.mxu3 %vm366_vm1, %v629_v19  ;;  %v454_v41 = vpop.f32.mrf.mxu0 }
  0xe6   : > { %v513_v44 = vpop.f32.mrf.mxu1 }
  0xe7   : > { %4359 = vmatmul.msk.f32.gmra.mxu2 %vm366_vm1, %v5748_v42  ;;  %v631_v45 = vpop.f32.mrf.mxu3  ;;  %v514_v46 = vadd.f32 %v513_v44, %v454_v41 }
  0xe8   : > { %1040 = vmatmul.f32.gmra.mxu0 %v5767_v48 }
  0xe9   : > { %764 = vmatmul.f32.gmra.mxu1 %v514_v46  ;;  %v4296_v46 = vld [vmem:[%s5442_s29 + $0x218] sm:$0xff] }
  0xea   : > { %v572_v47 = vpop.f32.mrf.mxu2  ;;  %1127 = vmatpush.msra.mxu1 %v4296_v46 }
  0xeb   : > { %v632_v49 = vadd.f32 %v631_v45, %v572_v47  ;;  %v4322_v47 = vld [vmem:[%s5442_s29 + $0x2e8] sm:$0xff] }
  0xec   : > { %1189 = vmatpush.msra.mxu3 %v4322_v47  ;;  %1128 = vmatpush.msra.mxu1 %v4294_v50 }
  0xed   : > { %4282 = vmatmul.msk.f32.gmra.mxu3 %vm366_vm1, %v632_v49  ;;  %v457_v51 = vpop.f32.mrf.mxu0 }
  0xee   : > { %v516_v55 = vpop.f32.mrf.mxu1 }
  0xef   : > { %4360 = vmatmul.msk.f32.gmra.mxu2 %vm366_vm1, %v5786_v56  ;;  %v634_v53 = vpop.f32.mrf.mxu3  ;;  %v517_v57 = vadd.f32 %v516_v55, %v457_v51  ;;  %v4292_v51 = vld [vmem:[%s5442_s29 + $0x1f8] sm:$0xff] }
  0xf0   : > { %1043 = vmatmul.f32.gmra.mxu0 %v5800_v0  ;;  %1129 = vmatpush.msra.mxu1 %v4292_v51 }
  0xf1   : > { %767 = vmatmul.f32.gmra.mxu1 %v517_v57  ;;  %v4290_v57 = vld [vmem:[%s5442_s29 + $0x1e8] sm:$0xff] }
  0xf2   : > { %v575_v59 = vpop.f32.mrf.mxu2  ;;  %1130 = vmatpush.msra.mxu1 %v4290_v57 }
  0xf3   : > { %v635_v60 = vadd.f32 %v634_v53, %v575_v59 }
  0xf5   : > { %4283 = vmatmul.msk.f32.gmra.mxu3 %vm366_vm1, %v635_v60  ;;  %v460_v20 = vpop.f32.mrf.mxu0 }
  0xf6   : > { %v519_v27 = vpop.f32.mrf.mxu1 }
  0xf7   : > { %4361 = vmatmul.msk.f32.gmra.mxu2 %vm366_vm1, %v5819_v31  ;;  %v637_v23 = vpop.f32.mrf.mxu3  ;;  %v520_v28 = vadd.f32 %v519_v27, %v460_v20 }
  0xf8   : > { %1046 = vmatmul.f32.gmra.mxu0 %v5827_v35 }
  0xf9   : > { %770 = vmatmul.f32.gmra.mxu1 %v520_v28 }
  0xfa   : > { %v578_v30 = vpop.f32.mrf.mxu2 }
  0xfb   : > { %v638_v34 = vadd.f32 %v637_v23, %v578_v30 }
  0xfd   : > { %4284 = vmatmul.msk.f32.gmra.mxu3 %vm366_vm1, %v638_v34  ;;  %v463_v38 = vpop.f32.mrf.mxu0 }
  0xfe   : > { %v522_v41 = vpop.f32.mrf.mxu1 }
  0xff   : > { %4362 = vmatmul.msk.f32.gmra.mxu2 %vm366_vm1, %v5843_v39  ;;  %v640_v19 = vpop.f32.mrf.mxu3  ;;  %v523_v26 = vadd.f32 %v522_v41, %v463_v38 }
 0x100   : > { %1049 = vmatmul.f32.gmra.mxu0 %v5852_v3 }
 0x101   : > { %773 = vmatmul.f32.gmra.mxu1 %v523_v26 }
 0x102   : > { %v581_v45 = vpop.f32.mrf.mxu2 }
 0x103   : > { %v641_v44 = vadd.f32 %v640_v19, %v581_v45 }
 0x105   : > { %4285 = vmatmul.msk.f32.gmra.mxu3 %vm366_vm1, %v641_v44  ;;  %v466_v49 = vpop.f32.mrf.mxu0 }
 0x106   : > { %v525_v53 = vpop.f32.mrf.mxu1 }
 0x107   : > { %4363 = vmatmul.msk.f32.gmra.mxu2 %vm366_vm1, %v5869_v40  ;;  %v643_v52 = vpop.f32.mrf.mxu3  ;;  %v526_v55 = vadd.f32 %v525_v53, %v466_v49 }
 0x108   : > { %1052 = vmatmul.f32.gmra.mxu0 %v5887_v43 }
 0x109   : > { %776 = vmatmul.f32.gmra.mxu1 %v526_v55 }
 0x10a   : > { %v584_v59 = vpop.f32.mrf.mxu2 }
 0x10b   : > { %v644_v60 = vadd.f32 %v643_v52, %v584_v59 }
 0x10d   : > { %4286 = vmatmul.msk.f32.gmra.mxu3 %vm366_vm1, %v644_v60  ;;  %v469_v61 = vpop.f32.mrf.mxu0 }
 0x10e   : > { %v528_v22 = vpop.f32.mrf.mxu1 }
 0x10f   : > { %v646_v20 = vpop.f32.mrf.mxu3  ;;  %v529_v23 = vadd.f32 %v528_v22, %v469_v61 }
 0x111   : > { %779 = vmatmul.f32.gmra.mxu1 %v529_v23 }
 0x112   : > { %v587_v27 = vpop.f32.mrf.mxu2 }
 0x113   : > { %v647_v28 = vadd.f32 %v646_v20, %v587_v27  ;;  %v4423_v20 = vld [vmem:[%s5442_s29 + $0x4a8] sm:$0xff] }
 0x115   : > { %4287 = vmatmul.msk.f32.gmra.mxu3 %vm366_vm1, %v647_v28  ;;  %v472_v30 = vpop.f32.mrf.mxu0  ;;  %v4452_v28 = vld [vmem:[%s5442_s29 + $0x590] sm:$0xf] }
 0x116   : > { %v531_v37 = vpop.f32.mrf.mxu1  ;;  %4454 = vmatpush.msk.msrb.mxu3 %vm409_vm0, %v4452_v28  ;;  %v4402_v28 = vld [vmem:[%s5442_s29 + $0x400] sm:$0xff] }
 0x117   : > { %v649_v34 = vpop.f32.mrf.mxu3  ;;  %v532_v38 = vadd.f32 %v531_v37, %v472_v30  ;;  %v4421_v30 = vld [vmem:[%s5442_s29 + $0x498] sm:$0xff]  ;;  %v4450_v37 = vld [vmem:[%s5442_s29 + $0x580] sm:$0xff] }
 0x118   : > { %1639 = vmatpush.msrb.mxu3 %v4450_v37  ;;  %v4400_v37 = vld [vmem:[%s5442_s29 + $0x3f0] sm:$0xff] }
 0x119   : > { %782 = vmatmul.f32.gmra.mxu1 %v532_v38  ;;  %v4419_v38 = vld [vmem:[%s5442_s29 + $0x488] sm:$0xff] }
 0x11a   : > { %v590_v7 = vpop.f32.mrf.mxu2 }
 0x11b   : > { %v650_v11 = vadd.f32 %v649_v34, %v590_v7  ;;  %v4424_v34 = vld [vmem:[%s5442_s29 + $0x4b0] sm:$0xff] }
 0x11c   : > { %1577 = vmatpush.msrb.mxu1 %v4424_v34 }
 0x11d   : > { %4288 = vmatmul.msk.f32.gmra.mxu3 %vm366_vm1, %v650_v11  ;;  %v1014_v15 = vpop.f32.mrf.mxu0  ;;  %v4422_v11 = vld [vmem:[%s5442_s29 + $0x4a0] sm:$0xff] }
 0x11e   : > { %1578 = vmatpush.msrb.mxu1 %v4422_v11 }
 0x121   : > { %1131 = vmatmul.f32.vlgmr.msra.gmra.mxu1 %v5511_v58 }
 0x122   : > { %v1073_v19 = vpop.f32.mrf.mxu2 }
 0x123   : > { %v1074_v41 = vadd.f32 %v1073_v19, %v1014_v15  ;;  %v4448_v15 = vld [vmem:[%s5442_s29 + $0x570] sm:$0xff]  ;;  %v4417_v19 = vld [vmem:[%s5442_s29 + $0x478] sm:$0xff] }
 0x124   : > { %1640 = vmatpush.msrb.mxu3 %v4448_v15 }
 0x125   : > { %4365 = vmatmul.msk.f32.vlgmr.msra.gmra.mxu3 %vm366_vm1, %v5503_v54  ;;  %1324 = vmatmul.f32.vlgmr.msra.gmra.mxu0 %v1074_v41  ;;  %v1017_v26 = vpop.f32.mrf.mxu0  ;;  %v1262_v54 = vld [vmem:[%s8107_s2 + $0xe8] sm:$0xf]  ;;  %v4446_v41 = vld [vmem:[%s5442_s29 + $0x560] sm:$0xff] }
 0x126   : > { %4379 = vmatpush.msk.msra.mxu2 %vm409_vm0, %v1262_v54  ;;  %1641 = vmatpush.msrb.mxu3 %v4446_v41 }
 0x128   : > { %1370 = vmatpush.msra.mxu2 %v5565_v4 }
 0x129   : > { %1134 = vmatmul.f32.gmra.mxu1 %v5530_v63 }
 0x12a   : > { %v1076_v32 = vpop.f32.mrf.mxu2  ;;  %1371 = vmatpush.msra.mxu2 %v5593_v8 }
 0x12b   : > { %v1077_v45 = vadd.f32 %v1076_v32, %v1017_v26  ;;  %v4415_v26 = vld [vmem:[%s5442_s29 + $0x468] sm:$0xff] }
 0x12c   : > { %1372 = vmatpush.msra.mxu2 %v5621_v12 }
 0x12d   : > { %4366 = vmatmul.msk.f32.gmra.mxu3 %vm366_vm1, %v5523_v62  ;;  %1327 = vmatmul.f32.gmra.mxu0 %v1077_v45  ;;  %v1020_v44 = vpop.f32.mrf.mxu0 }
 0x12e   : > { %v744_v46 = vpop.f32.mrf.mxu1  ;;  %1373 = vmatpush.msra.mxu2 %v5649_v16 }
 0x130   : > { %1374 = vmatpush.msra.mxu2 %v5678_v21 }
 0x131   : > { %1137 = vmatmul.f32.gmra.mxu1 %v5550_v2 }
 0x132   : > { %v1079_v47 = vpop.f32.mrf.mxu2  ;;  %1375 = vmatpush.msra.mxu2 %v5723_v33 }
 0x133   : > { %v1080_v49 = vadd.f32 %v1079_v47, %v1020_v44  ;;  %v4418_v44 = vld [vmem:[%s5442_s29 + $0x480] sm:$0xff]  ;;  %v4413_v47 = vld [vmem:[%s5442_s29 + $0x458] sm:$0xff] }
 0x135   : > { %4367 = vmatmul.msk.f32.gmra.mxu3 %vm366_vm1, %v5542_v1  ;;  %1330 = vmatmul.f32.gmra.mxu0 %v1080_v49  ;;  %v1023_v58 = vpop.f32.mrf.mxu0 }
 0x136   : > { %v747_v63 = vpop.f32.mrf.mxu1 }
 0x138   : > { %v803_v62 = vpop.f32.mrf.mxu3 }
 0x139   : > { %v804_v50 = vadd.f32 %v803_v62, %v744_v46  ;;  %1140 = vmatmul.f32.gmra.mxu1 %v5578_v6  ;;  %v4444_v46 = vld [vmem:[%s5442_s29 + $0x550] sm:$0xff]  ;;  %v4442_v62 = vld [vmem:[%s5442_s29 + $0x540] sm:$0xff] }
 0x13a   : > { %v1082_v2 = vpop.f32.mrf.mxu2  ;;  %1642 = vmatpush.msrb.mxu3 %v4444_v46 }
 0x13b   : > { %846 = vst.msk [vmem:[#allocation2] sm:$0xff] %vm845_vm2, %v804_v50  ;;  %v1083_v51 = vadd.f32 %v1082_v2, %v1023_v58  ;;  %v4416_v58 = vld [vmem:[%s5442_s29 + $0x470] sm:$0xff]  ;;  %v4414_v2 = vld [vmem:[%s5442_s29 + $0x460] sm:$0xff] }
 0x13c   : > { %1643 = vmatpush.msrb.mxu3 %v4442_v62 }
 0x13d   : > { %4368 = vmatmul.msk.f32.gmra.mxu3 %vm366_vm1, %v5570_v5  ;;  %1333 = vmatmul.f32.gmra.mxu0 %v1083_v51  ;;  %v1026_v1 = vpop.f32.mrf.mxu0  ;;  %v4440_v51 = vld [vmem:[%s5442_s29 + $0x530] sm:$0xff] }
 0x13e   : > { %v750_v8 = vpop.f32.mrf.mxu1  ;;  %1644 = vmatpush.msrb.mxu3 %v4440_v51 }
 0x140   : > { %v806_v4 = vpop.f32.mrf.mxu3 }
 0x141   : > { %v807_v52 = vadd.f32 %v806_v4, %v747_v63  ;;  %1143 = vmatmul.f32.gmra.mxu1 %v5606_v10  ;;  %v4411_v63 = vld [vmem:[%s5442_s29 + $0x448] sm:$0xff]  ;;  %v4438_v4 = vld [vmem:[%s5442_s29 + $0x520] sm:$0xff] }
 0x142   : > { %v1085_v12 = vpop.f32.mrf.mxu2  ;;  %1645 = vmatpush.msrb.mxu3 %v4438_v4  ;;  %v6148_v4 = vld [vmem:[%s8106_s1 + $0x8] sm:$0xff] }
 0x143   : > { %847 = vst.msk [vmem:[#allocation2 + $0x8] sm:$0xff] %vm845_vm2, %v807_v52  ;;  %v1086_v53 = vadd.f32 %v1085_v12, %v1026_v1  ;;  %v4409_v1 = vld [vmem:[%s5442_s29 + $0x438] sm:$0xff] }
 0x145   : > { %4369 = vmatmul.msk.f32.gmra.mxu3 %vm366_vm1, %v5598_v9  ;;  %1336 = vmatmul.f32.gmra.mxu0 %v1086_v53  ;;  %v1029_v5 = vpop.f32.mrf.mxu0  ;;  %v4410_v53 = vld [vmem:[%s5442_s29 + $0x440] sm:$0xff] }
 0x146   : > { %v753_v16 = vpop.f32.mrf.mxu1 }
 0x148   : > { %v809_v6 = vpop.f32.mrf.mxu3 }
 0x149   : > { %v810_v55 = vadd.f32 %v809_v6, %v750_v8  ;;  %1146 = vmatmul.f32.gmra.mxu1 %v5634_v14  ;;  %v4407_v8 = vld [vmem:[%s5442_s29 + $0x428] sm:$0xff] }
 0x14a   : > { %v1088_v21 = vpop.f32.mrf.mxu2 }
 0x14b   : > { %848 = vst.msk [vmem:[#allocation2 + $0x10] sm:$0xff] %vm845_vm2, %v810_v55  ;;  %v1089_v33 = vadd.f32 %v1088_v21, %v1029_v5  ;;  %v4436_v5 = vld [vmem:[%s5442_s29 + $0x510] sm:$0xff]  ;;  %v4405_v55 = vld [vmem:[%s5442_s29 + $0x418] sm:$0xff] }
 0x14c   : > { %v6070_v21 = vld [vmem:[%s8107_s2 + $0xb0] sm:$0xff]  ;;  %1646 = vmatpush.msrb.mxu3 %v4436_v5 }
 0x14d   : > { %4370 = vmatmul.msk.f32.gmra.mxu3 %vm366_vm1, %v5626_v13  ;;  %1339 = vmatmul.f32.gmra.mxu0 %v1089_v33  ;;  %v1032_v10 = vpop.f32.mrf.mxu0  ;;  %v4425_v13 = vld [vmem:[%s5442_s29 + $0x4b8] sm:$0xff]  ;;  %v4408_v33 = vld [vmem:[%s5442_s29 + $0x430] sm:$0xff] }
 0x14e   : > { %v756_v9 = vpop.f32.mrf.mxu1  ;;  %1695 = vmatpush.msrb.mxu0 %v4425_v13  ;;  %1376 = vmatpush.msra.mxu2 %v6070_v21  ;;  %v4430_v13 = vld [vmem:[%s5442_s29 + $0x4e0] sm:$0xff] }
 0x150   : > { %v812_v57 = vpop.f32.mrf.mxu3  ;;  %1696 = vmatpush.msrb.mxu0 %v4423_v20  ;;  %v4404_v20 = vld [vmem:[%s5442_s29 + $0x410] sm:$0xff] }
 0x151   : > { %v813_v59 = vadd.f32 %v812_v57, %v753_v16  ;;  %1149 = vmatmul.f32.gmra.mxu1 %v5662_v18 }
 0x152   : > { %v1091_v60 = vpop.f32.mrf.mxu2  ;;  %1697 = vmatpush.msrb.mxu0 %v4421_v30  ;;  %v4428_v30 = vld [vmem:[%s5442_s29 + $0x4d0] sm:$0xff] }
 0x153   : > { %849 = vst.msk [vmem:[#allocation2 + $0x18] sm:$0xff] %vm845_vm2, %v813_v59  ;;  %v1092_v61 = vadd.f32 %v1091_v60, %v1032_v10  ;;  %v4434_v10 = vld [vmem:[%s5442_s29 + $0x500] sm:$0xff]  ;;  %v4432_v59 = vld [vmem:[%s5442_s29 + $0x4f0] sm:$0xff]  ;;  %v4401_v60 = vld [vmem:[%s5442_s29 + $0x3f8] sm:$0xff] }
 0x154   : > { %1698 = vmatpush.msrb.mxu0 %v4419_v38  ;;  %1647 = vmatpush.msrb.mxu3 %v4434_v10  ;;  %v4395_v38 = vld [vmem:[%s5442_s29 + $0x3c8] sm:$0xff]  ;;  %v4453_v10 = vld [vmem:[%s5442_s29 + $0x598] sm:$0xf] }
 0x155   : > { %4371 = vmatmul.msk.f32.gmra.mxu3 %vm366_vm1, %v5654_v17  ;;  %1342 = vmatmul.f32.gmra.mxu0 %v1092_v61  ;;  %v1035_v14 = vpop.f32.mrf.mxu0 }
 0x156   : > { %v759_v23 = vpop.f32.mrf.mxu1  ;;  %1699 = vmatpush.msrb.mxu0 %v4417_v19  ;;  %1648 = vmatpush.msrb.mxu3 %v4432_v59 }
 0x158   : > { %v815_v22 = vpop.f32.mrf.mxu3  ;;  %1700 = vmatpush.msrb.mxu0 %v4415_v26  ;;  %1649 = vmatpush.msrb.mxu3 %v4430_v13  ;;  %v4394_v26 = vld [vmem:[%s5442_s29 + $0x3c0] sm:$0xff] }
 0x159   : > { %v816_v27 = vadd.f32 %v815_v22, %v756_v9  ;;  %1152 = vmatmul.f32.gmra.mxu1 %v5694_v25  ;;  %v4420_v25 = vld [vmem:[%s5442_s29 + $0x490] sm:$0xff]  ;;  %v4403_v9 = vld [vmem:[%s5442_s29 + $0x408] sm:$0xff] }
 0x15a   : > { %v1094_v18 = vpop.f32.mrf.mxu2  ;;  %1579 = vmatpush.msrb.mxu1 %v4420_v25  ;;  %1701 = vmatpush.msrb.mxu0 %v4413_v47  ;;  %v4399_v22 = vld [vmem:[%s5442_s29 + $0x3e8] sm:$0xff] }
 0x15b   : > { %850 = vst.msk [vmem:[#allocation2 + $0x20] sm:$0xff] %vm845_vm2, %v816_v27  ;;  %v1095_v17 = vadd.f32 %v1094_v18, %v1035_v14  ;;  %v4397_v18 = vld [vmem:[%s5442_s29 + $0x3d8] sm:$0xff]  ;;  %1650 = vmatpush.msrb.mxu3 %v4428_v30 }
 0x15c   : > { %1580 = vmatpush.msrb.mxu1 %v4418_v44  ;;  %1702 = vmatpush.msrb.mxu0 %v4411_v63 }
 0x15d   : > { %4372 = vmatmul.msk.f32.gmra.mxu3 %vm366_vm1, %v5685_v24  ;;  %1345 = vmatmul.f32.gmra.mxu0 %v1095_v17  ;;  %v1038_v7 = vpop.f32.mrf.mxu0  ;;  %v6092_v17 = vld [vmem:[%s8107_s2 + $0xa8] sm:$0xff] }
 0x15e   : > { %v762_v45 = vpop.f32.mrf.mxu1  ;;  %1581 = vmatpush.msrb.mxu1 %v4416_v58  ;;  %1703 = vmatpush.msrb.mxu0 %v4409_v1 }
 0x15f   : > { %1377 = vmatpush.msra.mxu2 %v6092_v17 }
 0x160   : > { %v818_v32 = vpop.f32.mrf.mxu3  ;;  %1582 = vmatpush.msrb.mxu1 %v4414_v2  ;;  %1704 = vmatpush.msrb.mxu0 %v4407_v8  ;;  %v1501_v8 = vld [vmem:[%s8106_s1] sm:$0xff] }
 0x161   : > { %v819_v24 = vadd.f32 %v818_v32, %v759_v23  ;;  %1155 = vmatmul.f32.gmra.mxu1 %v5734_v36  ;;  %v4412_v36 = vld [vmem:[%s5442_s29 + $0x450] sm:$0xff]  ;;  %v6108_v32 = vld [vmem:[%s8107_s2 + $0xa0] sm:$0xff] }
 0x162   : > { %v1097_v49 = vpop.f32.mrf.mxu2  ;;  %1583 = vmatpush.msrb.mxu1 %v4412_v36  ;;  %1705 = vmatpush.msrb.mxu0 %v4405_v55  ;;  %v6172_v55 = vld [vmem:[%s8106_s1 + $0x28] sm:$0xff] }
 0x163   : > { %851 = vst.msk [vmem:[#allocation2 + $0x28] sm:$0xff] %vm845_vm2, %v819_v24  ;;  %v1098_v54 = vadd.f32 %v1097_v49, %v1038_v7  ;;  %v4398_v7 = vld [vmem:[%s5442_s29 + $0x3e0] sm:$0xff]  ;;  %1378 = vmatpush.msra.mxu2 %v6108_v32  ;;  %v6118_v49 = vld [vmem:[%s8107_s2 + $0x98] sm:$0xff] }
 0x164   : > { %1584 = vmatpush.msrb.mxu1 %v4410_v53  ;;  %1706 = vmatpush.msrb.mxu0 %v4403_v9 }
 0x165   : > { %4373 = vmatmul.msk.f32.gmra.mxu3 %vm366_vm1, %v5710_v29  ;;  %1348 = vmatmul.f32.gmra.mxu0 %v1098_v54  ;;  %v1041_v50 = vpop.f32.mrf.mxu0 }
 0x166   : > { %v765_v12 = vpop.f32.mrf.mxu1  ;;  %1585 = vmatpush.msrb.mxu1 %v4408_v33  ;;  %1707 = vmatpush.msrb.mxu0 %v4401_v60  ;;  %v1505_v33 = vld [vmem:[%s8106_s1 + $0x20] sm:$0xff]  ;;  %v6187_v60 = vld [vmem:[%s8106_s1 + $0x38] sm:$0xff] }
 0x167   : > { %1379 = vmatpush.msra.mxu2 %v6118_v49 }
 0x168   : > { %v821_v52 = vpop.f32.mrf.mxu3  ;;  %1708 = vmatpush.msrb.mxu0 %v4399_v22 }
 0x169   : > { %v822_v29 = vadd.f32 %v821_v52, %v762_v45  ;;  %1158 = vmatmul.f32.gmra.mxu1 %v5767_v48  ;;  %v4406_v48 = vld [vmem:[%s5442_s29 + $0x420] sm:$0xff] }
 0x16a   : > { %v1100_v6 = vpop.f32.mrf.mxu2  ;;  %1586 = vmatpush.msrb.mxu1 %v4406_v48  ;;  %1709 = vmatpush.msrb.mxu0 %v4397_v18 }
 0x16b   : > { %852 = vst.msk [vmem:[#allocation2 + $0x30] sm:$0xff] %vm845_vm2, %v822_v29  ;;  %v1101_v16 = vadd.f32 %v1100_v6, %v1041_v50  ;;  %v1503_v29 = vld [vmem:[%s8106_s1 + $0x10] sm:$0xff] }
 0x16c   : > { %1587 = vmatpush.msrb.mxu1 %v4404_v20  ;;  %1710 = vmatpush.msrb.mxu0 %v4395_v38  ;;  %v1511_v38 = vld [vmem:[%s8106_s1 + $0x50] sm:$0xff] }
 0x16d   : > { %4374 = vmatmul.msk.f32.gmra.mxu3 %vm366_vm1, %v5748_v42  ;;  %1351 = vmatmul.f32.gmra.mxu0 %v1101_v16  ;;  %v1044_v57 = vpop.f32.mrf.mxu0 }
 0x16e   : > { %v768_v14 = vpop.f32.mrf.mxu1  ;;  %1588 = vmatpush.msrb.mxu1 %v4402_v28  ;;  %v4449_v28 = vld [vmem:[%s5442_s29 + $0x578] sm:$0xff] }
 0x170   : > { %v824_v61 = vpop.f32.mrf.mxu3  ;;  %1589 = vmatpush.msrb.mxu1 %v4400_v37 }
 0x171   : > { %v825_v42 = vadd.f32 %v824_v61, %v765_v12  ;;  %1161 = vmatmul.f32.gmra.mxu1 %v5800_v0  ;;  %v4426_v0 = vld [vmem:[%s5442_s29 + $0x4c0] sm:$0xff]  ;;  %v6159_v12 = vld [vmem:[%s8106_s1 + $0x18] sm:$0xff]  ;;  %v1507_v61 = vld [vmem:[%s8106_s1 + $0x30] sm:$0xff] }
 0x172   : > { %v1103_v23 = vpop.f32.mrf.mxu2  ;;  %1651 = vmatpush.msrb.mxu3 %v4426_v0  ;;  %1590 = vmatpush.msrb.mxu1 %v4398_v7  ;;  %v6215_v0 = vld [vmem:[%s8106_s1 + $0x58] sm:$0xff]  ;;  %v4447_v7 = vld [vmem:[%s5442_s29 + $0x568] sm:$0xff] }
 0x173   : > { %853 = vst.msk [vmem:[#allocation2 + $0x38] sm:$0xff] %vm845_vm2, %v825_v42  ;;  %v1104_v27 = vadd.f32 %v1103_v23, %v1044_v57  ;;  %v6201_v23 = vld [vmem:[%s8106_s1 + $0x48] sm:$0xff] }
 0x175   : > { %4375 = vmatmul.msk.f32.gmra.mxu3 %vm366_vm1, %v5786_v56  ;;  %1354 = vmatmul.f32.gmra.mxu0 %v1104_v27  ;;  %v1047_v34 = vpop.f32.mrf.mxu0  ;;  %v4396_v56 = vld [vmem:[%s5442_s29 + $0x3d0] sm:$0xff]  ;;  %v1509_v27 = vld [vmem:[%s8106_s1 + $0x40] sm:$0xff] }
 0x176   : > { %v771_v15 = vpop.f32.mrf.mxu1  ;;  %1591 = vmatpush.msrb.mxu1 %v4396_v56 }
 0x178   : > { %v827_v11 = vpop.f32.mrf.mxu3  ;;  %1592 = vmatpush.msrb.mxu1 %v4394_v26  ;;  %v4445_v26 = vld [vmem:[%s5442_s29 + $0x558] sm:$0xff] }
 0x179   : > { %v828_v19 = vadd.f32 %v827_v11, %v768_v14  ;;  %1164 = vmatmul.f32.gmra.mxu1 %v5827_v35  ;;  %v4451_v14 = vld [vmem:[%s5442_s29 + $0x588] sm:$0xff] }
 0x17a   : > { %v1106_v25 = vpop.f32.mrf.mxu2 }
 0x17b   : > { %854 = vst.msk [vmem:[#allocation2 + $0x40] sm:$0xff] %vm845_vm2, %v828_v19  ;;  %v1107_v41 = vadd.f32 %v1106_v25, %v1047_v34  ;;  %v6229_v25 = vld [vmem:[%s8106_s1 + $0x68] sm:$0xff] }
 0x17d   : > { %4376 = vmatmul.msk.f32.gmra.mxu3 %vm366_vm1, %v5819_v31  ;;  %1357 = vmatmul.f32.gmra.mxu0 %v1107_v41  ;;  %v1050_v45 = vpop.f32.mrf.mxu0  ;;  %v6126_v31 = vld [vmem:[%s8107_s2 + $0x90] sm:$0xff]  ;;  %v1513_v41 = vld [vmem:[%s8106_s1 + $0x60] sm:$0xff] }
 0x17e   : > { %v774_v44 = vpop.f32.mrf.mxu1  ;;  %1380 = vmatpush.msra.mxu2 %v6126_v31 }
 0x180   : > { %v830_v24 = vpop.f32.mrf.mxu3 }
 0x181   : > { %v831_v46 = vadd.f32 %v830_v24, %v771_v15  ;;  %1167 = vmatmul.f32.gmra.mxu1 %v5852_v3  ;;  %v6132_v3 = vld [vmem:[%s8107_s2 + $0x88] sm:$0xff]  ;;  %v5235_v24 = vld [vmem:[%s8108_s3 + $0xcc] sm:$0xf0] }
 0x182   : > { %v1109_v47 = vpop.f32.mrf.mxu2  ;;  %1381 = vmatpush.msra.mxu2 %v6132_v3 }
 0x183   : > { %855 = vst.msk [vmem:[#allocation2 + $0x48] sm:$0xff] %vm845_vm2, %v831_v46  ;;  %v1110_v35 = vadd.f32 %v1109_v47, %v1050_v45  ;;  %v4597_v45 = vld [vmem:[%s8108_s3 + $0xc0] sm:$0xf] }
 0x184   : > { %v4598_v47 = vor.u32 %v5235_v24, %v4597_v45 }
 0x185   : > { %4377 = vmatmul.msk.f32.gmra.mxu3 %vm366_vm1, %v5843_v39  ;;  %1360 = vmatmul.f32.gmra.mxu0 %v1110_v35  ;;  %v1053_v54 = vpop.f32.mrf.mxu0  ;;  %v6138_v39 = vld [vmem:[%s8107_s2 + $0x80] sm:$0xff] }
 0x186   : > { %v777_v62 = vpop.f32.mrf.mxu1  ;;  %1382 = vmatpush.msra.mxu2 %v6138_v39  ;;  %2325 = vmatpush.bf16.msra.mxu0 %v4598_v47 }
 0x188   : > { %v833_v58 = vpop.f32.mrf.mxu3  ;;  %4469 = vmatpush.msk.msrb.mxu2 %vm409_vm0, %v4453_v10  ;;  %v5223_v10 = vld [vmem:[%s8108_s3 + $0x6c] sm:$0xf0] }
 0x189   : > { %v834_v63 = vadd.f32 %v833_v58, %v774_v44  ;;  %1170 = vmatmul.f32.gmra.mxu1 %v5887_v43  ;;  %v6249_v58 = vld [vmem:[%s8106_s1 + $0x78] sm:$0xff] }
 0x18a   : > { %v1112_v50 = vpop.f32.mrf.mxu2  ;;  %1757 = vmatpush.msrb.mxu2 %v4451_v14 }
 0x18b   : > { %856 = vst.msk [vmem:[#allocation2 + $0x50] sm:$0xff] %vm845_vm2, %v834_v63  ;;  %v1113_v2 = vadd.f32 %v1112_v50, %v1053_v54  ;;  %v4443_v63 = vld [vmem:[%s5442_s29 + $0x548] sm:$0xff]  ;;  %v4581_v50 = vld [vmem:[%s8108_s3 + $0xa0] sm:$0xf] }
 0x18c   : > { %1758 = vmatpush.msrb.mxu2 %v4449_v28  ;;  %v1519_v28 = vld [vmem:[%s8106_s1 + $0x90] sm:$0xff] }
 0x18d   : > { %4378 = vmatmul.msk.f32.gmra.mxu3 %vm366_vm1, %v5869_v40  ;;  %1363 = vmatmul.f32.gmra.mxu0 %v1113_v2  ;;  %v5231_v2 = vld [vmem:[%s8108_s3 + $0xac] sm:$0xf0] }
 0x18e   : > { %v780_v1 = vpop.f32.mrf.mxu1  ;;  %1759 = vmatpush.msrb.mxu2 %v4447_v7  ;;  %v1827_v7 = vld [vmem:[%s8107_s2 + $0x70] sm:$0xff] }
 0x190   : > { %v836_v51 = vpop.f32.mrf.mxu3  ;;  %1760 = vmatpush.msrb.mxu2 %v4445_v26 }
 0x191   : > { %v837_v36 = vadd.f32 %v836_v51, %v777_v62  ;;  %1593 = vmatmul.f32.vlgmr.msrb.gmra.mxu1 %v1501_v8  ;;  %v1515_v62 = vld [vmem:[%s8106_s1 + $0x70] sm:$0xff]  ;;  %v4582_v51 = vor.u32 %v5231_v2, %v4581_v50  ;;  %v1824_v50 = vld [vmem:[%s8107_s2 + $0x58] sm:$0xff] }
 0x192   : > { %1761 = vmatpush.msrb.mxu2 %v4443_v63  ;;  %v4437_v63 = vld [vmem:[%s5442_s29 + $0x518] sm:$0xff]  ;;  %v1823_v2 = vld [vmem:[%s8107_s2 + $0x50] sm:$0xff] }
 0x193   : > { %857 = vst.msk [vmem:[#allocation2 + $0x58] sm:$0xff] %vm845_vm2, %v837_v36  ;;  %2326 = vmatpush.bf16.msra.mxu0 %v4582_v51  ;;  %v5227_v36 = vld [vmem:[%s8108_s3 + $0x8c] sm:$0xf0]  ;;  %v1822_v51 = vld [vmem:[%s8107_s2 + $0x48] sm:$0xff] }
 0x195   : > { %4455 = vmatmul.msk.f32.vlgmr.msrb.gmra.mxu3 %vm366_vm1, %v6148_v4  ;;  %1711 = vmatmul.f32.vlgmr.msrb.gmra.mxu0 %v1501_v8 }
 0x196   : > { %v783_v43 = vpop.f32.mrf.mxu1 }
 0x198   : > { %v839_v40 = vpop.f32.mrf.mxu3 }
 0x199   : > { %v840_v52 = vadd.f32 %v839_v40, %v780_v1  ;;  %1596 = vmatmul.f32.gmra.mxu1 %v1503_v29  ;;  %v4565_v1 = vld [vmem:[%s8108_s3 + $0x80] sm:$0xf] }
 0x19b   : > { %858 = vst.msk [vmem:[#allocation2 + $0x60] sm:$0xff] %vm845_vm2, %v840_v52 }
 0x19d   : > { %4456 = vmatmul.msk.f32.gmra.mxu3 %vm366_vm1, %v6159_v12  ;;  %1714 = vmatmul.f32.gmra.mxu0 %v1503_v29 }
 0x19e   : > { %v1132_v5 = vpop.f32.mrf.mxu1 }
 0x1a0   : > { %v842_v53 = vpop.f32.mrf.mxu3 }
 0x1a1   : > { %v843_v6 = vadd.f32 %v842_v53, %v783_v43  ;;  %1599 = vmatmul.f32.gmra.mxu1 %v1505_v33  ;;  %v4566_v43 = vor.u32 %v5227_v36, %v4565_v1  ;;  %v6275_v53 = vld [vmem:[%s8106_s1 + $0x88] sm:$0xff] }
 0x1a2   : > { %v6167_v16 = vpop.f32.mrf.mxu0 }
 0x1a3   : > { %859 = vst.msk [vmem:[#allocation2 + $0x68] sm:$0xff] %vm845_vm2, %v843_v6  ;;  %v4441_v6 = vld [vmem:[%s5442_s29 + $0x538] sm:$0xff]  ;;  %2327 = vmatpush.bf16.msra.mxu0 %v4566_v43 }
 0x1a4   : > { %1762 = vmatpush.msrb.mxu2 %v4441_v6  ;;  %v4435_v6 = vld [vmem:[%s5442_s29 + $0x508] sm:$0xff] }
 0x1a5   : > { %4457 = vmatmul.msk.f32.gmra.mxu3 %vm366_vm1, %v6172_v55  ;;  %1717 = vmatmul.f32.gmra.mxu0 %v1505_v33  ;;  %v4549_v33 = vld [vmem:[%s8108_s3 + $0x60] sm:$0xf] }
 0x1a6   : > { %v1135_v9 = vpop.f32.mrf.mxu1 }
 0x1a8   : > { %v1191_v57 = vpop.f32.mrf.mxu3 }
 0x1a9   : > { %v1192_v48 = vadd.f32 %v1191_v57, %v1132_v5  ;;  %1602 = vmatmul.f32.gmra.mxu1 %v1507_v61  ;;  %v1517_v5 = vld [vmem:[%s8106_s1 + $0x80] sm:$0xff]  ;;  %v4550_v57 = vor.u32 %v5223_v10, %v4549_v33  ;;  %v1820_v33 = vld [vmem:[%s8107_s2 + $0x38] sm:$0xff]  ;;  %v1819_v10 = vld [vmem:[%s8107_s2 + $0x30] sm:$0xff] }
 0x1aa   : > { %v6182_v59 = vpop.f32.mrf.mxu0 }
 0x1ab   : > { %4380 = vmatmul.msk.f32.vlgmr.msra.gmra.mxu2 %vm366_vm1, %v1192_v48  ;;  %v5219_v48 = vld [vmem:[%s8108_s3 + $0x4c] sm:$0xf0]  ;;  %2328 = vmatpush.bf16.msra.mxu0 %v4550_v57  ;;  %v1818_v57 = vld [vmem:[%s8107_s2 + $0x28] sm:$0xff] }
 0x1ad   : > { %4458 = vmatmul.msk.f32.gmra.mxu3 %vm366_vm1, %v6187_v60  ;;  %1720 = vmatmul.f32.gmra.mxu0 %v1507_v61 }
 0x1ae   : > { %v1138_v42 = vpop.f32.mrf.mxu1 }
 0x1b0   : > { %v1194_v13 = vpop.f32.mrf.mxu3 }
 0x1b1   : > { %v1195_v20 = vadd.f32 %v1194_v13, %v1135_v9  ;;  %1605 = vmatmul.f32.gmra.mxu1 %v1509_v27  ;;  %v4533_v9 = vld [vmem:[%s8108_s3 + $0x40] sm:$0xf] }
 0x1b2   : > { %v6196_v22 = vpop.f32.mrf.mxu0  ;;  %v4534_v13 = vor.u32 %v5219_v48, %v4533_v9 }
 0x1b3   : > { %4381 = vmatmul.msk.f32.gmra.mxu2 %vm366_vm1, %v1195_v20 }
 0x1b4   : > { %2329 = vmatpush.bf16.msra.mxu0 %v4534_v13 }
 0x1b5   : > { %4459 = vmatmul.msk.f32.gmra.mxu3 %vm366_vm1, %v6201_v23  ;;  %1723 = vmatmul.f32.gmra.mxu0 %v1509_v27  ;;  %v6301_v27 = vld [vmem:[%s8106_s1 + $0x98] sm:$0xff] }
 0x1b6   : > { %v1141_v18 = vpop.f32.mrf.mxu1 }
 0x1b8   : > { %v1197_v30 = vpop.f32.mrf.mxu3 }
 0x1b9   : > { %v1198_v34 = vadd.f32 %v1197_v30, %v1138_v42  ;;  %1608 = vmatmul.f32.gmra.mxu1 %v1511_v38  ;;  %v4439_v30 = vld [vmem:[%s5442_s29 + $0x528] sm:$0xff] }
 0x1ba   : > { %v6210_v37 = vpop.f32.mrf.mxu0  ;;  %1763 = vmatpush.msrb.mxu2 %v4439_v30  ;;  %v4433_v30 = vld [vmem:[%s5442_s29 + $0x4f8] sm:$0xff] }
 0x1bb   : > { %4382 = vmatmul.msk.f32.gmra.mxu2 %vm366_vm1, %v1198_v34  ;;  %v4517_v34 = vld [vmem:[%s8108_s3 + $0x20] sm:$0xf] }
 0x1bc   : > { %1764 = vmatpush.msrb.mxu2 %v4437_v63  ;;  %v2021_v63 = vld [vmem:[#allocation2 + $0x8] sm:$0xff] }
 0x1bd   : > { %4460 = vmatmul.msk.f32.gmra.mxu3 %vm366_vm1, %v6215_v0  ;;  %1726 = vmatmul.f32.gmra.mxu0 %v1511_v38  ;;  %v5215_v38 = vld [vmem:[%s8108_s3 + $0x2c] sm:$0xf0] }
 0x1be   : > { %v1144_v15 = vpop.f32.mrf.mxu1  ;;  %1765 = vmatpush.msrb.mxu2 %v4435_v6 }
 0x1c0   : > { %v1200_v11 = vpop.f32.mrf.mxu3  ;;  %1766 = vmatpush.msrb.mxu2 %v4433_v30 }
 0x1c1   : > { %v1201_v19 = vadd.f32 %v1200_v11, %v1141_v18  ;;  %1611 = vmatmul.f32.gmra.mxu1 %v1513_v41  ;;  %v1828_v18 = vld [vmem:[%s8107_s2 + $0x78] sm:$0xff]  ;;  %v4518_v11 = vor.u32 %v5215_v38, %v4517_v34  ;;  %v4431_v34 = vld [vmem:[%s5442_s29 + $0x4e8] sm:$0xff]  ;;  %v1815_v38 = vld [vmem:[%s8107_s2 + $0x10] sm:$0xff] }
 0x1c2   : > { %v6224_v56 = vpop.f32.mrf.mxu0  ;;  %1888 = vmatpush.msra.mxu1 %v1828_v18  ;;  %v1816_v18 = vld [vmem:[%s8107_s2 + $0x18] sm:$0xff]  ;;  %1767 = vmatpush.msrb.mxu2 %v4431_v34 }
 0x1c3   : > { %4383 = vmatmul.msk.f32.gmra.mxu2 %vm366_vm1, %v1201_v19  ;;  %v4501_v19 = vld [vmem:[%s8108_s3] sm:$0xf]  ;;  %2330 = vmatpush.bf16.msra.mxu0 %v4518_v11  ;;  %v1814_v11 = vld [vmem:[%s8107_s2 + $0x8] sm:$0xff] }
 0x1c4   : > { %1889 = vmatpush.msra.mxu1 %v1827_v7  ;;  %v4429_v7 = vld [vmem:[%s5442_s29 + $0x4d8] sm:$0xff] }
 0x1c5   : > { %4461 = vmatmul.msk.f32.gmra.mxu3 %vm366_vm1, %v6229_v25  ;;  %1729 = vmatmul.f32.gmra.mxu0 %v1513_v41  ;;  %v5211_v41 = vld [vmem:[%s8108_s3 + $0xc] sm:$0xf0] }
 0x1c6   : > { %v1147_v46 = vpop.f32.mrf.mxu1  ;;  %v4502_v24 = vor.u32 %v5211_v41, %v4501_v19  ;;  %1768 = vmatpush.msrb.mxu2 %v4429_v7  ;;  %v2025_v7 = vld [vmem:[#allocation2 + $0x28] sm:$0xff] }
 0x1c8   : > { %v1203_v44 = vpop.f32.mrf.mxu3  ;;  %2331 = vmatpush.bf16.msra.mxu0 %v4502_v24 }
 0x1c9   : > { %v1204_v35 = vadd.f32 %v1203_v44, %v1144_v15  ;;  %1614 = vmatmul.f32.gmra.mxu1 %v1515_v62  ;;  %v1826_v15 = vld [vmem:[%s8107_s2 + $0x68] sm:$0xff] }
 0x1ca   : > { %v6244_v54 = vpop.f32.mrf.mxu0  ;;  %1890 = vmatpush.msra.mxu1 %v1826_v15 }
 0x1cb   : > { %4384 = vmatmul.msk.f32.gmra.mxu2 %vm366_vm1, %v1204_v35  ;;  %v6339_v35 = vld [vmem:[%s8106_s1 + $0xa8] sm:$0xff] }
 0x1cd   : > { %4462 = vmatmul.msk.f32.gmra.mxu3 %vm366_vm1, %v6249_v58  ;;  %1732 = vmatmul.f32.gmra.mxu0 %v1515_v62  ;;  %v1521_v62 = vld [vmem:[%s8106_s1 + $0xa0] sm:$0xff] }
 0x1ce   : > { %v1150_v40 = vpop.f32.mrf.mxu1 }
 0x1d0   : > { %v1206_v8 = vpop.f32.mrf.mxu3 }
 0x1d1   : > { %v1207_v52 = vadd.f32 %v1206_v8, %v1147_v46  ;;  %1617 = vmatmul.f32.gmra.mxu1 %v1517_v5  ;;  %v1825_v46 = vld [vmem:[%s8107_s2 + $0x60] sm:$0xff] }
 0x1d2   : > { %v6270_v29 = vpop.f32.mrf.mxu0  ;;  %1891 = vmatpush.msra.mxu1 %v1825_v46  ;;  %v1527_v46 = vld [vmem:[%s8106_s1 + $0xd0] sm:$0xff] }
 0x1d3   : > { %4385 = vmatmul.msk.f32.gmra.mxu2 %vm366_vm1, %v1207_v52  ;;  %v6365_v52 = vld [vmem:[%s8106_s1 + $0xb8] sm:$0xff] }
 0x1d4   : > { %1892 = vmatpush.msra.mxu1 %v1824_v50 }
 0x1d5   : > { %4463 = vmatmul.msk.f32.gmra.mxu3 %vm366_vm1, %v6275_v53  ;;  %1735 = vmatmul.f32.gmra.mxu0 %v1517_v5  ;;  %v1523_v5 = vld [vmem:[%s8106_s1 + $0xb0] sm:$0xff] }
 0x1d6   : > { %v1153_v14 = vpop.f32.mrf.mxu1  ;;  %1893 = vmatpush.msra.mxu1 %v1823_v2 }
 0x1d8   : > { %v1209_v61 = vpop.f32.mrf.mxu3  ;;  %1894 = vmatpush.msra.mxu1 %v1822_v51 }
 0x1d9   : > { %v1210_v42 = vadd.f32 %v1209_v61, %v1150_v40  ;;  %1620 = vmatmul.f32.gmra.mxu1 %v1519_v28  ;;  %v1821_v40 = vld [vmem:[%s8107_s2 + $0x40] sm:$0xff] }
 0x1da   : > { %v6296_v20 = vpop.f32.mrf.mxu0  ;;  %1895 = vmatpush.msra.mxu1 %v1821_v40 }
 0x1db   : > { %4386 = vmatmul.msk.f32.gmra.mxu2 %vm366_vm1, %v1210_v42  ;;  %v6391_v42 = vld [vmem:[%s8106_s1 + $0xc8] sm:$0xff] }
 0x1dc   : > { %1896 = vmatpush.msra.mxu1 %v1820_v33 }
 0x1dd   : > { %4464 = vmatmul.msk.f32.gmra.mxu3 %vm366_vm1, %v6301_v27  ;;  %1738 = vmatmul.f32.gmra.mxu0 %v1519_v28  ;;  %v1525_v28 = vld [vmem:[%s8106_s1 + $0xc0] sm:$0xff] }
 0x1de   : > { %v1156_v45 = vpop.f32.mrf.mxu1  ;;  %1897 = vmatpush.msra.mxu1 %v1819_v10  ;;  %v2023_v10 = vld [vmem:[#allocation2 + $0x18] sm:$0xff] }
 0x1e0   : > { %v1212_v26 = vpop.f32.mrf.mxu3  ;;  %1898 = vmatpush.msra.mxu1 %v1818_v57 }
 0x1e1   : > { %v1213_v44 = vadd.f32 %v1212_v26, %v1153_v14  ;;  %1623 = vmatmul.f32.gmra.mxu1 %v1521_v62  ;;  %v1817_v14 = vld [vmem:[%s8107_s2 + $0x20] sm:$0xff]  ;;  %v4427_v26 = vld [vmem:[%s5442_s29 + $0x4c8] sm:$0xff] }
 0x1e2   : > { %v6334_v47 = vpop.f32.mrf.mxu0  ;;  %1899 = vmatpush.msra.mxu1 %v1817_v14  ;;  %1769 = vmatpush.msrb.mxu2 %v4427_v26 }
 0x1e3   : > { %4387 = vmatmul.msk.f32.gmra.mxu2 %vm366_vm1, %v1213_v44  ;;  %v6420_v44 = vld [vmem:[%s8106_s1 + $0xd8] sm:$0xff] }
 0x1e4   : > { %1900 = vmatpush.msra.mxu1 %v1816_v18 }
 0x1e5   : > { %4465 = vmatmul.msk.f32.gmra.mxu3 %vm366_vm1, %v6339_v35  ;;  %1741 = vmatmul.f32.gmra.mxu0 %v1521_v62 }
 0x1e6   : > { %v1159_v36 = vpop.f32.mrf.mxu1  ;;  %1901 = vmatpush.msra.mxu1 %v1815_v38 }
 0x1e8   : > { %v1215_v1 = vpop.f32.mrf.mxu3  ;;  %1902 = vmatpush.msra.mxu1 %v1814_v11 }
 0x1e9   : > { %v1216_v8 = vadd.f32 %v1215_v1, %v1156_v45  ;;  %1626 = vmatmul.f32.gmra.mxu1 %v1523_v5  ;;  %v1813_v45 = vld [vmem:[%s8107_s2] sm:$0xff] }
 0x1ea   : > { %v6360_v43 = vpop.f32.mrf.mxu0  ;;  %1903 = vmatpush.msra.mxu1 %v1813_v45  ;;  %v2020_v1 = vld [vmem:[#allocation2] sm:$0xff] }
 0x1eb   : > { %4388 = vmatmul.msk.f32.gmra.mxu2 %vm366_vm1, %v1216_v8 }
 0x1ed   : > { %4466 = vmatmul.msk.f32.gmra.mxu3 %vm366_vm1, %v6365_v52  ;;  %1744 = vmatmul.f32.gmra.mxu0 %v1523_v5 }
 0x1ee   : > { %v1162_v48 = vpop.f32.mrf.mxu1 }
 0x1f0   : > { %v1218_v9 = vpop.f32.mrf.mxu3 }
 0x1f1   : > { %v1219_v61 = vadd.f32 %v1218_v9, %v1159_v36  ;;  %1629 = vmatmul.f32.gmra.mxu1 %v1525_v28  ;;  %v6431_v36 = vpack.c.bf16 %v2021_v63, %v2020_v1  ;;  %v1842_v63 = vld [vmem:[%s8107_s2 + $0xe8] sm:$0xf]  ;;  %v2027_v1 = vld [vmem:[#allocation2 + $0x38] sm:$0xff] }
 0x1f2   : > { %v6386_v13 = vpop.f32.mrf.mxu0  ;;  %4484 = vmatpush.msk.msra.mxu3 %vm409_vm0, %v1842_v63 }
 0x1f3   : > { %4389 = vmatmul.msk.f32.gmra.mxu2 %vm366_vm1, %v1219_v61  ;;  %v2022_v61 = vld [vmem:[#allocation2 + $0x10] sm:$0xff] }
 0x1f4   : > { %v6441_v14 = vpack.c.bf16 %v2023_v10, %v2022_v61  ;;  %v1841_v10 = vld [vmem:[%s8107_s2 + $0xe0] sm:$0xff] }
 0x1f5   : > { %4467 = vmatmul.msk.f32.gmra.mxu3 %vm366_vm1, %v6391_v42  ;;  %1747 = vmatmul.f32.gmra.mxu0 %v1525_v28 }
 0x1f6   : > { %v1165_v19 = vpop.f32.mrf.mxu1  ;;  %1950 = vmatpush.msra.mxu3 %v1841_v10 }
 0x1f8   : > { %v1221_v15 = vpop.f32.mrf.mxu3 }
 0x1f9   : > { %v1222_v41 = vadd.f32 %v1221_v15, %v1162_v48  ;;  %1632 = vmatmul.f32.gmra.mxu1 %v1527_v46 }
 0x1fa   : > { %v6415_v24 = vpop.f32.mrf.mxu0 }
 0x1fb   : > { %4390 = vmatmul.msk.f32.gmra.mxu2 %vm366_vm1, %v1222_v41  ;;  %v2024_v41 = vld [vmem:[#allocation2 + $0x20] sm:$0xff] }
 0x1fc   : > { %v6453_v26 = vpack.c.bf16 %v2025_v7, %v2024_v41  ;;  %v2029_v7 = vld [vmem:[#allocation2 + $0x48] sm:$0xff] }
 0x1fd   : > { %4468 = vmatmul.msk.f32.gmra.mxu3 %vm366_vm1, %v6420_v44  ;;  %1750 = vmatmul.f32.gmra.mxu0 %v1527_v46 }
 0x1fe   : > { %v1168_v50 = vpop.f32.mrf.mxu1 }
 0x200   : > { %v1224_v62 = vpop.f32.mrf.mxu3 }
 0x201   : > { %v1225_v2 = vadd.f32 %v1224_v62, %v1165_v19 }
 0x202   : > { %v6428_v51 = vpop.f32.mrf.mxu0 }
 0x203   : > { %4391 = vmatmul.msk.f32.gmra.mxu2 %vm366_vm1, %v1225_v2 }
 0x205   : > { %4611 = vmatmul.msk.bf16.vlgmr.msra.gmra.mxu0 %vm845_vm2, %v6431_v36 }
 0x206   : > { %v1171_v40 = vpop.f32.mrf.mxu1 }
 0x208   : > { %v1227_v8 = vpop.f32.mrf.mxu3 }
 0x209   : > { %v1228_v5 = vadd.f32 %v1227_v8, %v1168_v50 }
 0x20a   : > { %v6435_v6 = vpop.f32.mrf.mxu0 }
 0x20b   : > { %4392 = vmatmul.msk.f32.gmra.mxu2 %vm366_vm1, %v1228_v5 }
 0x20e   : > { %v1594_v57 = vpop.f32.mrf.mxu1 }
 0x210   : > { %v1230_v33 = vpop.f32.mrf.mxu3 }
 0x211   : > { %v1231_v9 = vadd.f32 %v1230_v33, %v1171_v40  ;;  %v2026_v33 = vld [vmem:[#allocation2 + $0x30] sm:$0xff] }
 0x212   : > { %v6438_v48 = vpop.f32.mrf.mxu0 }
 0x213   : > { %4393 = vmatmul.msk.f32.gmra.mxu2 %vm366_vm1, %v1231_v9 }
 0x215   : > { %4612 = vmatmul.msk.bf16.gmra.mxu0 %vm845_vm2, %v6441_v14 }
 0x216   : > { %v1597_v30 = vpop.f32.mrf.mxu1 }
 0x218   : > { %v1653_v28 = vpop.f32.mrf.mxu3 }
 0x219   : > { %v1654_v18 = vadd.f32 %v1653_v28, %v1594_v57 }
 0x21a   : > { %v6445_v34 = vpop.f32.mrf.mxu0 }
 0x21b   : > { %4470 = vmatmul.msk.f32.vlgmr.msrb.gmra.mxu2 %vm366_vm1, %v6148_v4  ;;  %1904 = vmatmul.f32.vlgmr.msra.gmra.mxu1 %v1654_v18 }
 0x21e   : > { %v1600_v11 = vpop.f32.mrf.mxu1 }
 0x220   : > { %v1656_v38 = vpop.f32.mrf.mxu3 }
 0x221   : > { %v1657_v15 = vadd.f32 %v1656_v38, %v1597_v30 }
 0x222   : > { %v6449_v19 = vpop.f32.mrf.mxu0 }
 0x223   : > { %4471 = vmatmul.msk.f32.gmra.mxu2 %vm366_vm1, %v6159_v12  ;;  %1907 = vmatmul.f32.gmra.mxu1 %v1657_v15 }
 0x225   : > { %4613 = vmatmul.msk.bf16.gmra.mxu0 %vm845_vm2, %v6453_v26 }
 0x226   : > { %v1603_v46 = vpop.f32.mrf.mxu1 }
 0x228   : > { %v1659_v45 = vpop.f32.mrf.mxu3 }
 0x229   : > { %v1660_v4 = vadd.f32 %v1659_v45, %v1600_v11  ;;  %v2028_v45 = vld [vmem:[#allocation2 + $0x40] sm:$0xff] }
 0x22a   : > { %v6457_v62 = vpop.f32.mrf.mxu0 }
 0x22b   : > { %4472 = vmatmul.msk.f32.gmra.mxu2 %vm366_vm1, %v6172_v55  ;;  %1910 = vmatmul.f32.gmra.mxu1 %v1660_v4  ;;  %v6474_v55 = vpack.c.bf16 %v2027_v1, %v2026_v33  ;;  %v4599_v1 = vld [vmem:[%s8108_s3 + $0xd0] sm:$0xf0] }
 0x22e   : > { %v1384_v12 = vpop.f32.mrf.mxu2  ;;  %v1606_v8 = vpop.f32.mrf.mxu1 }
 0x22f   : > { %v1385_v50 = vadd.f32 %v1384_v12, %v6167_v16 }
 0x230   : > { %v1662_v2 = vpop.f32.mrf.mxu3 }
 0x231   : > { %1426 = vst.msk [vmem:[#allocation2 + $0x70] sm:$0xff] %vm845_vm2, %v1385_v50  ;;  %v1663_v40 = vadd.f32 %v1662_v2, %v1603_v46  ;;  %v1839_v46 = vld [vmem:[%s8107_s2 + $0xd0] sm:$0xff] }
 0x232   : > { %v6467_v5 = vpop.f32.mrf.mxu0 }
 0x233   : > { %4473 = vmatmul.msk.f32.gmra.mxu2 %vm366_vm1, %v6187_v60  ;;  %1913 = vmatmul.f32.gmra.mxu1 %v1663_v40  ;;  %v1840_v60 = vld [vmem:[%s8107_s2 + $0xd8] sm:$0xff] }
 0x234   : > { %1951 = vmatpush.msra.mxu3 %v1840_v60  ;;  %v2030_v60 = vld [vmem:[#allocation2 + $0x50] sm:$0xff] }
 0x235   : > { %4614 = vmatmul.msk.bf16.gmra.mxu0 %vm845_vm2, %v6474_v55 }
 0x236   : > { %v1387_v16 = vpop.f32.mrf.mxu2  ;;  %v1609_v61 = vpop.f32.mrf.mxu1  ;;  %1952 = vmatpush.msra.mxu3 %v1839_v46 }
 0x237   : > { %v1388_v57 = vadd.f32 %v1387_v16, %v6182_v59 }
 0x238   : > { %v1665_v9 = vpop.f32.mrf.mxu3 }
 0x239   : > { %1427 = vst.msk [vmem:[#allocation2 + $0x78] sm:$0xff] %vm845_vm2, %v1388_v57  ;;  %v1666_v28 = vadd.f32 %v1665_v9, %v1606_v8  ;;  %v4605_v8 = vld [vmem:[%s8108_s3 + $0xc8] sm:$0xf]  ;;  %v2031_v9 = vld [vmem:[#allocation2 + $0x58] sm:$0xff] }
 0x23a   : > { %v6480_v30 = vpop.f32.mrf.mxu0 }
 0x23b   : > { %4474 = vmatmul.msk.f32.gmra.mxu2 %vm366_vm1, %v6201_v23  ;;  %1916 = vmatmul.f32.gmra.mxu1 %v1666_v28  ;;  %v6496_v23 = vpack.c.bf16 %v2029_v7, %v2028_v45  ;;  %v6542_v45 = vpack.c.bf16 %v2031_v9, %v2030_v60  ;;  %v5224_v9 = vld [vmem:[%s8108_s3 + $0x74] sm:$0xf0]  ;;  %v4535_v60 = vld [vmem:[%s8108_s3 + $0x50] sm:$0xf0] }
 0x23e   : > { %v1390_v18 = vpop.f32.mrf.mxu2  ;;  %v1612_v11 = vpop.f32.mrf.mxu1 }
 0x23f   : > { %v1391_v38 = vadd.f32 %v1390_v18, %v6196_v22  ;;  %v5229_v18 = vld [vmem:[%s8108_s3 + $0xa4] sm:$0xf] }
 0x240   : > { %v1668_v59 = vpop.f32.mrf.mxu3 }
 0x241   : > { %1428 = vst.msk [vmem:[#allocation2 + $0x80] sm:$0xff] %vm845_vm2, %v1391_v38  ;;  %v1669_v15 = vadd.f32 %v1668_v59, %v1609_v61  ;;  %v4583_v38 = vld [vmem:[%s8108_s3 + $0xb0] sm:$0xf0] }
 0x242   : > { %v6489_v41 = vpop.f32.mrf.mxu0  ;;  %v4586_v7 = vor.u32 %v5229_v18, %v4583_v38  ;;  %v4541_v18 = vld [vmem:[%s8108_s3 + $0x48] sm:$0xf] }
 0x243   : > { %4475 = vmatmul.msk.f32.gmra.mxu2 %vm366_vm1, %v6215_v0  ;;  %1919 = vmatmul.f32.gmra.mxu1 %v1669_v15  ;;  %v1838_v0 = vld [vmem:[%s8107_s2 + $0xc8] sm:$0xff]  ;;  %v5232_v15 = vld [vmem:[%s8108_s3 + $0xb4] sm:$0xf0] }
 0x244   : > { %1953 = vmatpush.msra.mxu3 %v1838_v0 }
 0x245   : > { %4615 = vmatmul.msk.bf16.gmra.mxu0 %vm845_vm2, %v6496_v23 }
 0x246   : > { %v1393_v22 = vpop.f32.mrf.mxu2  ;;  %v1615_v12 = vpop.f32.mrf.mxu1 }
 0x247   : > { %v1394_v4 = vadd.f32 %v1393_v22, %v6210_v37  ;;  %v5233_v37 = vld [vmem:[%s8108_s3 + $0xc4] sm:$0xf] }
 0x248   : > { %v1671_v63 = vpop.f32.mrf.mxu3  ;;  %v4602_v33 = vor.u32 %v5233_v37, %v4599_v1  ;;  %v5225_v22 = vld [vmem:[%s8108_s3 + $0x84] sm:$0xf] }
 0x249   : > { %1429 = vst.msk [vmem:[#allocation2 + $0x88] sm:$0xff] %vm845_vm2, %v1394_v4  ;;  %v1672_v50 = vadd.f32 %v1671_v63, %v1612_v11  ;;  %v4589_v11 = vld [vmem:[%s8108_s3 + $0xa8] sm:$0xf]  ;;  %v4567_v4 = vld [vmem:[%s8108_s3 + $0x90] sm:$0xf0] }
 0x24a   : > { %v6502_v2 = vpop.f32.mrf.mxu0  ;;  %2439 = vmatpush.bf16.msra.mxu2 %v4602_v33  ;;  %v4590_v46 = vor.u32 %v5232_v15, %v4589_v11  ;;  %v5221_v33 = vld [vmem:[%s8108_s3 + $0x64] sm:$0xf] }
 0x24b   : > { %4476 = vmatmul.msk.f32.gmra.mxu2 %vm366_vm1, %v6229_v25  ;;  %1922 = vmatmul.f32.gmra.mxu1 %v1672_v50  ;;  %v5236_v25 = vld [vmem:[%s8108_s3 + $0xd4] sm:$0xf0] }
 0x24c   : > { %v4606_v16 = vor.u32 %v5236_v25, %v4605_v8  ;;  %v5228_v50 = vld [vmem:[%s8108_s3 + $0x94] sm:$0xf0]  ;;  %v4551_v25 = vld [vmem:[%s8108_s3 + $0x70] sm:$0xf0] }
 0x24e   : > { %v1396_v40 = vpop.f32.mrf.mxu2  ;;  %v1618_v61 = vpop.f32.mrf.mxu1  ;;  %2553 = vmatpush.bf16.msrb.mxu1 %v4606_v16  ;;  %2440 = vmatpush.bf16.msra.mxu2 %v4586_v7  ;;  %v4554_v16 = vor.u32 %v5221_v33, %v4551_v25 }
 0x24f   : > { %v1397_v10 = vadd.f32 %v1396_v40, %v6224_v56  ;;  %v1837_v56 = vld [vmem:[%s8107_s2 + $0xc0] sm:$0xff] }
 0x250   : > { %v1674_v57 = vpop.f32.mrf.mxu3  ;;  %1954 = vmatpush.msra.mxu3 %v1837_v56 }
 0x251   : > { %1430 = vst.msk [vmem:[#allocation2 + $0x90] sm:$0xff] %vm845_vm2, %v1397_v10  ;;  %v1675_v28 = vadd.f32 %v1674_v57, %v1615_v12  ;;  %v4570_v12 = vor.u32 %v5225_v22, %v4567_v4  ;;  %v4557_v57 = vld [vmem:[%s8108_s3 + $0x68] sm:$0xf] }
 0x252   : > { %v6529_v59 = vpop.f32.mrf.mxu0  ;;  %2554 = vmatpush.bf16.msrb.mxu1 %v4590_v46  ;;  %v2033_v46 = vld [vmem:[#allocation2 + $0x68] sm:$0xff] }
 0x253   : > { %4477 = vmatmul.msk.f32.gmra.mxu2 %vm366_vm1, %v6249_v58  ;;  %1925 = vmatmul.f32.gmra.mxu1 %v1675_v28  ;;  %v4573_v58 = vld [vmem:[%s8108_s3 + $0x88] sm:$0xf]  ;;  %v5217_v28 = vld [vmem:[%s8108_s3 + $0x44] sm:$0xf] }
 0x254   : > { %v4574_v37 = vor.u32 %v5228_v50, %v4573_v58  ;;  %2441 = vmatpush.bf16.msra.mxu2 %v4570_v12  ;;  %v4538_v56 = vor.u32 %v5217_v28, %v4535_v60  ;;  %v5213_v58 = vld [vmem:[%s8108_s3 + $0x24] sm:$0xf]  ;;  %v5216_v50 = vld [vmem:[%s8108_s3 + $0x34] sm:$0xf0] }
 0x255   : > { %4616 = vmatmul.msk.bf16.gmra.mxu0 %vm845_vm2, %v6542_v45  ;;  %v2035_v28 = vld [vmem:[#allocation2 + $0x78] sm:$0xff] }
 0x256   : > { %v1399_v63 = vpop.f32.mrf.mxu2  ;;  %v1621_v8 = vpop.f32.mrf.mxu1  ;;  %2555 = vmatpush.bf16.msrb.mxu1 %v4574_v37 }
 0x257   : > { %v1400_v0 = vadd.f32 %v1399_v63, %v6244_v54  ;;  %v1836_v54 = vld [vmem:[%s8107_s2 + $0xb8] sm:$0xff]  ;;  %v2032_v63 = vld [vmem:[#allocation2 + $0x60] sm:$0xff] }
 0x258   : > { %v1677_v1 = vpop.f32.mrf.mxu3  ;;  %1955 = vmatpush.msra.mxu3 %v1836_v54  ;;  %2442 = vmatpush.bf16.msra.mxu2 %v4554_v16 }
 0x259   : > { %1431 = vst.msk [vmem:[#allocation2 + $0x98] sm:$0xff] %vm845_vm2, %v1400_v0  ;;  %v1678_v40 = vadd.f32 %v1677_v1, %v1618_v61  ;;  %v4558_v61 = vor.u32 %v5224_v9, %v4557_v57  ;;  %v6612_v0 = vpack.c.bf16 %v2033_v46, %v2032_v63  ;;  %v5209_v1 = vld [vmem:[%s8108_s3 + $0x4] sm:$0xf] }
 0x25a   : > { %v6566_v10 = vpop.f32.mrf.mxu0  ;;  %1956 = vmatpush.msra.mxu3 %v6070_v21  ;;  %v4519_v21 = vld [vmem:[%s8108_s3 + $0x30] sm:$0xf0] }
 0x25b   : > { %4478 = vmatmul.msk.f32.gmra.mxu2 %vm366_vm1, %v6275_v53  ;;  %1928 = vmatmul.f32.gmra.mxu1 %v1678_v40  ;;  %v5220_v53 = vld [vmem:[%s8108_s3 + $0x54] sm:$0xf0]  ;;  %v4522_v12 = vor.u32 %v5213_v58, %v4519_v21  ;;  %v2036_v21 = vld [vmem:[#allocation2 + $0x80] sm:$0xff] }
 0x25c   : > { %2556 = vmatpush.bf16.msrb.mxu1 %v4558_v61  ;;  %v4542_v11 = vor.u32 %v5220_v53, %v4541_v18  ;;  %2443 = vmatpush.bf16.msra.mxu2 %v4538_v56  ;;  %v2034_v18 = vld [vmem:[#allocation2 + $0x70] sm:$0xff] }
 0x25d   : > { %1957 = vmatpush.msra.mxu3 %v6092_v17  ;;  %v4525_v17 = vld [vmem:[%s8108_s3 + $0x28] sm:$0xf] }
 0x25e   : > { %v1402_v38 = vpop.f32.mrf.mxu2  ;;  %v1624_v22 = vpop.f32.mrf.mxu1  ;;  %v4526_v37 = vor.u32 %v5216_v50, %v4525_v17 }
 0x25f   : > { %v1403_v7 = vadd.f32 %v1402_v38, %v6270_v29  ;;  %1958 = vmatpush.msra.mxu3 %v6108_v32  ;;  %v4503_v32 = vld [vmem:[%s8108_s3 + $0x10] sm:$0xf0] }
 0x260   : > { %v1680_v15 = vpop.f32.mrf.mxu3  ;;  %2557 = vmatpush.bf16.msrb.mxu1 %v4542_v11  ;;  %2444 = vmatpush.bf16.msra.mxu2 %v4522_v12  ;;  %v4506_v40 = vor.u32 %v5209_v1, %v4503_v32 }
 0x261   : > { %1432 = vst.msk [vmem:[#allocation2 + $0xa0] sm:$0xff] %vm845_vm2, %v1403_v7  ;;  %v1681_v4 = vadd.f32 %v1680_v15, %v1621_v8  ;;  %1959 = vmatpush.msra.mxu3 %v6118_v49  ;;  %v5212_v49 = vld [vmem:[%s8108_s3 + $0x14] sm:$0xf0] }
 0x262   : > { %v6601_v29 = vpop.f32.mrf.mxu0 }
 0x263   : > { %4479 = vmatmul.msk.f32.gmra.mxu2 %vm366_vm1, %v6301_v27  ;;  %1931 = vmatmul.f32.gmra.mxu1 %v1681_v4  ;;  %v4509_v27 = vld [vmem:[%s8108_s3 + $0x8] sm:$0xf] }
 0x264   : > { %2558 = vmatpush.bf16.msrb.mxu1 %v4526_v37  ;;  %1960 = vmatpush.msra.mxu3 %v6126_v31  ;;  %v4510_v25 = vor.u32 %v5212_v49, %v4509_v27  ;;  %v2038_v49 = vld [vmem:[#allocation2 + $0x90] sm:$0xff] }
 0x265   : > { %4617 = vmatmul.msk.bf16.gmra.mxu0 %vm845_vm2, %v6612_v0  ;;  %2445 = vmatpush.bf16.msra.mxu2 %v4506_v40 }
 0x266   : > { %v1405_v8 = vpop.f32.mrf.mxu2  ;;  %1961 = vmatpush.msra.mxu3 %v6132_v3  ;;  %v1627_v9 = vpop.f32.mrf.mxu1 }
 0x267   : > { %v1406_v33 = vadd.f32 %v1405_v8, %v6296_v20 }
 0x268   : > { %v1683_v54 = vpop.f32.mrf.mxu3  ;;  %2559 = vmatpush.bf16.msrb.mxu1 %v4510_v25  ;;  %1962 = vmatpush.msra.mxu3 %v6138_v39  ;;  %v6644_v39 = vpack.c.bf16 %v2035_v28, %v2034_v18 }
 0x269   : > { %1433 = vst.msk [vmem:[#allocation2 + $0xa8] sm:$0xff] %vm845_vm2, %v1406_v33  ;;  %v1684_v16 = vadd.f32 %v1683_v54, %v1624_v22  ;;  %v2037_v22 = vld [vmem:[#allocation2 + $0x88] sm:$0xff] }
 0x26a   : > { %v6633_v57 = vpop.f32.mrf.mxu0 }
 0x26b   : > { %4480 = vmatmul.msk.f32.gmra.mxu2 %vm366_vm1, %v6339_v35  ;;  %1934 = vmatmul.f32.gmra.mxu1 %v1684_v16 }
 0x26e   : > { %v1408_v31 = vpop.f32.mrf.mxu2  ;;  %v1630_v38 = vpop.f32.mrf.mxu1 }
 0x26f   : > { %v1409_v20 = vadd.f32 %v1408_v31, %v6334_v47 }
 0x270   : > { %v1686_v61 = vpop.f32.mrf.mxu3 }
 0x271   : > { %1434 = vst.msk [vmem:[#allocation2 + $0xb0] sm:$0xff] %vm845_vm2, %v1409_v20  ;;  %v1687_v3 = vadd.f32 %v1686_v61, %v1627_v9 }
 0x272   : > { %v6640_v60 = vpop.f32.mrf.mxu0 }
 0x273   : > { %4481 = vmatmul.msk.f32.gmra.mxu2 %vm366_vm1, %v6365_v52  ;;  %1937 = vmatmul.f32.gmra.mxu1 %v1687_v3 }
 0x275   : > { %4618 = vmatmul.msk.bf16.gmra.mxu0 %vm845_vm2, %v6644_v39 }
 0x276   : > { %v1411_v35 = vpop.f32.mrf.mxu2  ;;  %v1633_v11 = vpop.f32.mrf.mxu1 }
 0x277   : > { %v1412_v47 = vadd.f32 %v1411_v35, %v6360_v43  ;;  %v6659_v43 = vld [vmem:[%s8109_s4] sm:$0xf]  ;;  %v4607_v35 = vld [vmem:[%s8108_s3 + $0xd8] sm:$0xf0] }
 0x278   : > { %v1689_v56 = vpop.f32.mrf.mxu3 }
 0x279   : > { %1435 = vst.msk [vmem:[#allocation2 + $0xb8] sm:$0xff] %vm845_vm2, %v1412_v47  ;;  %v1690_v53 = vadd.f32 %v1689_v56, %v1630_v38  ;;  %v2041_v56 = vld [vmem:[#allocation2 + $0xa8] sm:$0xff] }
 0x27a   : > { %v6650_v7 = vpop.f32.mrf.mxu0 }
 0x27b   : > { %4482 = vmatmul.msk.f32.gmra.mxu2 %vm366_vm1, %v6391_v42  ;;  %1940 = vmatmul.f32.gmra.mxu1 %v1690_v53  ;;  %v6663_v42 = vpack.c.bf16 %v2037_v22, %v2036_v21 }
 0x27e   : > { %v1414_v52 = vpop.f32.mrf.mxu2 }
 0x27f   : > { %v1415_v15 = vadd.f32 %v1414_v52, %v6386_v13  ;;  %v6666_v13 = vperm.slane %v6659_v43, 0 }
 0x280   : > { %v1692_v46 = vpop.f32.mrf.mxu3 }
 0x281   : > { %1436 = vst.msk [vmem:[#allocation2 + $0xc0] sm:$0xff] %vm845_vm2, %v1415_v15  ;;  %v1693_v4 = vadd.f32 %v1692_v46, %v1633_v11  ;;  %v2040_v11 = vld [vmem:[#allocation2 + $0xa0] sm:$0xff] }
 0x282   : > { %v2333_v58 = vpop.f32.mrf.mxu0 }
 0x283   : > { %4483 = vmatmul.msk.f32.gmra.mxu2 %vm366_vm1, %v6420_v44  ;;  %1943 = vmatmul.f32.gmra.mxu1 %v1693_v4  ;;  %v2334_v17 = vadd.f32 %v2333_v58, %v6666_v13 }
 0x285   : > { %4619 = vmatmul.msk.bf16.gmra.mxu0 %vm845_vm2, %v6663_v42  ;;  %v2780_v44 = vmax.f32 %v2334_v17, 0.0 }
 0x286   : > { %v1417_v63 = vpop.f32.mrf.mxu2 }
 0x287   : > { %v1418_v12 = vadd.f32 %v1417_v63, %v6415_v24  ;;  %v2039_v24 = vld [vmem:[#allocation2 + $0x98] sm:$0xff] }
 0x288   : > { %v6681_v25 = vpack.c.bf16 %v2039_v24, %v2038_v49  ;;  %v2042_v24 = vld [vmem:[#allocation2 + $0xb0] sm:$0xff] }
 0x289   : > { %1437 = vst.msk [vmem:[#allocation2 + $0xc8] sm:$0xff] %vm845_vm2, %v1418_v12 }
 0x28a   : > { %v2335_v50 = vpop.f32.mrf.mxu0 }
 0x28b   : > { %v2336_v37 = vadd.f32 %v2335_v50, %v6666_v13  ;;  %4632 = vmatmul.msk.bf16.vlgmr.msra.gmra.mxu2 %vm845_vm2, %v6431_v36  ;;  %4653 = vmatmul.msk.bf16.vlgmr.msrb.gmra.mxu1 %vm845_vm2, %v6431_v36 }
 0x28d   : > { %v2784_v1 = vmax.f32 %v2336_v37, 0.0  ;;  %v4591_v37 = vld [vmem:[%s8108_s3 + $0xb8] sm:$0xf0] }
 0x28e   : > { %v1420_v32 = vpop.f32.mrf.mxu2 }
 0x28f   : > { %v2948_v27 = vadd.f32 %v2784_v1, %v2780_v44  ;;  %v1421_v8 = vadd.f32 %v1420_v32, %v6428_v51  ;;  %v2043_v1 = vld [vmem:[#allocation2 + $0xb8] sm:$0xff] }
 0x291   : > { %1438 = vst.msk [vmem:[#allocation2 + $0xd0] sm:$0xff] %vm845_vm2, %v1421_v8 }
 0x292   : > { %v2338_v40 = vpop.f32.mrf.mxu0 }
 0x293   : > { %v2339_v33 = vadd.f32 %v2338_v40, %v6666_v13  ;;  %v6729_v40 = vpack.c.bf16 %v2043_v1, %v2042_v24 }
 0x295   : > { %v2788_v54 = vmax.f32 %v2339_v33, 0.0  ;;  %4620 = vmatmul.msk.bf16.gmra.mxu0 %vm845_vm2, %v6681_v25 }
 0x296   : > { %v1423_v16 = vpop.f32.mrf.mxu2 }
 0x297   : > { %v2949_v9 = vadd.f32 %v2948_v27, %v2788_v54  ;;  %v1424_v31 = vadd.f32 %v1423_v16, %v6435_v6  ;;  %v5234_v6 = vld [vmem:[%s8108_s3 + $0xcc] sm:$0xf] }
 0x298   : > { %v6686_v20 = vpop.f32.mrf.mxu1  ;;  %v4610_v53 = vor.u32 %v5234_v6, %v4607_v35  ;;  %v2045_v6 = vld [vmem:[#allocation2 + $0xc8] sm:$0xff] }
 0x299   : > { %1439 = vst.msk [vmem:[#allocation2 + $0xd8] sm:$0xff] %vm845_vm2, %v1424_v31 }
 0x29a   : > { %v2340_v51 = vpop.f32.mrf.mxu0  ;;  %2667 = vmatpush.bf16.msrb.mxu3 %v4610_v53 }
 0x29b   : > { %v2341_v61 = vadd.f32 %v2340_v51, %v6666_v13  ;;  %4633 = vmatmul.msk.bf16.gmra.mxu2 %vm845_vm2, %v6441_v14  ;;  %4654 = vmatmul.msk.bf16.gmra.mxu1 %vm845_vm2, %v6441_v14 }
 0x29d   : > { %v2792_v28 = vmax.f32 %v2341_v61, 0.0 }
 0x29e   : > { %v1771_v3 = vpop.f32.mrf.mxu2 }
 0x29f   : > { %v2950_v18 = vadd.f32 %v2949_v9, %v2792_v28  ;;  %v1772_v38 = vadd.f32 %v1771_v3, %v6438_v48  ;;  %v6705_v48 = vpack.c.bf16 %v2041_v56, %v2040_v11 }
 0x2a0   : > { %v6701_v47 = vpop.f32.mrf.mxu1 }
 0x2a1   : > { %4485 = vmatmul.msk.f32.vlgmr.msra.gmra.mxu3 %vm366_vm1, %v1772_v38 }
 0x2a2   : > { %v2343_v52 = vpop.f32.mrf.mxu0 }
 0x2a3   : > { %v2344_v15 = vadd.f32 %v2343_v52, %v6666_v13  ;;  %v2044_v52 = vld [vmem:[#allocation2 + $0xc0] sm:$0xff] }
 0x2a4   : > { %v6753_v11 = vpack.c.bf16 %v2045_v6, %v2044_v52  ;;  %v4543_v6 = vld [vmem:[%s8108_s3 + $0x58] sm:$0xf0] }
 0x2a5   : > { %v2796_v46 = vmax.f32 %v2344_v15, 0.0  ;;  %4621 = vmatmul.msk.bf16.gmra.mxu0 %vm845_vm2, %v6705_v48 }
 0x2a6   : > { %v1774_v22 = vpop.f32.mrf.mxu2 }
 0x2a7   : > { %v2951_v4 = vadd.f32 %v2950_v18, %v2796_v46  ;;  %v1775_v58 = vadd.f32 %v1774_v22, %v6445_v34  ;;  %v5230_v34 = vld [vmem:[%s8108_s3 + $0xac] sm:$0xf]  ;;  %v4575_v18 = vld [vmem:[%s8108_s3 + $0x98] sm:$0xf0] }
 0x2a8   : > { %v6710_v21 = vpop.f32.mrf.mxu1  ;;  %v4594_v32 = vor.u32 %v5230_v34, %v4591_v37  ;;  %v4559_v37 = vld [vmem:[%s8108_s3 + $0x78] sm:$0xf0] }
 0x2a9   : > { %4486 = vmatmul.msk.f32.gmra.mxu3 %vm366_vm1, %v1775_v58 }
 0x2aa   : > { %v2345_v63 = vpop.f32.mrf.mxu0  ;;  %2668 = vmatpush.bf16.msrb.mxu3 %v4594_v32  ;;  %v2047_v32 = vld [vmem:[#allocation2 + $0xd8] sm:$0xff] }
 0x2ab   : > { %4634 = vmatmul.msk.bf16.gmra.mxu2 %vm845_vm2, %v6453_v26  ;;  %4655 = vmatmul.msk.bf16.gmra.mxu1 %vm845_vm2, %v6453_v26  ;;  %v2346_v12 = vadd.f32 %v2345_v63, %v6666_v13 }
 0x2ad   : > { %v2800_v27 = vmax.f32 %v2346_v12, 0.0 }
 0x2ae   : > { %v1777_v17 = vpop.f32.mrf.mxu2 }
 0x2af   : > { %v1778_v50 = vadd.f32 %v1777_v17, %v6449_v19  ;;  %v2952_v49 = vadd.f32 %v2951_v4, %v2800_v27 }
 0x2b0   : > { %v6725_v44 = vpop.f32.mrf.mxu1 }
 0x2b1   : > { %4487 = vmatmul.msk.f32.gmra.mxu3 %vm366_vm1, %v1778_v50 }
 0x2b2   : > { %v2348_v8 = vpop.f32.mrf.mxu0 }
 0x2b3   : > { %v2349_v19 = vadd.f32 %v2348_v8, %v6666_v13 }
 0x2b5   : > { %v2804_v33 = vmax.f32 %v2349_v19, 0.0  ;;  %4622 = vmatmul.msk.bf16.gmra.mxu0 %vm845_vm2, %v6729_v40  ;;  %v2046_v19 = vld [vmem:[#allocation2 + $0xd0] sm:$0xff] }
 0x2b6   : > { %v1780_v54 = vpop.f32.mrf.mxu2 }
 0x2b7   : > { %v2953_v16 = vadd.f32 %v2952_v49, %v2804_v33  ;;  %v1781_v9 = vadd.f32 %v1780_v54, %v6457_v62  ;;  %v5226_v62 = vld [vmem:[%s8108_s3 + $0x8c] sm:$0xf]  ;;  %v6777_v49 = vpack.c.bf16 %v2047_v32, %v2046_v19 }
 0x2b8   : > { %v6734_v31 = vpop.f32.mrf.mxu1  ;;  %v4578_v35 = vor.u32 %v5226_v62, %v4575_v18 }
 0x2b9   : > { %4488 = vmatmul.msk.f32.gmra.mxu3 %vm366_vm1, %v1781_v9 }
 0x2ba   : > { %v2350_v51 = vpop.f32.mrf.mxu0  ;;  %2669 = vmatpush.bf16.msrb.mxu3 %v4578_v35 }
 0x2bb   : > { %4635 = vmatmul.msk.bf16.gmra.mxu2 %vm845_vm2, %v6474_v55  ;;  %4656 = vmatmul.msk.bf16.gmra.mxu1 %vm845_vm2, %v6474_v55  ;;  %v2351_v61 = vadd.f32 %v2350_v51, %v6666_v13 }
 0x2bd   : > { %v2808_v56 = vmax.f32 %v2351_v61, 0.0 }
 0x2be   : > { %v1783_v28 = vpop.f32.mrf.mxu2 }
 0x2bf   : > { %v1784_v3 = vadd.f32 %v1783_v28, %v6467_v5  ;;  %v2954_v15 = vadd.f32 %v2953_v16, %v2808_v56 }
 0x2c0   : > { %v6749_v38 = vpop.f32.mrf.mxu1 }
 0x2c1   : > { %4489 = vmatmul.msk.f32.gmra.mxu3 %vm366_vm1, %v1784_v3 }
 0x2c2   : > { %v2353_v53 = vpop.f32.mrf.mxu0 }
 0x2c3   : > { %v2354_v5 = vadd.f32 %v2353_v53, %v6666_v13 }
 0x2c5   : > { %v2812_v46 = vmax.f32 %v2354_v5, 0.0  ;;  %4623 = vmatmul.msk.bf16.gmra.mxu0 %vm845_vm2, %v6753_v11 }
 0x2c6   : > { %v1786_v22 = vpop.f32.mrf.mxu2 }
 0x2c7   : > { %v2955_v4 = vadd.f32 %v2954_v15, %v2812_v46  ;;  %v1787_v58 = vadd.f32 %v1786_v22, %v6480_v30  ;;  %v5222_v30 = vld [vmem:[%s8108_s3 + $0x6c] sm:$0xf] }
 0x2c8   : > { %v6758_v63 = vpop.f32.mrf.mxu1  ;;  %v4562_v27 = vor.u32 %v5222_v30, %v4559_v37  ;;  %v4511_v30 = vld [vmem:[%s8108_s3 + $0x18] sm:$0xf0] }
 0x2c9   : > { %4490 = vmatmul.msk.f32.gmra.mxu3 %vm366_vm1, %v1787_v58  ;;  %v5214_v58 = vld [vmem:[%s8108_s3 + $0x2c] sm:$0xf] }
 0x2ca   : > { %v2355_v12 = vpop.f32.mrf.mxu0  ;;  %2670 = vmatpush.bf16.msrb.mxu3 %v4562_v27 }
 0x2cb   : > { %4636 = vmatmul.msk.bf16.gmra.mxu2 %vm845_vm2, %v6496_v23  ;;  %4657 = vmatmul.msk.bf16.gmra.mxu1 %vm845_vm2, %v6496_v23  ;;  %v2356_v17 = vadd.f32 %v2355_v12, %v6666_v13  ;;  %v4527_v12 = vld [vmem:[%s8108_s3 + $0x38] sm:$0xf0] }
 0x2cd   : > { %v2816_v8 = vmax.f32 %v2356_v17, 0.0 }
 0x2ce   : > { %v1789_v50 = vpop.f32.mrf.mxu2 }
 0x2cf   : > { %v1790_v34 = vadd.f32 %v1789_v50, %v6489_v41  ;;  %v2956_v33 = vadd.f32 %v2955_v4, %v2816_v8  ;;  %v4530_v50 = vor.u32 %v5214_v58, %v4527_v12 }
 0x2d0   : > { %v6773_v1 = vpop.f32.mrf.mxu1 }
 0x2d1   : > { %4491 = vmatmul.msk.f32.gmra.mxu3 %vm366_vm1, %v1790_v34 }
 0x2d2   : > { %v2358_v24 = vpop.f32.mrf.mxu0 }
 0x2d3   : > { %v2359_v41 = vadd.f32 %v2358_v24, %v6666_v13 }
 0x2d5   : > { %v2820_v54 = vmax.f32 %v2359_v41, 0.0  ;;  %4624 = vmatmul.msk.bf16.gmra.mxu0 %vm845_vm2, %v6777_v49 }
 0x2d6   : > { %v1792_v16 = vpop.f32.mrf.mxu2 }
 0x2d7   : > { %v2957_v9 = vadd.f32 %v2956_v33, %v2820_v54  ;;  %v1793_v51 = vadd.f32 %v1792_v16, %v6502_v2  ;;  %v5218_v2 = vld [vmem:[%s8108_s3 + $0x4c] sm:$0xf] }
 0x2d8   : > { %v6782_v61 = vpop.f32.mrf.mxu1  ;;  %v4546_v56 = vor.u32 %v5218_v2, %v4543_v6 }
 0x2d9   : > { %4492 = vmatmul.msk.f32.gmra.mxu3 %vm366_vm1, %v1793_v51 }
 0x2da   : > { %v2360_v28 = vpop.f32.mrf.mxu0  ;;  %2671 = vmatpush.bf16.msrb.mxu3 %v4546_v56 }
 0x2db   : > { %4637 = vmatmul.msk.bf16.gmra.mxu2 %vm845_vm2, %v6542_v45  ;;  %4658 = vmatmul.msk.bf16.gmra.mxu1 %vm845_vm2, %v6542_v45  ;;  %v2361_v3 = vadd.f32 %v2360_v28, %v6666_v13 }
 0x2dd   : > { %v2824_v53 = vmax.f32 %v2361_v3, 0.0 }
 0x2de   : > { %v1795_v62 = vpop.f32.mrf.mxu2  ;;  %2672 = vmatpush.bf16.msrb.mxu3 %v4530_v50 }
 0x2df   : > { %v1796_v18 = vadd.f32 %v1795_v62, %v6529_v59  ;;  %v2958_v15 = vadd.f32 %v2957_v9, %v2824_v53 }
 0x2e0   : > { %v6797_v35 = vpop.f32.mrf.mxu1 }
 0x2e1   : > { %4493 = vmatmul.msk.f32.gmra.mxu3 %vm366_vm1, %v1796_v18 }
 0x2e2   : > { %v2363_v52 = vpop.f32.mrf.mxu0 }
 0x2e3   : > { %v2364_v5 = vadd.f32 %v2363_v52, %v6666_v13 }
 0x2e5   : > { %v2828_v59 = vmax.f32 %v2364_v5, 0.0 }
 0x2e6   : > { %v1798_v46 = vpop.f32.mrf.mxu2 }
 0x2e7   : > { %v2959_v22 = vadd.f32 %v2958_v15, %v2828_v59  ;;  %v1799_v4 = vadd.f32 %v1798_v46, %v6566_v10  ;;  %v5210_v10 = vld [vmem:[%s8108_s3 + $0xc] sm:$0xf] }
 0x2e8   : > { %v6808_v17 = vpop.f32.mrf.mxu1  ;;  %v4514_v37 = vor.u32 %v5210_v10, %v4511_v30  ;;  %v6853_v10 = vperm.slane %v6659_v43, 1 }
 0x2e9   : > { %4494 = vmatmul.msk.f32.gmra.mxu3 %vm366_vm1, %v1799_v4 }
 0x2ea   : > { %v2365_v34 = vpop.f32.mrf.mxu0  ;;  %2673 = vmatpush.bf16.msrb.mxu3 %v4514_v37 }
 0x2eb   : > { %4638 = vmatmul.msk.bf16.gmra.mxu2 %vm845_vm2, %v6612_v0  ;;  %4659 = vmatmul.msk.bf16.gmra.mxu1 %vm845_vm2, %v6612_v0  ;;  %v2366_v32 = vadd.f32 %v2365_v34, %v6666_v13 }
 0x2ed   : > { %v2832_v19 = vmax.f32 %v2366_v32, 0.0 }
 0x2ee   : > { %v1801_v27 = vpop.f32.mrf.mxu2 }
 0x2ef   : > { %v1802_v8 = vadd.f32 %v1801_v27, %v6601_v29  ;;  %v2960_v54 = vadd.f32 %v2959_v22, %v2832_v19 }
 0x2f0   : > { %v6823_v24 = vpop.f32.mrf.mxu1 }
 0x2f1   : > { %4495 = vmatmul.msk.f32.gmra.mxu3 %vm366_vm1, %v1802_v8 }
 0x2f2   : > { %v2368_v41 = vpop.f32.mrf.mxu0 }
 0x2f3   : > { %v2369_v33 = vadd.f32 %v2368_v41, %v6666_v13 }
 0x2f5   : > { %v2836_v16 = vmax.f32 %v2369_v33, 0.0 }
 0x2f6   : > { %v1804_v9 = vpop.f32.mrf.mxu2 }
 0x2f7   : > { %v2961_v51 = vadd.f32 %v2960_v54, %v2836_v16  ;;  %v1805_v28 = vadd.f32 %v1804_v9, %v6633_v57 }
 0x2f8   : > { %v6828_v3 = vpop.f32.mrf.mxu1 }
 0x2f9   : > { %4496 = vmatmul.msk.f32.gmra.mxu3 %vm366_vm1, %v1805_v28 }
 0x2fa   : > { %v2370_v62 = vpop.f32.mrf.mxu0 }
 0x2fb   : > { %4639 = vmatmul.msk.bf16.gmra.mxu2 %vm845_vm2, %v6644_v39  ;;  %4660 = vmatmul.msk.bf16.gmra.mxu1 %vm845_vm2, %v6644_v39  ;;  %v2371_v29 = vadd.f32 %v2370_v62, %v6666_v13 }
 0x2fd   : > { %v2840_v56 = vmax.f32 %v2371_v29, 0.0 }
 0x2fe   : > { %v1807_v18 = vpop.f32.mrf.mxu2 }
 0x2ff   : > { %v1808_v2 = vadd.f32 %v1807_v18, %v6640_v60  ;;  %v2962_v52 = vadd.f32 %v2961_v51, %v2840_v56  ;;  %v6844_v60 = vperm.slane %v6659_v43, 2 }
 0x300   : > { %v6837_v6 = vpop.f32.mrf.mxu1 }
 0x301   : > { %4497 = vmatmul.msk.f32.gmra.mxu3 %vm366_vm1, %v1808_v2 }
 0x302   : > { %v2373_v57 = vpop.f32.mrf.mxu0 }
 0x303   : > { %v2374_v53 = vadd.f32 %v2373_v57, %v6666_v13 }
 0x305   : > { %v2844_v5 = vmax.f32 %v2374_v53, 0.0 }
 0x306   : > { %v1810_v15 = vpop.f32.mrf.mxu2 }
 0x307   : > { %v2963_v59 = vadd.f32 %v2962_v52, %v2844_v5  ;;  %v1811_v46 = vadd.f32 %v1810_v15, %v6650_v7 }
 0x308   : > { %v2561_v22 = vpop.f32.mrf.mxu1 }
 0x309   : > { %4498 = vmatmul.msk.f32.gmra.mxu3 %vm366_vm1, %v1811_v46  ;;  %v2562_v50 = vadd.f32 %v2561_v22, %v6844_v60 }
 0x30a   : > { %v2375_v4 = vpop.f32.mrf.mxu0 }
 0x30b   : > { %4640 = vmatmul.msk.bf16.gmra.mxu2 %vm845_vm2, %v6663_v42  ;;  %4661 = vmatmul.msk.bf16.gmra.mxu1 %vm845_vm2, %v6663_v42  ;;  %v2376_v58 = vadd.f32 %v2375_v4, %v6666_v13  ;;  %v2782_v32 = vmax.f32 %v2562_v50, 0.0 }
 0x30d   : > { %v2848_v7 = vmax.f32 %v2376_v58, 0.0 }
 0x30e   : > { %v2447_v12 = vpop.f32.mrf.mxu2 }
 0x30f   : > { %v2964_v19 = vadd.f32 %v2963_v59, %v2848_v7  ;;  %v2448_v41 = vadd.f32 %v2447_v12, %v6853_v10 }
 0x310   : > { %v2563_v34 = vpop.f32.mrf.mxu1 }
 0x311   : > { %v2564_v30 = vadd.f32 %v2563_v34, %v6844_v60  ;;  %4674 = vmatmul.msk.bf16.vlgmr.msrb.gmra.mxu3 %vm845_vm2, %v6431_v36  ;;  %v2781_v62 = vmax.f32 %v2448_v41, 0.0 }
 0x312   : > { %v2378_v37 = vpop.f32.mrf.mxu0 }
 0x313   : > { %v2786_v27 = vmax.f32 %v2564_v30, 0.0  ;;  %v2379_v8 = vadd.f32 %v2378_v37, %v6666_v13 }
 0x315   : > { %v3042_v33 = vadd.f32 %v2786_v27, %v2782_v32  ;;  %v2852_v54 = vmax.f32 %v2379_v8, 0.0 }
 0x316   : > { %v2449_v16 = vpop.f32.mrf.mxu2 }
 0x317   : > { %v2965_v9 = vadd.f32 %v2964_v19, %v2852_v54  ;;  %v2450_v51 = vadd.f32 %v2449_v16, %v6853_v10 }
 0x318   : > { %v2566_v28 = vpop.f32.mrf.mxu1 }
 0x319   : > { %v2785_v29 = vmax.f32 %v2450_v51, 0.0  ;;  %v2567_v18 = vadd.f32 %v2566_v28, %v6844_v60 }
 0x31a   : > { %v2380_v36 = vpop.f32.mrf.mxu0 }
 0x31b   : > { %v2995_v2 = vadd.f32 %v2785_v29, %v2781_v62  ;;  %v2790_v56 = vmax.f32 %v2567_v18, 0.0  ;;  %4641 = vmatmul.msk.bf16.gmra.mxu2 %vm845_vm2, %v6681_v25  ;;  %4662 = vmatmul.msk.bf16.gmra.mxu1 %vm845_vm2, %v6681_v25  ;;  %v2381_v53 = vadd.f32 %v2380_v36, %v6666_v13 }
 0x31d   : > { %v3043_v57 = vadd.f32 %v3042_v33, %v2790_v56  ;;  %v2856_v59 = vmax.f32 %v2381_v53, 0.0 }
 0x31e   : > { %v2452_v52 = vpop.f32.mrf.mxu2 }
 0x31f   : > { %v2453_v5 = vadd.f32 %v2452_v52, %v6853_v10  ;;  %v2966_v7 = vadd.f32 %v2965_v9, %v2856_v59 }
 0x320   : > { %v2568_v15 = vpop.f32.mrf.mxu1 }
 0x321   : > { %v2789_v46 = vmax.f32 %v2453_v5, 0.0  ;;  %v2569_v22 = vadd.f32 %v2568_v15, %v6844_v60  ;;  %4675 = vmatmul.msk.bf16.gmra.mxu3 %vm845_vm2, %v6441_v14 }
 0x322   : > { %v2383_v4 = vpop.f32.mrf.mxu0 }
 0x323   : > { %v2996_v58 = vadd.f32 %v2995_v2, %v2789_v46  ;;  %v2794_v12 = vmax.f32 %v2569_v22, 0.0  ;;  %v2384_v50 = vadd.f32 %v2383_v4, %v6666_v13 }
 0x324   : > { %v1964_v34 = vpop.f32.mrf.mxu3 }
 0x325   : > { %v3044_v30 = vadd.f32 %v3043_v57, %v2794_v12  ;;  %v2860_v37 = vmax.f32 %v2384_v50, 0.0  ;;  %v1965_v32 = vadd.f32 %v1964_v34, %v6686_v20 }
 0x326   : > { %v2454_v27 = vpop.f32.mrf.mxu2 }
 0x327   : > { %v2967_v8 = vadd.f32 %v2966_v7, %v2860_v37  ;;  %2006 = vst.msk [vmem:[#allocation2 + $0xe0] sm:$0xff] %vm845_vm2, %v1965_v32  ;;  %v2455_v19 = vadd.f32 %v2454_v27, %v6853_v10 }
 0x328   : > { %v2571_v41 = vpop.f32.mrf.mxu1 }
 0x329   : > { %v2793_v33 = vmax.f32 %v2455_v19, 0.0  ;;  %v2572_v14 = vadd.f32 %v2571_v41, %v6844_v60 }
 0x32a   : > { %v2385_v54 = vpop.f32.mrf.mxu0 }
 0x32b   : > { %v2997_v16 = vadd.f32 %v2996_v58, %v2793_v33  ;;  %v2798_v51 = vmax.f32 %v2572_v14, 0.0  ;;  %4642 = vmatmul.msk.bf16.gmra.mxu2 %vm845_vm2, %v6705_v48  ;;  %4663 = vmatmul.msk.bf16.gmra.mxu1 %vm845_vm2, %v6705_v48  ;;  %v2386_v28 = vadd.f32 %v2385_v54, %v6666_v13 }
 0x32c   : > { %v1967_v20 = vpop.f32.mrf.mxu3 }
 0x32d   : > { %v3045_v9 = vadd.f32 %v3044_v30, %v2798_v51  ;;  %v1968_v62 = vadd.f32 %v1967_v20, %v6701_v47  ;;  %v2864_v2 = vmax.f32 %v2386_v28, 0.0 }
 0x32e   : > { %v2457_v29 = vpop.f32.mrf.mxu2  ;;  %v2048_v12 = vld [vmem:[#allocation2 + $0xe0] sm:$0xff] }
 0x32f   : > { %2007 = vst.msk [vmem:[#allocation2 + $0xe8] sm:$0xff] %vm845_vm2, %v1968_v62  ;;  %v2458_v18 = vadd.f32 %v2457_v29, %v6853_v10  ;;  %v2968_v47 = vadd.f32 %v2967_v8, %v2864_v2 }
 0x330   : > { %v2573_v36 = vpop.f32.mrf.mxu1 }
 0x331   : > { %v2797_v56 = vmax.f32 %v2458_v18, 0.0  ;;  %v2574_v57 = vadd.f32 %v2573_v36, %v6844_v60  ;;  %4676 = vmatmul.msk.bf16.gmra.mxu3 %vm845_vm2, %v6453_v26 }
 0x332   : > { %v2388_v53 = vpop.f32.mrf.mxu0 }
 0x333   : > { %v2998_v52 = vadd.f32 %v2997_v16, %v2797_v56  ;;  %v2802_v5 = vmax.f32 %v2574_v57, 0.0  ;;  %v2389_v15 = vadd.f32 %v2388_v53, %v6666_v13 }
 0x334   : > { %v1970_v59 = vpop.f32.mrf.mxu3 }
 0x335   : > { %v3046_v46 = vadd.f32 %v3045_v9, %v2802_v5  ;;  %v2868_v22 = vmax.f32 %v2389_v15, 0.0  ;;  %v1971_v4 = vadd.f32 %v1970_v59, %v6710_v21 }
 0x336   : > { %v2459_v58 = vpop.f32.mrf.mxu2  ;;  %v2049_v50 = vld [vmem:[#allocation2 + $0xe8] sm:$0xff] }
 0x337   : > { %v2969_v34 = vadd.f32 %v2968_v47, %v2868_v22  ;;  %2008 = vst.msk [vmem:[#allocation2 + $0xf0] sm:$0xff] %vm845_vm2, %v1971_v4  ;;  %v2460_v7 = vadd.f32 %v2459_v58, %v6853_v10  ;;  %v6891_v26 = vpack.c.bf16 %v2049_v50, %v2048_v12 }
 0x338   : > { %v2576_v30 = vpop.f32.mrf.mxu1 }
 0x339   : > { %v2801_v37 = vmax.f32 %v2460_v7, 0.0  ;;  %v2577_v32 = vadd.f32 %v2576_v30, %v6844_v60  ;;  %4625 = vmatmul.msk.bf16.gmra.mxu0 %vm845_vm2, %v6891_v26 }
 0x33a   : > { %v2390_v27 = vpop.f32.mrf.mxu0 }
 0x33b   : > { %v2999_v8 = vadd.f32 %v2998_v52, %v2801_v37  ;;  %v2806_v21 = vmax.f32 %v2577_v32, 0.0  ;;  %4643 = vmatmul.msk.bf16.gmra.mxu2 %vm845_vm2, %v6729_v40  ;;  %4664 = vmatmul.msk.bf16.gmra.mxu1 %vm845_vm2, %v6729_v40  ;;  %v2391_v33 = vadd.f32 %v2390_v27, %v6666_v13 }
 0x33c   : > { %v1973_v19 = vpop.f32.mrf.mxu3 }
 0x33d   : > { %v3047_v41 = vadd.f32 %v3046_v46, %v2806_v21  ;;  %v1974_v14 = vadd.f32 %v1973_v19, %v6725_v44  ;;  %v2872_v20 = vmax.f32 %v2391_v33, 0.0 }
 0x33e   : > { %v2462_v54 = vpop.f32.mrf.mxu2  ;;  %v2050_v5 = vld [vmem:[#allocation2 + $0xf0] sm:$0xff] }
 0x33f   : > { %2009 = vst.msk [vmem:[#allocation2 + $0xf8] sm:$0xff] %vm845_vm2, %v1974_v14  ;;  %v2463_v16 = vadd.f32 %v2462_v54, %v6853_v10  ;;  %v2970_v44 = vadd.f32 %v2969_v34, %v2872_v20 }
 0x340   : > { %v2578_v51 = vpop.f32.mrf.mxu1 }
 0x341   : > { %v2805_v9 = vmax.f32 %v2463_v16, 0.0  ;;  %v2579_v28 = vadd.f32 %v2578_v51, %v6844_v60  ;;  %4677 = vmatmul.msk.bf16.gmra.mxu3 %vm845_vm2, %v6474_v55 }
 0x342   : > { %v2393_v62 = vpop.f32.mrf.mxu0 }
 0x343   : > { %v3000_v29 = vadd.f32 %v2999_v8, %v2805_v9  ;;  %v2810_v18 = vmax.f32 %v2579_v28, 0.0  ;;  %v2394_v36 = vadd.f32 %v2393_v62, %v6666_v13 }
 0x344   : > { %v1976_v2 = vpop.f32.mrf.mxu3 }
 0x345   : > { %v3048_v56 = vadd.f32 %v3047_v41, %v2810_v18  ;;  %v2876_v57 = vmax.f32 %v2394_v36, 0.0  ;;  %v1977_v53 = vadd.f32 %v1976_v2, %v6734_v31 }
 0x346   : > { %v2464_v52 = vpop.f32.mrf.mxu2  ;;  %v2051_v15 = vld [vmem:[#allocation2 + $0xf8] sm:$0xff] }
 0x347   : > { %v2971_v59 = vadd.f32 %v2970_v44, %v2876_v57  ;;  %2010 = vst.msk [vmem:[#allocation2 + $0x100] sm:$0xff] %vm845_vm2, %v1977_v53  ;;  %v2465_v47 = vadd.f32 %v2464_v52, %v6853_v10  ;;  %v6911_v55 = vpack.c.bf16 %v2051_v15, %v2050_v5 }
 0x348   : > { %v2581_v46 = vpop.f32.mrf.mxu1 }
 0x349   : > { %v2809_v22 = vmax.f32 %v2465_v47, 0.0  ;;  %v2582_v4 = vadd.f32 %v2581_v46, %v6844_v60  ;;  %4626 = vmatmul.msk.bf16.gmra.mxu0 %vm845_vm2, %v6911_v55 }
 0x34a   : > { %v2395_v58 = vpop.f32.mrf.mxu0 }
 0x34b   : > { %v3001_v12 = vadd.f32 %v3000_v29, %v2809_v22  ;;  %v2814_v31 = vmax.f32 %v2582_v4, 0.0  ;;  %4644 = vmatmul.msk.bf16.gmra.mxu2 %vm845_vm2, %v6753_v11  ;;  %4665 = vmatmul.msk.bf16.gmra.mxu1 %vm845_vm2, %v6753_v11  ;;  %v2396_v7 = vadd.f32 %v2395_v58, %v6666_v13 }
 0x34c   : > { %v1979_v50 = vpop.f32.mrf.mxu3 }
 0x34d   : > { %v3049_v34 = vadd.f32 %v3048_v56, %v2814_v31  ;;  %v1980_v30 = vadd.f32 %v1979_v50, %v6749_v38  ;;  %v2880_v8 = vmax.f32 %v2396_v7, 0.0 }
 0x34e   : > { %v2467_v37 = vpop.f32.mrf.mxu2  ;;  %v2052_v62 = vld [vmem:[#allocation2 + $0x100] sm:$0xff] }
 0x34f   : > { %2011 = vst.msk [vmem:[#allocation2 + $0x108] sm:$0xff] %vm845_vm2, %v1980_v30  ;;  %v2468_v32 = vadd.f32 %v2467_v37, %v6853_v10  ;;  %v2972_v38 = vadd.f32 %v2971_v59, %v2880_v8 }
 0x350   : > { %v2583_v27 = vpop.f32.mrf.mxu1 }
 0x351   : > { %v2813_v21 = vmax.f32 %v2468_v32, 0.0  ;;  %v2584_v19 = vadd.f32 %v2583_v27, %v6844_v60  ;;  %4678 = vmatmul.msk.bf16.gmra.mxu3 %vm845_vm2, %v6496_v23 }
 0x352   : > { %v2398_v41 = vpop.f32.mrf.mxu0 }
 0x353   : > { %v3002_v33 = vadd.f32 %v3001_v12, %v2813_v21  ;;  %v2818_v14 = vmax.f32 %v2584_v19, 0.0  ;;  %v2399_v54 = vadd.f32 %v2398_v41, %v6666_v13 }
 0x354   : > { %v1982_v16 = vpop.f32.mrf.mxu3 }
 0x355   : > { %v3050_v51 = vadd.f32 %v3049_v34, %v2818_v14  ;;  %v2884_v20 = vmax.f32 %v2399_v54, 0.0  ;;  %v1983_v9 = vadd.f32 %v1982_v16, %v6758_v63 }
 0x356   : > { %v2469_v28 = vpop.f32.mrf.mxu2  ;;  %v2053_v29 = vld [vmem:[#allocation2 + $0x108] sm:$0xff] }
 0x357   : > { %v6929_v18 = vadd.f32 %v2972_v38, %v2884_v20  ;;  %2012 = vst.msk [vmem:[#allocation2 + $0x110] sm:$0xff] %vm845_vm2, %v1983_v9  ;;  %v2470_v23 = vadd.f32 %v2469_v28, %v6853_v10  ;;  %v6933_v36 = vpack.c.bf16 %v2053_v29, %v2052_v62 }
 0x358   : > { %v2586_v2 = vpop.f32.mrf.mxu1 }
 0x359   : > { %v2817_v44 = vmax.f32 %v2470_v23, 0.0  ;;  %v2587_v56 = vadd.f32 %v2586_v2, %v6844_v60  ;;  %4627 = vmatmul.msk.bf16.gmra.mxu0 %vm845_vm2, %v6933_v36 }
 0x35b   : > { %v3003_v57 = vadd.f32 %v3002_v33, %v2817_v44  ;;  %v2822_v63 = vmax.f32 %v2587_v56, 0.0  ;;  %4645 = vmatmul.msk.bf16.gmra.mxu2 %vm845_vm2, %v6777_v49  ;;  %4666 = vmatmul.msk.bf16.gmra.mxu1 %vm845_vm2, %v6777_v49 }
 0x35c   : > { %v1985_v53 = vpop.f32.mrf.mxu3 }
 0x35d   : > { %v3051_v52 = vadd.f32 %v3050_v51, %v2822_v63  ;;  %v1986_v5 = vadd.f32 %v1985_v53, %v6773_v1 }
 0x35e   : > { %v2472_v15 = vpop.f32.mrf.mxu2  ;;  %v2054_v1 = vld [vmem:[#allocation2 + $0x110] sm:$0xff] }
 0x35f   : > { %2013 = vst.msk [vmem:[#allocation2 + $0x118] sm:$0xff] %vm845_vm2, %v1986_v5  ;;  %v2473_v59 = vadd.f32 %v2472_v15, %v6853_v10 }
 0x360   : > { %v2588_v47 = vpop.f32.mrf.mxu1 }
 0x361   : > { %v2821_v46 = vmax.f32 %v2473_v59, 0.0  ;;  %v2589_v22 = vadd.f32 %v2588_v47, %v6844_v60  ;;  %4679 = vmatmul.msk.bf16.gmra.mxu3 %vm845_vm2, %v6542_v45 }
 0x363   : > { %v3004_v4 = vadd.f32 %v3003_v57, %v2821_v46  ;;  %v2826_v58 = vmax.f32 %v2589_v22, 0.0 }
 0x364   : > { %v1988_v12 = vpop.f32.mrf.mxu3 }
 0x365   : > { %v3052_v31 = vadd.f32 %v3051_v52, %v2826_v58  ;;  %v1989_v50 = vadd.f32 %v1988_v12, %v6782_v61 }
 0x366   : > { %v2474_v34 = vpop.f32.mrf.mxu2  ;;  %v2055_v7 = vld [vmem:[#allocation2 + $0x118] sm:$0xff] }
 0x367   : > { %2014 = vst.msk [vmem:[#allocation2 + $0x120] sm:$0xff] %vm845_vm2, %v1989_v50  ;;  %v2475_v30 = vadd.f32 %v2474_v34, %v6853_v10  ;;  %v6951_v37 = vpack.c.bf16 %v2055_v7, %v2054_v1 }
 0x368   : > { %v2591_v32 = vpop.f32.mrf.mxu1 }
 0x369   : > { %v2825_v27 = vmax.f32 %v2475_v30, 0.0  ;;  %v2592_v8 = vadd.f32 %v2591_v32, %v6844_v60  ;;  %4628 = vmatmul.msk.bf16.gmra.mxu0 %vm845_vm2, %v6951_v37 }
 0x36b   : > { %v3005_v45 = vadd.f32 %v3004_v4, %v2825_v27  ;;  %v2830_v21 = vmax.f32 %v2592_v8, 0.0  ;;  %4646 = vmatmul.msk.bf16.gmra.mxu2 %vm845_vm2, %v6891_v26  ;;  %4667 = vmatmul.msk.bf16.gmra.mxu1 %vm845_vm2, %v6891_v26 }
 0x36c   : > { %v1991_v61 = vpop.f32.mrf.mxu3 }
 0x36d   : > { %v3053_v19 = vadd.f32 %v3052_v31, %v2830_v21  ;;  %v1992_v41 = vadd.f32 %v1991_v61, %v6797_v35 }
 0x36e   : > { %v2477_v33 = vpop.f32.mrf.mxu2  ;;  %v2056_v35 = vld [vmem:[#allocation2 + $0x120] sm:$0xff] }
 0x36f   : > { %2015 = vst.msk [vmem:[#allocation2 + $0x128] sm:$0xff] %vm845_vm2, %v1992_v41  ;;  %v2478_v14 = vadd.f32 %v2477_v33, %v6853_v10 }
 0x370   : > { %v2593_v54 = vpop.f32.mrf.mxu1 }
 0x371   : > { %v2829_v16 = vmax.f32 %v2478_v14, 0.0  ;;  %v2594_v38 = vadd.f32 %v2593_v54, %v6844_v60  ;;  %4680 = vmatmul.msk.bf16.gmra.mxu3 %vm845_vm2, %v6612_v0 }
 0x373   : > { %v3006_v51 = vadd.f32 %v3005_v45, %v2829_v16  ;;  %v2834_v20 = vmax.f32 %v2594_v38, 0.0  ;;  %v4937_v16 = vld [vmem:[%s8110_s5 + $0x1e0] sm:$0xf] }
 0x374   : > { %v1994_v9 = vpop.f32.mrf.mxu3 }
 0x375   : > { %v3054_v28 = vadd.f32 %v3053_v19, %v2834_v20  ;;  %v1995_v62 = vadd.f32 %v1994_v9, %v6808_v17 }
 0x376   : > { %v2479_v29 = vpop.f32.mrf.mxu2  ;;  %v2057_v23 = vld [vmem:[#allocation2 + $0x128] sm:$0xff] }
 0x377   : > { %2016 = vst.msk [vmem:[#allocation2 + $0x130] sm:$0xff] %vm845_vm2, %v1995_v62  ;;  %v2480_v2 = vadd.f32 %v2479_v29, %v6853_v10  ;;  %v6969_v44 = vpack.c.bf16 %v2057_v23, %v2056_v35  ;;  %v4809_v62 = vld [vmem:[%s8110_s5 + $0xe0] sm:$0xf] }
 0x378   : > { %v2596_v56 = vpop.f32.mrf.mxu1 }
 0x379   : > { %v2833_v57 = vmax.f32 %v2480_v2, 0.0  ;;  %v2597_v63 = vadd.f32 %v2596_v56, %v6844_v60  ;;  %4629 = vmatmul.msk.bf16.gmra.mxu0 %vm845_vm2, %v6969_v44  ;;  %v7015_v56 = vperm.slane %v6659_v43, 3 }
 0x37b   : > { %v3007_v0 = vadd.f32 %v3006_v51, %v2833_v57  ;;  %v2838_v53 = vmax.f32 %v2597_v63, 0.0  ;;  %4647 = vmatmul.msk.bf16.gmra.mxu2 %vm845_vm2, %v6911_v55  ;;  %4668 = vmatmul.msk.bf16.gmra.mxu1 %vm845_vm2, %v6911_v55 }
 0x37c   : > { %v1997_v17 = vpop.f32.mrf.mxu3 }
 0x37d   : > { %v3055_v52 = vadd.f32 %v3054_v28, %v2838_v53  ;;  %v1998_v5 = vadd.f32 %v1997_v17, %v6823_v24 }
 0x37e   : > { %v2482_v15 = vpop.f32.mrf.mxu2  ;;  %v2058_v24 = vld [vmem:[#allocation2 + $0x130] sm:$0xff] }
 0x37f   : > { %2017 = vst.msk [vmem:[#allocation2 + $0x138] sm:$0xff] %vm845_vm2, %v1998_v5  ;;  %v2483_v59 = vadd.f32 %v2482_v15, %v6853_v10 }
 0x380   : > { %v2598_v47 = vpop.f32.mrf.mxu1 }
 0x381   : > { %v2837_v46 = vmax.f32 %v2483_v59, 0.0  ;;  %v2599_v22 = vadd.f32 %v2598_v47, %v6844_v60  ;;  %4681 = vmatmul.msk.bf16.gmra.mxu3 %vm845_vm2, %v6644_v39 }
 0x383   : > { %v3008_v4 = vadd.f32 %v3007_v0, %v2837_v46  ;;  %v2842_v58 = vmax.f32 %v2599_v22, 0.0 }
 0x384   : > { %v2000_v12 = vpop.f32.mrf.mxu3 }
 0x385   : > { %v3056_v31 = vadd.f32 %v3055_v52, %v2842_v58  ;;  %v2001_v50 = vadd.f32 %v2000_v12, %v6828_v3 }
 0x386   : > { %v2484_v34 = vpop.f32.mrf.mxu2  ;;  %v2059_v1 = vld [vmem:[#allocation2 + $0x138] sm:$0xff] }
 0x387   : > { %2018 = vst.msk [vmem:[#allocation2 + $0x140] sm:$0xff] %vm845_vm2, %v2001_v50  ;;  %v2485_v7 = vadd.f32 %v2484_v34, %v6853_v10  ;;  %v6987_v30 = vpack.c.bf16 %v2059_v1, %v2058_v24 }
 0x388   : > { %v2601_v32 = vpop.f32.mrf.mxu1 }
 0x389   : > { %v2841_v27 = vmax.f32 %v2485_v7, 0.0  ;;  %v2602_v8 = vadd.f32 %v2601_v32, %v6844_v60  ;;  %4630 = vmatmul.msk.bf16.gmra.mxu0 %vm845_vm2, %v6987_v30 }
 0x38b   : > { %v3009_v39 = vadd.f32 %v3008_v4, %v2841_v27  ;;  %v2846_v45 = vmax.f32 %v2602_v8, 0.0  ;;  %4648 = vmatmul.msk.bf16.gmra.mxu2 %vm845_vm2, %v6933_v36  ;;  %4669 = vmatmul.msk.bf16.gmra.mxu1 %vm845_vm2, %v6933_v36 }
 0x38c   : > { %v2003_v3 = vpop.f32.mrf.mxu3 }
 0x38d   : > { %v3057_v21 = vadd.f32 %v3056_v31, %v2846_v45  ;;  %v2004_v61 = vadd.f32 %v2003_v3, %v6837_v6  ;;  %v5299_v6 = vld [vmem:[%s8110_s5 + $0x1ec] sm:$0xf0] }
 0x38e   : > { %v2487_v19 = vpop.f32.mrf.mxu2  ;;  %v4938_v38 = vor.u32 %v5299_v6, %v4937_v16  ;;  %v2060_v35 = vld [vmem:[#allocation2 + $0x140] sm:$0xff] }
 0x38f   : > { %2019 = vst.msk [vmem:[#allocation2 + $0x148] sm:$0xff] %vm845_vm2, %v2004_v61  ;;  %v2488_v41 = vadd.f32 %v2487_v19, %v6853_v10 }
 0x390   : > { %v2603_v33 = vpop.f32.mrf.mxu1  ;;  %3942 = vmatpush.bf16.msrb.mxu2 %v4938_v38 }
 0x391   : > { %v2845_v14 = vmax.f32 %v2488_v41, 0.0  ;;  %v2604_v54 = vadd.f32 %v2603_v33, %v6844_v60  ;;  %4682 = vmatmul.msk.bf16.gmra.mxu3 %vm845_vm2, %v6663_v42  ;;  %v5267_v42 = vld [vmem:[%s8110_s5 + $0xec] sm:$0xf0]  ;;  %v2400_v41 = vpop.f32.mrf.mxu0 }
 0x392   : > { %v4810_v2 = vor.u32 %v5267_v42, %v4809_v62 }
 0x393   : > { %v3010_v51 = vadd.f32 %v3009_v39, %v2845_v14  ;;  %v2850_v20 = vmax.f32 %v2604_v54, 0.0 }
 0x394   : > { %v2675_v9 = vpop.f32.mrf.mxu3  ;;  %3929 = vmatpush.bf16.msrb.mxu0 %v4810_v2 }
 0x395   : > { %v3058_v28 = vadd.f32 %v3057_v21, %v2850_v20  ;;  %v2676_v52 = vadd.f32 %v2675_v9, %v7015_v56 }
 0x396   : > { %v2489_v29 = vpop.f32.mrf.mxu2  ;;  %v2061_v23 = vld [vmem:[#allocation2 + $0x148] sm:$0xff] }
 0x397   : > { %v2490_v57 = vadd.f32 %v2489_v29, %v6853_v10  ;;  %v7018_v63 = vpack.c.bf16 %v2061_v23, %v2060_v35  ;;  %v2783_v22 = vmax.f32 %v2676_v52, 0.0 }
 0x398   : > { %v2606_v0 = vpop.f32.mrf.mxu1 }
 0x399   : > { %v2849_v53 = vmax.f32 %v2490_v57, 0.0  ;;  %v2607_v17 = vadd.f32 %v2606_v0, %v6844_v60  ;;  %4631 = vmatmul.msk.bf16.gmra.mxu0 %vm845_vm2, %v7018_v63 }
 0x39b   : > { %v3011_v5 = vadd.f32 %v3010_v51, %v2849_v53  ;;  %v2854_v15 = vmax.f32 %v2607_v17, 0.0  ;;  %4649 = vmatmul.msk.bf16.gmra.mxu2 %vm845_vm2, %v6951_v37  ;;  %4670 = vmatmul.msk.bf16.gmra.mxu1 %vm845_vm2, %v6951_v37  ;;  %v2401_v51 = vadd.f32 %v2400_v41, %v6666_v13 }
 0x39c   : > { %v2677_v43 = vpop.f32.mrf.mxu3 }
 0x39d   : > { %v3059_v59 = vadd.f32 %v3058_v28, %v2854_v15  ;;  %v2678_v47 = vadd.f32 %v2677_v43, %v7015_v56  ;;  %v2888_v35 = vmax.f32 %v2401_v51, 0.0 }
 0x39e   : > { %v2492_v46 = vpop.f32.mrf.mxu2 }
 0x39f   : > { %v2787_v4 = vmax.f32 %v2678_v47, 0.0  ;;  %v2493_v58 = vadd.f32 %v2492_v46, %v6853_v10 }
 0x3a0   : > { %v2608_v12 = vpop.f32.mrf.mxu1 }
 0x3a1   : > { %v3089_v31 = vadd.f32 %v2787_v4, %v2783_v22  ;;  %v2853_v50 = vmax.f32 %v2493_v58, 0.0  ;;  %4683 = vmatmul.msk.bf16.gmra.mxu3 %vm845_vm2, %v6681_v25  ;;  %v2609_v24 = vadd.f32 %v2608_v12, %v6844_v60  ;;  %v5295_v58 = vld [vmem:[%s8110_s5 + $0x1cc] sm:$0xf0] }
 0x3a3   : > { %v3012_v34 = vadd.f32 %v3011_v5, %v2853_v50  ;;  %v2858_v27 = vmax.f32 %v2609_v24, 0.0  ;;  %v2974_v5 = vadd.f32 %v6929_v18, %v2888_v35  ;;  %v4921_v18 = vld [vmem:[%s8110_s5 + $0x1c0] sm:$0xf] }
 0x3a4   : > { %v2680_v1 = vpop.f32.mrf.mxu3 }
 0x3a5   : > { %v2681_v7 = vadd.f32 %v2680_v1, %v7015_v56  ;;  %v3060_v61 = vadd.f32 %v3059_v59, %v2858_v27  ;;  %v4793_v1 = vld [vmem:[%s8110_s5 + $0xc0] sm:$0xf] }
 0x3a6   : > { %v2494_v32 = vpop.f32.mrf.mxu2 }
 0x3a7   : > { %v2791_v8 = vmax.f32 %v2681_v7, 0.0  ;;  %v2495_v3 = vadd.f32 %v2494_v32, %v6853_v10  ;;  %v5263_v7 = vld [vmem:[%s8110_s5 + $0xcc] sm:$0xf0] }
 0x3a8   : > { %v2611_v39 = vpop.f32.mrf.mxu1 }
 0x3a9   : > { %v3090_v45 = vadd.f32 %v3089_v31, %v2791_v8  ;;  %v2612_v21 = vadd.f32 %v2611_v39, %v6844_v60  ;;  %v2857_v33 = vmax.f32 %v2495_v3, 0.0  ;;  %v4922_v31 = vor.u32 %v5295_v58, %v4921_v18 }
 0x3aa   : > { %v4794_v8 = vor.u32 %v5263_v7, %v4793_v1 }
 0x3ab   : > { %v2862_v19 = vmax.f32 %v2612_v21, 0.0  ;;  %4650 = vmatmul.msk.bf16.gmra.mxu2 %vm845_vm2, %v6969_v44  ;;  %4671 = vmatmul.msk.bf16.gmra.mxu1 %vm845_vm2, %v6969_v44  ;;  %v3013_v9 = vadd.f32 %v3012_v34, %v2857_v33 }
 0x3ac   : > { %v2682_v25 = vpop.f32.mrf.mxu3  ;;  %3943 = vmatpush.bf16.msrb.mxu2 %v4922_v31  ;;  %3930 = vmatpush.bf16.msrb.mxu0 %v4794_v8  ;;  %v4817_v31 = vld [vmem:[%s8110_s5 + $0xe8] sm:$0xf] }
 0x3ad   : > { %v3061_v14 = vadd.f32 %v3060_v61, %v2862_v19  ;;  %v2683_v54 = vadd.f32 %v2682_v25, %v7015_v56 }
 0x3ae   : > { %v2497_v16 = vpop.f32.mrf.mxu2 }
 0x3af   : > { %v2795_v6 = vmax.f32 %v2683_v54, 0.0  ;;  %v2498_v38 = vadd.f32 %v2497_v16, %v6853_v10 }
 0x3b0   : > { %v2613_v20 = vpop.f32.mrf.mxu1 }
 0x3b1   : > { %v3091_v28 = vadd.f32 %v3090_v45, %v2795_v6  ;;  %v2861_v62 = vmax.f32 %v2498_v38, 0.0  ;;  %4684 = vmatmul.msk.bf16.gmra.mxu3 %vm845_vm2, %v6705_v48  ;;  %v2614_v29 = vadd.f32 %v2613_v20, %v6844_v60 }
 0x3b3   : > { %v3014_v42 = vadd.f32 %v3013_v9, %v2861_v62  ;;  %v2866_v53 = vmax.f32 %v2614_v29, 0.0 }
 0x3b4   : > { %v2685_v23 = vpop.f32.mrf.mxu3 }
 0x3b5   : > { %v2686_v2 = vadd.f32 %v2685_v23, %v7015_v56  ;;  %v3062_v46 = vadd.f32 %v3061_v14, %v2866_v53 }
 0x3b6   : > { %v2403_v57 = vpop.f32.mrf.mxu0  ;;  %v2499_v0 = vpop.f32.mrf.mxu2 }
 0x3b7   : > { %v2799_v17 = vmax.f32 %v2686_v2, 0.0  ;;  %v2404_v52 = vadd.f32 %v2403_v57, %v6666_v13  ;;  %v2500_v48 = vadd.f32 %v2499_v0, %v6853_v10 }
 0x3b8   : > { %v2616_v15 = vpop.f32.mrf.mxu1 }
 0x3b9   : > { %v3092_v43 = vadd.f32 %v3091_v28, %v2799_v17  ;;  %v2892_v59 = vmax.f32 %v2404_v52, 0.0  ;;  %v2617_v47 = vadd.f32 %v2616_v15, %v6844_v60  ;;  %v2865_v50 = vmax.f32 %v2500_v48, 0.0  ;;  %v5300_v15 = vld [vmem:[%s8110_s5 + $0x1f4] sm:$0xf0] }
 0x3bb   : > { %v2975_v22 = vadd.f32 %v2974_v5, %v2892_v59  ;;  %v2870_v4 = vmax.f32 %v2617_v47, 0.0  ;;  %4651 = vmatmul.msk.bf16.gmra.mxu2 %vm845_vm2, %v6987_v30  ;;  %4672 = vmatmul.msk.bf16.gmra.mxu1 %vm845_vm2, %v6987_v30  ;;  %v3015_v61 = vadd.f32 %v3014_v42, %v2865_v50  ;;  %v4945_v5 = vld [vmem:[%s8110_s5 + $0x1e8] sm:$0xf]  ;;  %v5268_v50 = vld [vmem:[%s8110_s5 + $0xf4] sm:$0xf0] }
 0x3bc   : > { %v2687_v12 = vpop.f32.mrf.mxu3  ;;  %v4946_v48 = vor.u32 %v5300_v15, %v4945_v5 }
 0x3bd   : > { %v3063_v34 = vadd.f32 %v3062_v46, %v2870_v4  ;;  %v2688_v24 = vadd.f32 %v2687_v12, %v7015_v56 }
 0x3be   : > { %v2405_v32 = vpop.f32.mrf.mxu0  ;;  %v2502_v27 = vpop.f32.mrf.mxu2  ;;  %4046 = vmatpush.bf16.msra.mxu3 %v4946_v48 }
 0x3bf   : > { %v2803_v39 = vmax.f32 %v2688_v24, 0.0  ;;  %v2503_v45 = vadd.f32 %v2502_v27, %v6853_v10  ;;  %v2406_v3 = vadd.f32 %v2405_v32, %v6666_v13 }
 0x3c0   : > { %v2618_v21 = vpop.f32.mrf.mxu1 }
 0x3c1   : > { %v3093_v19 = vadd.f32 %v3092_v43, %v2803_v39  ;;  %v2869_v25 = vmax.f32 %v2503_v45, 0.0  ;;  %v2619_v41 = vadd.f32 %v2618_v21, %v6844_v60  ;;  %4685 = vmatmul.msk.bf16.gmra.mxu3 %vm845_vm2, %v6729_v40  ;;  %v2896_v54 = vmax.f32 %v2406_v3, 0.0 }
 0x3c3   : > { %v3016_v33 = vadd.f32 %v3015_v61, %v2869_v25  ;;  %v2874_v14 = vmax.f32 %v2619_v41, 0.0  ;;  %v2976_v62 = vadd.f32 %v2975_v22, %v2896_v54 }
 0x3c4   : > { %v2690_v16 = vpop.f32.mrf.mxu3 }
 0x3c5   : > { %v3064_v6 = vadd.f32 %v3063_v34, %v2874_v14  ;;  %v2691_v38 = vadd.f32 %v2690_v16, %v7015_v56  ;;  %v4818_v34 = vor.u32 %v5268_v50, %v4817_v31 }
 0x3c6   : > { %v2408_v51 = vpop.f32.mrf.mxu0  ;;  %v2504_v20 = vpop.f32.mrf.mxu2 }
 0x3c7   : > { %v2807_v9 = vmax.f32 %v2691_v38, 0.0  ;;  %v2409_v28 = vadd.f32 %v2408_v51, %v6666_v13  ;;  %v2505_v23 = vadd.f32 %v2504_v20, %v6853_v10  ;;  %4033 = vmatpush.bf16.msra.mxu1 %v4818_v34 }
 0x3c8   : > { %v2621_v42 = vpop.f32.mrf.mxu1 }
 0x3c9   : > { %v3094_v29 = vadd.f32 %v3093_v19, %v2807_v9  ;;  %v2900_v35 = vmax.f32 %v2409_v28, 0.0  ;;  %v2622_v40 = vadd.f32 %v2621_v42, %v6844_v60  ;;  %v2873_v53 = vmax.f32 %v2505_v23, 0.0 }
 0x3cb   : > { %v7077_v2 = vadd.f32 %v2976_v62, %v2900_v35  ;;  %v2878_v57 = vmax.f32 %v2622_v40, 0.0  ;;  %4652 = vmatmul.msk.bf16.gmra.mxu2 %vm845_vm2, %v7018_v63  ;;  %4673 = vmatmul.msk.bf16.gmra.mxu1 %vm845_vm2, %v7018_v63  ;;  %v3017_v4 = vadd.f32 %v3016_v33, %v2873_v53 }
 0x3cc   : > { %v2692_v0 = vpop.f32.mrf.mxu3 }
 0x3cd   : > { %v3065_v17 = vadd.f32 %v3064_v6, %v2878_v57  ;;  %v2693_v52 = vadd.f32 %v2692_v0, %v7015_v56  ;;  %v4905_v57 = vld [vmem:[%s8110_s5 + $0x1a0] sm:$0xf]  ;;  %v5291_v0 = vld [vmem:[%s8110_s5 + $0x1ac] sm:$0xf0] }
 0x3ce   : > { %v7090_v43 = vpop.f32.mrf.mxu0  ;;  %v2507_v59 = vpop.f32.mrf.mxu2 }
 0x3cf   : > { %v2811_v47 = vmax.f32 %v2693_v52, 0.0  ;;  %v2508_v46 = vadd.f32 %v2507_v59, %v6853_v10  ;;  %v4906_v52 = vor.u32 %v5291_v0, %v4905_v57 }
 0x3d0   : > { %v2623_v22 = vpop.f32.mrf.mxu1 }
 0x3d1   : > { %v3095_v18 = vadd.f32 %v3094_v29, %v2811_v47  ;;  %v2877_v58 = vmax.f32 %v2508_v46, 0.0  ;;  %v2624_v12 = vadd.f32 %v2623_v22, %v6844_v60  ;;  %4686 = vmatmul.msk.bf16.gmra.mxu3 %vm845_vm2, %v6753_v11  ;;  %3944 = vmatpush.bf16.msrb.mxu2 %v4906_v52  ;;  %v4777_v47 = vld [vmem:[%s8110_s5 + $0xa0] sm:$0xf]  ;;  %v5259_v46 = vld [vmem:[%s8110_s5 + $0xac] sm:$0xf0] }
 0x3d2   : > { %v4778_v22 = vor.u32 %v5259_v46, %v4777_v47 }
 0x3d3   : > { %v3018_v24 = vadd.f32 %v3017_v4, %v2877_v58  ;;  %v2882_v1 = vmax.f32 %v2624_v12, 0.0  ;;  %v4801_v4 = vld [vmem:[%s8110_s5 + $0xc8] sm:$0xf] }
 0x3d4   : > { %v2695_v7 = vpop.f32.mrf.mxu3  ;;  %3931 = vmatpush.bf16.msrb.mxu0 %v4778_v22 }
 0x3d5   : > { %v3066_v32 = vadd.f32 %v3065_v17, %v2882_v1  ;;  %v2696_v27 = vadd.f32 %v2695_v7, %v7015_v56 }
 0x3d6   : > { %v7103_v8 = vpop.f32.mrf.mxu0  ;;  %v2509_v39 = vpop.f32.mrf.mxu2 }
 0x3d7   : > { %v2815_v11 = vmax.f32 %v2696_v27, 0.0  ;;  %v2510_v21 = vadd.f32 %v2509_v39, %v6853_v10  ;;  %v5260_v27 = vld [vmem:[%s8110_s5 + $0xb4] sm:$0xf0] }
 0x3d8   : > { %v2626_v45 = vpop.f32.mrf.mxu1 }
 0x3d9   : > { %v3096_v3 = vadd.f32 %v3095_v18, %v2815_v11  ;;  %v2627_v61 = vadd.f32 %v2626_v45, %v6844_v60  ;;  %v2881_v41 = vmax.f32 %v2510_v21, 0.0  ;;  %v5264_v18 = vld [vmem:[%s8110_s5 + $0xd4] sm:$0xf0] }
 0x3da   : > { %v4802_v12 = vor.u32 %v5264_v18, %v4801_v4 }
 0x3db   : > { %v2886_v19 = vmax.f32 %v2627_v61, 0.0  ;;  %v3019_v20 = vadd.f32 %v3018_v24, %v2881_v41  ;;  %v4769_v41 = vld [vmem:[%s8110_s5 + $0x88] sm:$0xf] }
 0x3dc   : > { %v2697_v25 = vpop.f32.mrf.mxu3  ;;  %4034 = vmatpush.bf16.msra.mxu1 %v4802_v12  ;;  %v4745_v12 = vld [vmem:[%s8110_s5 + $0x60] sm:$0xf] }
 0x3dd   : > { %v3067_v33 = vadd.f32 %v3066_v32, %v2886_v19  ;;  %v2698_v14 = vadd.f32 %v2697_v25, %v7015_v56  ;;  %v4785_v32 = vld [vmem:[%s8110_s5 + $0xa8] sm:$0xf] }
 0x3de   : > { %v7108_v54 = vpop.f32.mrf.mxu0  ;;  %v2512_v16 = vpop.f32.mrf.mxu2  ;;  %v4786_v45 = vor.u32 %v5260_v27, %v4785_v32  ;;  %v5244_v32 = vld [vmem:[%s8110_s5 + $0x34] sm:$0xf0] }
 0x3df   : > { %v2819_v6 = vmax.f32 %v2698_v14, 0.0  ;;  %v2513_v38 = vadd.f32 %v2512_v16, %v6853_v10 }
 0x3e0   : > { %v2628_v51 = vpop.f32.mrf.mxu1  ;;  %4035 = vmatpush.bf16.msra.mxu1 %v4786_v45 }
 0x3e1   : > { %v3097_v9 = vadd.f32 %v3096_v3, %v2819_v6  ;;  %v2885_v28 = vmax.f32 %v2513_v38, 0.0  ;;  %v2629_v62 = vadd.f32 %v2628_v51, %v6844_v60  ;;  %4687 = vmatmul.msk.bf16.gmra.mxu3 %vm845_vm2, %v6777_v49 }
 0x3e3   : > { %v3020_v42 = vadd.f32 %v3019_v20, %v2885_v28  ;;  %v2890_v29 = vmax.f32 %v2629_v62, 0.0 }
 0x3e4   : > { %v2700_v35 = vpop.f32.mrf.mxu3 }
 0x3e5   : > { %v3068_v23 = vadd.f32 %v3067_v33, %v2890_v29  ;;  %v2701_v40 = vadd.f32 %v2700_v35, %v7015_v56  ;;  %v5256_v33 = vld [vmem:[%s8110_s5 + $0x94] sm:$0xf0]  ;;  %v4753_v29 = vld [vmem:[%s8110_s5 + $0x68] sm:$0xf] }
 0x3e6   : > { %v7121_v53 = vpop.f32.mrf.mxu0  ;;  %v2514_v17 = vpop.f32.mrf.mxu2  ;;  %v4770_v6 = vor.u32 %v5256_v33, %v4769_v41  ;;  %v5252_v35 = vld [vmem:[%s8110_s5 + $0x74] sm:$0xf0]  ;;  %v4705_v33 = vld [vmem:[%s8110_s5 + $0x8] sm:$0xf] }
 0x3e7   : > { %v2823_v5 = vmax.f32 %v2701_v40, 0.0  ;;  %v2515_v59 = vadd.f32 %v2514_v17, %v6853_v10  ;;  %v4754_v40 = vor.u32 %v5252_v35, %v4753_v29 }
 0x3e8   : > { %v2631_v49 = vpop.f32.mrf.mxu1  ;;  %4036 = vmatpush.bf16.msra.mxu1 %v4770_v6  ;;  %v5266_v6 = vld [vmem:[%s8110_s5 + $0xec] sm:$0xf] }
 0x3e9   : > { %v3098_v15 = vadd.f32 %v3097_v9, %v2823_v5  ;;  %v2632_v48 = vadd.f32 %v2631_v49, %v6844_v60  ;;  %v2889_v50 = vmax.f32 %v2515_v59, 0.0  ;;  %v5296_v9 = vld [vmem:[%s8110_s5 + $0x1d4] sm:$0xf0]  ;;  %v4761_v5 = vld [vmem:[%s8110_s5 + $0x80] sm:$0xf] }
 0x3ea   : > { %v5255_v49 = vld [vmem:[%s8110_s5 + $0x8c] sm:$0xf0]  ;;  %v4737_v59 = vld [vmem:[%s8110_s5 + $0x48] sm:$0xf] }
 0x3eb   : > { %v2894_v58 = vmax.f32 %v2632_v48, 0.0  ;;  %v3021_v21 = vadd.f32 %v3020_v42, %v2889_v50  ;;  %v5248_v48 = vld [vmem:[%s8110_s5 + $0x54] sm:$0xf0] }
 0x3ec   : > { %v2702_v31 = vpop.f32.mrf.mxu3  ;;  %4037 = vmatpush.bf16.msra.mxu1 %v4754_v40  ;;  %v4738_v46 = vor.u32 %v5248_v48, %v4737_v59  ;;  %v2416_v59 = vadd.f32 %v7108_v54, %v6666_v13  ;;  %v4787_v54 = vld [vmem:[%s8110_s5 + $0xb8] sm:$0xf0] }
 0x3ed   : > { %v3069_v34 = vadd.f32 %v3068_v23, %v2894_v58  ;;  %v2703_v24 = vadd.f32 %v2702_v31, %v7015_v56  ;;  %v5251_v31 = vld [vmem:[%s8110_s5 + $0x6c] sm:$0xf0] }
 0x3ee   : > { %v7138_v1 = vpop.f32.mrf.mxu0  ;;  %v2517_v7 = vpop.f32.mrf.mxu2 }
 0x3ef   : > { %v2827_v39 = vmax.f32 %v2703_v24, 0.0  ;;  %v2518_v11 = vadd.f32 %v2517_v7, %v6853_v10  ;;  %v4746_v24 = vor.u32 %v5251_v31, %v4745_v12  ;;  %v4721_v7 = vld [vmem:[%s8110_s5 + $0x28] sm:$0xf]  ;;  %v2419_v12 = vadd.f32 %v7121_v53, %v6666_v13  ;;  %v5049_v53 = vld [vmem:[%s8110_s5 + $0x2c0] sm:$0xf] }
 0x3f0   : > { %v2633_v3 = vpop.f32.mrf.mxu1  ;;  %4038 = vmatpush.bf16.msra.mxu1 %v4738_v46  ;;  %v5331_v46 = vld [vmem:[%s8110_s5 + $0x2ec] sm:$0xf0] }
 0x3f1   : > { %v3099_v61 = vadd.f32 %v3098_v15, %v2827_v39  ;;  %v2893_v19 = vmax.f32 %v2518_v11, 0.0  ;;  %v2634_v25 = vadd.f32 %v2633_v3, %v6844_v60  ;;  %4688 = vmatmul.msk.bf16.gmra.mxu3 %vm845_vm2, %v6891_v26  ;;  %v4929_v26 = vld [vmem:[%s8110_s5 + $0x1c8] sm:$0xf]  ;;  %v4762_v15 = vor.u32 %v5255_v49, %v4761_v5 }
 0x3f2   : > { %v4930_v42 = vor.u32 %v5296_v9, %v4929_v26  ;;  %v4722_v11 = vor.u32 %v5244_v32, %v4721_v7  ;;  %v2411_v26 = vadd.f32 %v7090_v43, %v6666_v13  ;;  %v2414_v43 = vadd.f32 %v7103_v8, %v6666_v13  ;;  %v5239_v8 = vld [vmem:[%s8110_s5 + $0xc] sm:$0xf0] }
 0x3f3   : > { %v3022_v14 = vadd.f32 %v3021_v21, %v2893_v19  ;;  %v2898_v16 = vmax.f32 %v2634_v25, 0.0  ;;  %3932 = vmatpush.bf16.msrb.mxu0 %v4762_v15  ;;  %v4729_v19 = vld [vmem:[%s8110_s5 + $0x40] sm:$0xf]  ;;  %v5247_v25 = vld [vmem:[%s8110_s5 + $0x4c] sm:$0xf0]  ;;  %v2912_v32 = vmax.f32 %v2416_v59, 0.0 }
 0x3f4   : > { %v2705_v38 = vpop.f32.mrf.mxu3  ;;  %4047 = vmatpush.bf16.msra.mxu3 %v4930_v42  ;;  %4039 = vmatpush.bf16.msra.mxu1 %v4722_v11  ;;  %v4730_v41 = vor.u32 %v5247_v25, %v4729_v19  ;;  %v5243_v42 = vld [vmem:[%s8110_s5 + $0x2c] sm:$0xf0]  ;;  %v2904_v5 = vmax.f32 %v2411_v26, 0.0  ;;  %v4697_v15 = vld [vmem:[%s8110_s5] sm:$0xf]  ;;  %v2916_v19 = vmax.f32 %v2419_v12, 0.0 }
 0x3f5   : > { %v3070_v51 = vadd.f32 %v3069_v34, %v2898_v16  ;;  %v2706_v20 = vadd.f32 %v2705_v38, %v7015_v56  ;;  %v4819_v38 = vld [vmem:[%s8110_s5 + $0xf8] sm:$0xf0]  ;;  %v4698_v48 = vor.u32 %v5239_v8, %v4697_v15  ;;  %v4889_v26 = vld [vmem:[%s8110_s5 + $0x180] sm:$0xf] }
 0x3f6   : > { %v7163_v28 = vpop.f32.mrf.mxu0  ;;  %v2519_v62 = vpop.f32.mrf.mxu2  ;;  %v5017_v59 = vld [vmem:[%s8110_s5 + $0x280] sm:$0xf] }
 0x3f7   : > { %v2831_v23 = vmax.f32 %v2706_v20, 0.0  ;;  %v2520_v17 = vadd.f32 %v2519_v62, %v6853_v10  ;;  %3933 = vmatpush.bf16.msrb.mxu0 %v4746_v24  ;;  %v4822_v20 = vor.u32 %v5266_v6, %v4819_v38  ;;  %v4713_v62 = vld [vmem:[%s8110_s5 + $0x20] sm:$0xf]  ;;  %v2978_v24 = vadd.f32 %v7077_v2, %v2904_v5 }
 0x3f8   : > { %v2636_v57 = vpop.f32.mrf.mxu1  ;;  %v2424_v25 = vadd.f32 %v7163_v28, %v6666_v13  ;;  %v5323_v28 = vld [vmem:[%s8110_s5 + $0x2ac] sm:$0xf0] }
 0x3f9   : > { %v3100_v0 = vadd.f32 %v3099_v61, %v2831_v23  ;;  %v2637_v52 = vadd.f32 %v2636_v57, %v6844_v60  ;;  %v2897_v4 = vmax.f32 %v2520_v17, 0.0  ;;  %v4714_v23 = vor.u32 %v5243_v42, %v4713_v62  ;;  %v5262_v57 = vld [vmem:[%s8110_s5 + $0xcc] sm:$0xf] }
 0x3fa   : > { %v2924_v42 = vmax.f32 %v2424_v25, 0.0 }
 0x3fb   : > { %v2902_v47 = vmax.f32 %v2637_v52, 0.0  ;;  %v3023_v3 = vadd.f32 %v3022_v14, %v2897_v4  ;;  %v5240_v14 = vld [vmem:[%s8110_s5 + $0x14] sm:$0xf0]  ;;  %3934 = vmatpush.bf16.msrb.mxu0 %v4730_v41 }
 0x3fc   : > { %v2707_v22 = vpop.f32.mrf.mxu3 }
 0x3fd   : > { %v7185_v18 = vadd.f32 %v3070_v51, %v2902_v47  ;;  %v2708_v58 = vadd.f32 %v2707_v22, %v7015_v56  ;;  %v5065_v47 = vld [vmem:[%s8110_s5 + $0x2e0] sm:$0xf]  ;;  %v2908_v22 = vmax.f32 %v2414_v43, 0.0 }
 0x3fe   : > { %v7194_v50 = vpop.f32.mrf.mxu0  ;;  %v2522_v34 = vpop.f32.mrf.mxu2  ;;  %v5066_v4 = vor.u32 %v5331_v46, %v5065_v47 }
 0x3ff   : > { %v2835_v27 = vmax.f32 %v2708_v58, 0.0  ;;  %v2523_v39 = vadd.f32 %v2522_v34, %v6853_v10  ;;  %3935 = vmatpush.bf16.msrb.mxu0 %v4714_v23  ;;  %v5258_v58 = vld [vmem:[%s8110_s5 + $0xac] sm:$0xf]  ;;  %v2979_v2 = vadd.f32 %v2978_v24, %v2908_v22 }
 0x400   : > { %v7203_v45 = vpop.f32.mrf.mxu1  ;;  %v4790_v34 = vor.u32 %v5258_v58, %v4787_v54  ;;  %v4739_v58 = vld [vmem:[%s8110_s5 + $0x58] sm:$0xf0] }
 0x401   : > { %v3101_v21 = vadd.f32 %v3100_v0, %v2835_v27  ;;  %v2901_v61 = vmax.f32 %v2523_v39, 0.0  ;;  %4689 = vmatmul.msk.bf16.gmra.mxu3 %vm845_vm2, %v6911_v55  ;;  %v4706_v55 = vor.u32 %v5240_v14, %v4705_v33  ;;  %v4803_v0 = vld [vmem:[%s8110_s5 + $0xd8] sm:$0xf0]  ;;  %v2421_v27 = vadd.f32 %v7138_v1, %v6666_v13 }
 0x402   : > { %v4806_v52 = vor.u32 %v5262_v57, %v4803_v0  ;;  %v4771_v1 = vld [vmem:[%s8110_s5 + $0x98] sm:$0xf0]  ;;  %v2980_v6 = vadd.f32 %v2979_v2, %v2912_v32  ;;  %v5001_v32 = vld [vmem:[%s8110_s5 + $0x260] sm:$0xf] }
 0x403   : > { %v7219_v16 = vadd.f32 %v3023_v3, %v2901_v61  ;;  %4040 = vmatpush.bf16.msra.mxu1 %v4706_v55  ;;  %3936 = vmatpush.bf16.msrb.mxu0 %v4698_v48  ;;  %v5327_v3 = vld [vmem:[%s8110_s5 + $0x2cc] sm:$0xf0]  ;;  %v5254_v61 = vld [vmem:[%s8110_s5 + $0x8c] sm:$0xf]  ;;  %v2920_v38 = vmax.f32 %v2421_v27, 0.0 }
 0x404   : > { %v2710_v51 = vpop.f32.mrf.mxu3  ;;  %v5050_v33 = vor.u32 %v5327_v3, %v5049_v53  ;;  %v4774_v14 = vor.u32 %v5254_v61, %v4771_v1  ;;  %v2981_v62 = vadd.f32 %v2980_v6, %v2916_v19  ;;  %v5319_v48 = vld [vmem:[%s8110_s5 + $0x28c] sm:$0xf0]  ;;  %v4723_v61 = vld [vmem:[%s8110_s5 + $0x38] sm:$0xf0] }
 0x405   : > { %v2711_v9 = vadd.f32 %v2710_v51, %v7015_v56  ;;  %v5033_v51 = vld [vmem:[%s8110_s5 + $0x2a0] sm:$0xf]  ;;  %v5018_v22 = vor.u32 %v5319_v48, %v5017_v59  ;;  %v5315_v27 = vld [vmem:[%s8110_s5 + $0x26c] sm:$0xf0] }
 0x406   : > { %v7236_v29 = vpop.f32.mrf.mxu0  ;;  %v7238_v35 = vpop.f32.mrf.mxu2  ;;  %v5002_v2 = vor.u32 %v5315_v27, %v5001_v32 }
 0x407   : > { %4085 = vmatpush.bf16.msrb.mxu1 %v4822_v20  ;;  %v2839_v40 = vmax.f32 %v2711_v9, 0.0  ;;  %3955 = vmatpush.bf16.msra.mxu0 %v5066_v4  ;;  %v2426_v20 = vadd.f32 %v7194_v50, %v6666_v13  ;;  %v5034_v9 = vor.u32 %v5323_v28, %v5033_v51  ;;  %v4755_v50 = vld [vmem:[%s8110_s5 + $0x78] sm:$0xf0]  ;;  %v2429_v57 = vadd.f32 %v7236_v29, %v6666_v13  ;;  %v5246_v4 = vld [vmem:[%s8110_s5 + $0x4c] sm:$0xf] }
 0x408   : > { %v7248_v17 = vpop.f32.mrf.mxu1  ;;  %v4742_v12 = vor.u32 %v5246_v4, %v4739_v58  ;;  %v4985_v51 = vld [vmem:[%s8110_s5 + $0x240] sm:$0xf]  ;;  %v5311_v28 = vld [vmem:[%s8110_s5 + $0x24c] sm:$0xf0] }
 0x409   : > { %v3102_v49 = vadd.f32 %v3101_v21, %v2839_v40  ;;  %v5250_v40 = vld [vmem:[%s8110_s5 + $0x6c] sm:$0xf]  ;;  %v2928_v29 = vmax.f32 %v2426_v20, 0.0  ;;  %v4953_v4 = vld [vmem:[%s8110_s5 + $0x200] sm:$0xf] }
 0x40a   : > { %v4758_v5 = vor.u32 %v5250_v40, %v4755_v50  ;;  %v5303_v58 = vld [vmem:[%s8110_s5 + $0x20c] sm:$0xf0] }
 0x40b   : > { %4086 = vmatpush.bf16.msrb.mxu1 %v4806_v52  ;;  %3956 = vmatpush.bf16.msra.mxu0 %v5050_v33  ;;  %v5387_v52 = vmov 336.0  }
 0x40c   : > { %v2712_v31 = vpop.f32.mrf.mxu3  ;;  %5375 = vrcp.f32 %v5387_v52 }
 0x40d   : > { %v2713_v7 = vadd.f32 %v2712_v31, %v7015_v56 }
 0x40e   : > { %v2430_v39 = vpop.f32.mrf.mxu0  ;;  %v7276_v11 = vpop.f32.mrf.mxu2 }
 0x40f   : > { %4087 = vmatpush.bf16.msrb.mxu1 %v4790_v34  ;;  %v2843_v21 = vmax.f32 %v2713_v7, 0.0  ;;  %3957 = vmatpush.bf16.msra.mxu0 %v5034_v9  ;;  %v2431_v47 = vadd.f32 %v2430_v39, %v6666_v13  ;;  %v2932_v34 = vmax.f32 %v2429_v57, 0.0  ;;  %v4986_v9 = vor.u32 %v5311_v28, %v4985_v51  ;;  %v5265_v28 = vld [vmem:[%s8110_s5 + $0xe4] sm:$0xf] }
 0x410   : > { %v7292_v41 = vpop.f32.mrf.mxu1 }
 0x411   : > { %v3103_v55 = vadd.f32 %v3102_v49, %v2843_v21  ;;  %4690 = vmatmul.msk.bf16.gmra.mxu3 %vm845_vm2, %v6933_v36  ;;  %v5287_v36 = vld [vmem:[%s8110_s5 + $0x18c] sm:$0xf0]  ;;  %v2982_v49 = vadd.f32 %v2981_v62, %v2920_v38  ;;  %v2936_v3 = vmax.f32 %v2431_v47, 0.0  ;;  %v5242_v21 = vld [vmem:[%s8110_s5 + $0x2c] sm:$0xf] }
 0x412   : > { %v4890_v43 = vor.u32 %v5287_v36, %v4889_v26  ;;  %v7343_v39 = vpop.eup %5375  ;;  %v4726_v19 = vor.u32 %v5242_v21, %v4723_v61  ;;  %v5238_v62 = vld [vmem:[%s8110_s5 + $0xc] sm:$0xf] }
 0x413   : > { %4088 = vmatpush.bf16.msrb.mxu1 %v4774_v14  ;;  %v2983_v31 = vadd.f32 %v2982_v49, %v2924_v42  ;;  %3958 = vmatpush.bf16.msra.mxu0 %v5018_v22  ;;  %v3137_v6 = vmul.f32 336.0, %v7343_v39  ;;  %v4707_v42 = vld [vmem:[%s8110_s5 + $0x18] sm:$0xf0]  ;;  %v4969_v49 = vld [vmem:[%s8110_s5 + $0x220] sm:$0xf]  ;;  %vm3141_vm3 = vweird.f32 %v7343_v39 }
 0x414   : > { %v2715_v23 = vpop.f32.mrf.mxu3  ;;  %3945 = vmatpush.bf16.msrb.mxu2 %v4890_v43  ;;  %v4710_v43 = vor.u32 %v5238_v62, %v4707_v42  ;;  %v4865_v42 = vld [vmem:[%s8110_s5 + $0x148] sm:$0xf] }
 0x415   : > { %v2716_v0 = vadd.f32 %v2715_v23, %v7015_v56  ;;  %v2984_v53 = vadd.f32 %v2983_v31, %v2928_v29  ;;  %v3138_v52 = vsub.f32 1.0, %v3137_v6 }
 0x416   : > { %v2433_v15 = vpop.f32.mrf.mxu0  ;;  %v7319_v8 = vpop.f32.mrf.mxu2 }
 0x417   : > { %v2847_v46 = vmax.f32 %v2716_v0, 0.0  ;;  %4089 = vmatpush.bf16.msrb.mxu1 %v4758_v5  ;;  %v2434_v7 = vadd.f32 %v2433_v15, %v6666_v13  ;;  %v2985_v25 = vadd.f32 %v2984_v53, %v2932_v34  ;;  %3959 = vmatpush.bf16.msra.mxu0 %v5002_v2  ;;  %v5292_v0 = vld [vmem:[%s8110_s5 + $0x1b4] sm:$0xf0]  ;;  %v5307_v15 = vld [vmem:[%s8110_s5 + $0x22c] sm:$0xf0]  ;;  %v4954_v34 = vor.u32 %v5303_v58, %v4953_v4 }
 0x418   : > { %v7334_v54 = vpop.f32.mrf.mxu1  ;;  %v4970_v59 = vor.u32 %v5307_v15, %v4969_v49  ;;  %v4897_v53 = vld [vmem:[%s8110_s5 + $0x188] sm:$0xf]  ;;  %v2642_v4 = vadd.f32 %v7248_v17, %v6844_v60  ;;  %v2644_v17 = vadd.f32 %v7292_v41, %v6844_v60 }
 0x419   : > { %v3104_v24 = vadd.f32 %v3103_v55, %v2847_v46  ;;  %v2940_v33 = vmax.f32 %v2434_v7, 0.0  ;;  %v2986_v20 = vadd.f32 %v2985_v25, %v2936_v3  ;;  %v3139_v46 = vmul.f32 %v7343_v39, %v3138_v52  ;;  %v5288_v3 = vld [vmem:[%s8110_s5 + $0x194] sm:$0xf0]  ;;  %v4849_v15 = vld [vmem:[%s8110_s5 + $0x128] sm:$0xf] }
 0x41a   : > { %v4898_v21 = vor.u32 %v5288_v3, %v4897_v53  ;;  %v4763_v53 = vld [vmem:[%s8110_s5 + $0x90] sm:$0xf0]  ;;  %v2910_v41 = vmax.f32 %v2642_v4, 0.0 }
 0x41b   : > { %4090 = vmatpush.bf16.msrb.mxu1 %v4742_v12  ;;  %v2987_v40 = vadd.f32 %v2986_v20, %v2940_v33  ;;  %3960 = vmatpush.bf16.msra.mxu0 %v4986_v9  ;;  %v3140_v27 = vadd.f32 %v7343_v39, %v3139_v46 }
 0x41c   : > { %v2717_v1 = vpop.f32.mrf.mxu3 }
 0x41d   : > { %v2718_v14 = vadd.f32 %v2717_v1, %v7015_v56  ;;  %v7406_v25 = vsel %vm3141_vm3, %v7343_v39, %v3140_v27  ;;  %v4811_v39 = vld [vmem:[%s8110_s5 + $0xf0] sm:$0xf0]  ;;  %v5283_v27 = vld [vmem:[%s8110_s5 + $0x16c] sm:$0xf0] }
 0x41e   : > { %v2435_v55 = vpop.f32.mrf.mxu0  ;;  %v7353_v38 = vpop.f32.mrf.mxu2  ;;  %v4814_v62 = vor.u32 %v5265_v28, %v4811_v39  ;;  %v5249_v39 = vld [vmem:[%s8110_s5 + $0x64] sm:$0xf] }
 0x41f   : > { %v2851_v26 = vmax.f32 %v2718_v14, 0.0  ;;  %v2436_v36 = vadd.f32 %v2435_v55, %v6666_v13  ;;  %4091 = vmatpush.bf16.msrb.mxu1 %v4726_v19  ;;  %v4913_v13 = vld [vmem:[%s8110_s5 + $0x1a8] sm:$0xf]  ;;  %3961 = vmatpush.bf16.msra.mxu0 %v4970_v59  ;;  %v5284_v55 = vld [vmem:[%s8110_s5 + $0x174] sm:$0xf0] }
 0x420   : > { %v7368_v23 = vpop.f32.mrf.mxu1  ;;  %v4914_v5 = vor.u32 %v5292_v0, %v4913_v13  ;;  %v4881_v14 = vld [vmem:[%s8110_s5 + $0x168] sm:$0xf]  ;;  %v2639_v0 = vadd.f32 %v7203_v45, %v6844_v60  ;;  %v5257_v59 = vld [vmem:[%s8110_s5 + $0xa4] sm:$0xf] }
 0x421   : > { %v3105_v50 = vadd.f32 %v3104_v24, %v2851_v26  ;;  %v2944_v57 = vmax.f32 %v2436_v36, 0.0  ;;  %4691 = vmatmul.msk.bf16.gmra.mxu3 %vm845_vm2, %v6951_v37  ;;  %v4882_v20 = vor.u32 %v5284_v55, %v4881_v14  ;;  %v4947_v55 = vld [vmem:[%s8110_s5 + $0x1f8] sm:$0xf0] }
 0x422   : > { %4048 = vmatpush.bf16.msra.mxu3 %v4914_v5  ;;  %v2906_v46 = vmax.f32 %v2639_v0, 0.0 }
 0x423   : > { %v2988_v37 = vadd.f32 %v2987_v40, %v2944_v57  ;;  %4092 = vmatpush.bf16.msrb.mxu1 %v4710_v43  ;;  %3962 = vmatpush.bf16.msra.mxu0 %v4954_v34  ;;  %v5280_v43 = vld [vmem:[%s8110_s5 + $0x154] sm:$0xf0]  ;;  %v5253_v34 = vld [vmem:[%s8110_s5 + $0x84] sm:$0xf] }
 0x424   : > { %v2720_v48 = vpop.f32.mrf.mxu3  ;;  %v4866_v57 = vor.u32 %v5280_v43, %v4865_v42  ;;  %v4766_v28 = vor.u32 %v5253_v34, %v4763_v53  ;;  %v5279_v42 = vld [vmem:[%s8110_s5 + $0x14c] sm:$0xf0]  ;;  %v2530_v43 = vadd.f32 %v7319_v8, %v6853_v10  ;;  %v4931_v8 = vld [vmem:[%s8110_s5 + $0x1d8] sm:$0xf0] }
 0x425   : > { %v2989_v29 = vrot.slane %v2988_v37, 4  ;;  %v2721_v47 = vadd.f32 %v2720_v48, %v7015_v56  ;;  %v4779_v48 = vld [vmem:[%s8110_s5 + $0xb0] sm:$0xf0] }
 0x426   : > { %v7386_v22 = vpop.f32.mrf.mxu2  ;;  %4049 = vmatpush.bf16.msra.mxu3 %v4898_v21  ;;  %v2913_v4 = vmax.f32 %v2530_v43, 0.0 }
 0x427   : > { %v2990_v12 = vadd.f32 %v2989_v29, %v2988_v37  ;;  %v2855_v31 = vmax.f32 %v2721_v47, 0.0  ;;  %v5276_v37 = vld [vmem:[%s8110_s5 + $0x134] sm:$0xf0] }
 0x428   : > { %v7394_v24 = vpop.f32.mrf.mxu1  ;;  %v4850_v29 = vor.u32 %v5276_v37, %v4849_v15  ;;  %v5245_v37 = vld [vmem:[%s8110_s5 + $0x44] sm:$0xf] }
 0x429   : > { %v2991_v7 = vrot.slane %v2990_v12, 2  ;;  %v3106_v32 = vadd.f32 %v3105_v50, %v2855_v31  ;;  %v5261_v50 = vld [vmem:[%s8110_s5 + $0xc4] sm:$0xf]  ;;  %v4782_v31 = vor.u32 %v5257_v59, %v4779_v48 }
 0x42a   : > { %4050 = vmatpush.bf16.msra.mxu3 %v4882_v20  ;;  %v3072_v20 = vadd.f32 %v7185_v18, %v2906_v46  ;;  %v5275_v46 = vld [vmem:[%s8110_s5 + $0x12c] sm:$0xf0] }
 0x42b   : > { %v2992_v2 = vadd.f32 %v2991_v7, %v2990_v12  ;;  %v2525_v12 = vadd.f32 %v7238_v35, %v6853_v10  ;;  %v4833_v7 = vld [vmem:[%s8110_s5 + $0x108] sm:$0xf]  ;;  %v4873_v35 = vld [vmem:[%s8110_s5 + $0x160] sm:$0xf] }
 0x42c   : > { %v2722_v61 = vpop.f32.mrf.mxu3  ;;  %v4874_v21 = vor.u32 %v5283_v27, %v4873_v35  ;;  %v2535_v27 = vadd.f32 %v7386_v22, %v6853_v10 }
 0x42d   : > { %v2993_v1 = vrot.slane %v2992_v2, 1  ;;  %v2723_v19 = vadd.f32 %v2722_v61, %v7015_v56  ;;  %v5298_v61 = vld [vmem:[%s8110_s5 + $0x1ec] sm:$0xf] }
 0x42e   : > { %v7408_v33 = vpop.f32.mrf.mxu2  ;;  %4051 = vmatpush.bf16.msra.mxu3 %v4866_v57  ;;  %3946 = vmatpush.bf16.msrb.mxu2 %v4874_v21  ;;  %v5294_v57 = vld [vmem:[%s8110_s5 + $0x1cc] sm:$0xf] }
 0x42f   : > { %v2994_v6 = vadd.f32 %v2993_v1, %v2992_v2  ;;  %v2859_v51 = vmax.f32 %v2723_v19, 0.0  ;;  %v2528_v1 = vadd.f32 %v7276_v11, %v6853_v10  ;;  %v2647_v19 = vadd.f32 %v7334_v54, %v6844_v60  ;;  %v4747_v11 = vld [vmem:[%s8110_s5 + $0x70] sm:$0xf0] }
 0x430   : > { %v7422_v26 = vpop.f32.mrf.mxu1  ;;  %v4950_v54 = vor.u32 %v5298_v61, %v4947_v55  ;;  %v4750_v15 = vor.u32 %v5249_v39, %v4747_v11 }
 0x431   : > { %v3143_v36 = vmul.f32 %v7406_v25, %v2994_v6  ;;  %v3107_v9 = vadd.f32 %v3106_v32, %v2859_v51  ;;  %4692 = vmatmul.msk.bf16.gmra.mxu3 %vm845_vm2, %v6969_v44  ;;  %v4795_v44 = vld [vmem:[%s8110_s5 + $0xd0] sm:$0xf0]  ;;  %v5272_v32 = vld [vmem:[%s8110_s5 + $0x114] sm:$0xf0]  ;;  %v2905_v6 = vmax.f32 %v2525_v12, 0.0  ;;  %v2909_v0 = vmax.f32 %v2528_v1, 0.0 }
 0x432   : > { %v4798_v49 = vor.u32 %v5261_v50, %v4795_v44  ;;  %4052 = vmatpush.bf16.msra.mxu3 %v4850_v29  ;;  %v4834_v3 = vor.u32 %v5272_v32, %v4833_v7  ;;  %v2649_v50 = vadd.f32 %v7368_v23, %v6844_v60  ;;  %v2533_v23 = vadd.f32 %v7353_v38, %v6853_v10  ;;  %v4731_v29 = vld [vmem:[%s8110_s5 + $0x50] sm:$0xf0]  ;;  %v4841_v38 = vld [vmem:[%s8110_s5 + $0x120] sm:$0xf] }
 0x433   : > { %v7433_v40 = vpack.c.bf16 %v3143_v36, %v3143_v36  ;;  %v2914_v36 = vmax.f32 %v2644_v17, 0.0  ;;  %v3025_v59 = vadd.f32 %v7219_v16, %v2905_v6  ;;  %v4842_v16 = vor.u32 %v5275_v46, %v4841_v38  ;;  %v4915_v17 = vld [vmem:[%s8110_s5 + $0x1b8] sm:$0xf0]  ;;  %v4715_v1 = vld [vmem:[%s8110_s5 + $0x30] sm:$0xf0] }
 0x434   : > { %v2725_v13 = vpop.f32.mrf.mxu3  ;;  %v2654_v7 = vadd.f32 %v7422_v26, %v6844_v60  ;;  %v2917_v35 = vmax.f32 %v2533_v23, 0.0  ;;  %v5271_v6 = vld [vmem:[%s8110_s5 + $0x10c] sm:$0xf0] }
 0x435   : > { %v2726_v52 = vadd.f32 %v2725_v13, %v7015_v56  ;;  %3937 = vmatmul.bf16.vlgmr.msrb.gmra.mxu0 %v7433_v40  ;;  %4041 = vmatmul.bf16.vlgmr.msra.gmra.mxu1 %v7433_v40  ;;  %v3073_v13 = vadd.f32 %v3072_v20, %v2910_v41  ;;  %v5241_v41 = vld [vmem:[%s8110_s5 + $0x24] sm:$0xf] }
 0x436   : > { %v7446_v5 = vpop.f32.mrf.mxu2  ;;  %3981 = vmatpush.bf16.msrb.mxu0 %v4814_v62  ;;  %4053 = vmatpush.bf16.msra.mxu3 %v4834_v3  ;;  %v4857_v62 = vld [vmem:[%s8110_s5 + $0x140] sm:$0xf]  ;;  %v4734_v3 = vor.u32 %v5245_v37, %v4731_v29  ;;  %v2930_v39 = vmax.f32 %v2654_v7, 0.0 }
 0x437   : > { %v2863_v45 = vmax.f32 %v2726_v52, 0.0  ;;  %v4858_v18 = vor.u32 %v5279_v42, %v4857_v62  ;;  %v2918_v52 = vmax.f32 %v2647_v19, 0.0  ;;  %v3074_v48 = vadd.f32 %v3073_v13, %v2914_v36 }
 0x438   : > { %v7460_v47 = vpop.f32.mrf.mxu1  ;;  %v2921_v36 = vmax.f32 %v2535_v27, 0.0  ;;  %v4718_v62 = vor.u32 %v5241_v41, %v4715_v1  ;;  %v5274_v41 = vld [vmem:[%s8110_s5 + $0x12c] sm:$0xf] }
 0x439   : > { %v3108_v58 = vadd.f32 %v3107_v9, %v2863_v45  ;;  %3947 = vmatpush.bf16.msrb.mxu2 %v4858_v18  ;;  %v4934_v45 = vor.u32 %v5294_v57, %v4931_v8  ;;  %v3075_v34 = vadd.f32 %v3074_v48, %v2918_v52  ;;  %v2657_v26 = vadd.f32 %v7460_v47, %v6844_v60  ;;  %v4825_v47 = vld [vmem:[%s8110_s5 + $0x100] sm:$0xf]  ;;  %v4699_v57 = vld [vmem:[%s8110_s5 + $0x10] sm:$0xf0]  ;;  %v4883_v8 = vld [vmem:[%s8110_s5 + $0x178] sm:$0xf0] }
 0x43a   : > { %3982 = vmatpush.bf16.msrb.mxu0 %v4798_v49  ;;  %4098 = vmatpush.bf16.msrb.mxu3 %v4950_v54  ;;  %v4826_v20 = vor.u32 %v5271_v6, %v4825_v47 }
 0x43c   : > { %v2727_v2 = vpop.f32.mrf.mxu3 }
 0x43d   : > { %v2728_v14 = vadd.f32 %v2727_v2, %v7015_v56  ;;  %3948 = vmatpush.bf16.msrb.mxu2 %v4842_v16 }
 0x43e   : > { %v7497_v51 = vpop.f32.mrf.mxu2  ;;  %3983 = vmatpush.bf16.msrb.mxu0 %v4782_v31  ;;  %4099 = vmatpush.bf16.msrb.mxu3 %v4934_v45  ;;  %v3026_v31 = vadd.f32 %v3025_v59, %v2909_v0 }
 0x43f   : > { %v2867_v9 = vmax.f32 %v2728_v14, 0.0  ;;  %v2538_v14 = vadd.f32 %v7408_v33, %v6853_v10  ;;  %v4899_v33 = vld [vmem:[%s8110_s5 + $0x198] sm:$0xf0] }
 0x440   : > { %v2658_v44 = vpop.f32.mrf.mxu1  ;;  %v3027_v19 = vadd.f32 %v3026_v31, %v2913_v4  ;;  %v5278_v31 = vld [vmem:[%s8110_s5 + $0x14c] sm:$0xf] }
 0x441   : > { %v3109_v49 = vadd.f32 %v3108_v58, %v2867_v9  ;;  %4693 = vmatmul.msk.bf16.gmra.mxu3 %vm845_vm2, %v6987_v30  ;;  %v2652_v30 = vadd.f32 %v7394_v24, %v6844_v60  ;;  %v2922_v58 = vmax.f32 %v2649_v50, 0.0  ;;  %v5290_v24 = vld [vmem:[%s8110_s5 + $0x1ac] sm:$0xf]  ;;  %v2659_v11 = vadd.f32 %v2658_v44, %v6844_v60  ;;  %v5237_v44 = vld [vmem:[%s8110_s5 + $0x4] sm:$0xf]  ;;  %3949 = vmatpush.bf16.msrb.mxu2 %v4826_v20 }
 0x442   : > { %3984 = vmatpush.bf16.msrb.mxu0 %v4766_v28  ;;  %v4918_v2 = vor.u32 %v5290_v24, %v4915_v17  ;;  %v5286_v28 = vld [vmem:[%s8110_s5 + $0x18c] sm:$0xf]  ;;  %v2540_v9 = vadd.f32 %v7446_v5, %v6853_v10  ;;  %v2934_v50 = vmax.f32 %v2657_v26, 0.0  ;;  %v3028_v13 = vadd.f32 %v3027_v19, %v2917_v35 }
 0x443   : > { %v2926_v21 = vmax.f32 %v2652_v30, 0.0  ;;  %v3076_v22 = vadd.f32 %v3075_v34, %v2922_v58  ;;  %v4902_v42 = vor.u32 %v5286_v28, %v4899_v33  ;;  %v2925_v0 = vmax.f32 %v2538_v14, 0.0  ;;  %v4867_v34 = vld [vmem:[%s8110_s5 + $0x158] sm:$0xf0] }
 0x444   : > { %v2730_v12 = vpop.f32.mrf.mxu3  ;;  %4100 = vmatpush.bf16.msrb.mxu3 %v4918_v2  ;;  %v2543_v5 = vadd.f32 %v7497_v51, %v6853_v10  ;;  %v3029_v59 = vadd.f32 %v3028_v13, %v2921_v36  ;;  %v2929_v48 = vmax.f32 %v2540_v9, 0.0  ;;  %v4702_v29 = vor.u32 %v5237_v44, %v4699_v57 }
 0x445   : > { %v2731_v32 = vadd.f32 %v2730_v12, %v7015_v56  ;;  %4093 = vmatmul.bf16.vlgmr.msrb.gmra.mxu1 %v7433_v40  ;;  %v3077_v43 = vadd.f32 %v3076_v22, %v2926_v21  ;;  %v4870_v35 = vor.u32 %v5278_v31, %v4867_v34 }
 0x446   : > { %v2544_v53 = vpop.f32.mrf.mxu2  ;;  %3985 = vmatpush.bf16.msrb.mxu0 %v4750_v15  ;;  %v2938_v15 = vmax.f32 %v2659_v11, 0.0  ;;  %v3030_v58 = vadd.f32 %v3029_v59, %v2925_v0  ;;  %v2933_v12 = vmax.f32 %v2543_v5, 0.0  ;;  %v4835_v11 = vld [vmem:[%s8110_s5 + $0x118] sm:$0xf0] }
 0x447   : > { %v2871_v61 = vmax.f32 %v2731_v32, 0.0  ;;  %v3078_v23 = vadd.f32 %v3077_v43, %v2930_v39  ;;  %v2545_v30 = vadd.f32 %v2544_v53, %v6853_v10  ;;  %v5270_v39 = vld [vmem:[%s8110_s5 + $0x10c] sm:$0xf] }
 0x448   : > { %v2661_v55 = vpop.f32.mrf.mxu1  ;;  %4101 = vmatpush.bf16.msrb.mxu3 %v4902_v42  ;;  %v3031_v27 = vadd.f32 %v3030_v58, %v2929_v48  ;;  %v4838_v36 = vor.u32 %v5270_v39, %v4835_v11  ;;  %v5073_v39 = vld [vmem:[%s8110_s5 + $0x2e8] sm:$0xf]  ;;  %v5332_v11 = vld [vmem:[%s8110_s5 + $0x2f4] sm:$0xf0] }
 0x449   : > { %v3110_v54 = vadd.f32 %v3109_v49, %v2871_v61  ;;  %v2662_v18 = vadd.f32 %v2661_v55, %v6844_v60  ;;  %v5282_v49 = vld [vmem:[%s8110_s5 + $0x16c] sm:$0xf]  ;;  %v3079_v38 = vadd.f32 %v3078_v23, %v2934_v50  ;;  %v2937_v53 = vmax.f32 %v2545_v30, 0.0  ;;  %v5325_v30 = vld [vmem:[%s8110_s5 + $0x2c4] sm:$0xf] }
 0x44a   : > { %3986 = vmatpush.bf16.msrb.mxu0 %v4734_v3  ;;  %v4886_v45 = vor.u32 %v5282_v49, %v4883_v8  ;;  %v3032_v21 = vadd.f32 %v3031_v27, %v2933_v12  ;;  %v5067_v49 = vld [vmem:[%s8110_s5 + $0x2f0] sm:$0xf0]  ;;  %v5321_v12 = vld [vmem:[%s8110_s5 + $0x2a4] sm:$0xf] }
 0x44b   : > { %v2942_v46 = vmax.f32 %v2662_v18, 0.0  ;;  %v3080_v7 = vadd.f32 %v3079_v38, %v2938_v15 }
 0x44c   : > { %v2732_v52 = vpop.f32.mrf.mxu3  ;;  %4102 = vmatpush.bf16.msrb.mxu3 %v4886_v45  ;;  %v3033_v22 = vadd.f32 %v3032_v21, %v2937_v53 }
 0x44d   : > { %v2733_v37 = vadd.f32 %v2732_v52, %v7015_v56  ;;  %v3081_v3 = vadd.f32 %v3080_v7, %v2942_v46  ;;  %v5329_v52 = vld [vmem:[%s8110_s5 + $0x2e4] sm:$0xf] }
 0x44e   : > { %v2547_v51 = vpop.f32.mrf.mxu2  ;;  %3987 = vmatpush.bf16.msrb.mxu0 %v4718_v62 }
 0x44f   : > { %v2875_v4 = vmax.f32 %v2733_v37, 0.0  ;;  %v2548_v16 = vadd.f32 %v2547_v51, %v6853_v10  ;;  %v5070_v37 = vor.u32 %v5329_v52, %v5067_v49  ;;  %v5051_v51 = vld [vmem:[%s8110_s5 + $0x2d0] sm:$0xf0] }
 0x450   : > { %v2663_v24 = vpop.f32.mrf.mxu1  ;;  %4103 = vmatpush.bf16.msrb.mxu3 %v4870_v35  ;;  %v5054_v46 = vor.u32 %v5325_v30, %v5051_v51  ;;  %v4977_v51 = vld [vmem:[%s8110_s5 + $0x228] sm:$0xf] }
 0x451   : > { %v3111_v32 = vadd.f32 %v3110_v54, %v2875_v4  ;;  %v2664_v17 = vadd.f32 %v2663_v24, %v6844_v60  ;;  %4694 = vmatmul.msk.bf16.gmra.mxu3 %vm845_vm2, %v7018_v63  ;;  %v2941_v26 = vmax.f32 %v2548_v16, 0.0  ;;  %v4851_v60 = vld [vmem:[%s8110_s5 + $0x138] sm:$0xf0]  ;;  %v5035_v16 = vld [vmem:[%s8110_s5 + $0x2b0] sm:$0xf0] }
 0x452   : > { %3988 = vmatpush.bf16.msrb.mxu0 %v4702_v29  ;;  %v4854_v19 = vor.u32 %v5274_v41, %v4851_v60  ;;  %v5038_v34 = vor.u32 %v5321_v12, %v5035_v16  ;;  %v5309_v41 = vld [vmem:[%s8110_s5 + $0x244] sm:$0xf]  ;;  %v4987_v60 = vld [vmem:[%s8110_s5 + $0x250] sm:$0xf0]  ;;  %v4961_v12 = vld [vmem:[%s8110_s5 + $0x208] sm:$0xf] }
 0x453   : > { %v2946_v2 = vmax.f32 %v2664_v17, 0.0  ;;  %v3034_v28 = vadd.f32 %v3033_v22, %v2941_v26  ;;  %v5019_v17 = vld [vmem:[%s8110_s5 + $0x290] sm:$0xf0]  ;;  %v5305_v22 = vld [vmem:[%s8110_s5 + $0x224] sm:$0xf] }
 0x454   : > { %v2735_v61 = vpop.f32.mrf.mxu3  ;;  %4104 = vmatpush.bf16.msrb.mxu3 %v4854_v19  ;;  %v5304_v16 = vld [vmem:[%s8110_s5 + $0x214] sm:$0xf0] }
 0x455   : > { %v3082_v1 = vadd.f32 %v3081_v3, %v2946_v2  ;;  %v2736_v63 = vadd.f32 %v2735_v61, %v7015_v56  ;;  %v5313_v3 = vld [vmem:[%s8110_s5 + $0x264] sm:$0xf]  ;;  %v5003_v2 = vld [vmem:[%s8110_s5 + $0x270] sm:$0xf0] }
 0x456   : > { %v2549_v14 = vpop.f32.mrf.mxu2  ;;  %v5006_v26 = vor.u32 %v5313_v3, %v5003_v2  ;;  %v5326_v3 = vld [vmem:[%s8110_s5 + $0x2cc] sm:$0xf]  ;;  %v5059_v2 = vld [vmem:[%s8110_s5 + $0x2d8] sm:$0xf0] }
 0x457   : > { %v3083_v55 = vrot.slane %v3082_v1, 4  ;;  %v2879_v47 = vmax.f32 %v2736_v63, 0.0  ;;  %v2550_v6 = vadd.f32 %v2549_v14, %v6853_v10  ;;  %v4990_v63 = vor.u32 %v5309_v41, %v4987_v60  ;;  %v4971_v14 = vld [vmem:[%s8110_s5 + $0x230] sm:$0xf0]  ;;  %v5322_v60 = vld [vmem:[%s8110_s5 + $0x2ac] sm:$0xf] }
 0x458   : > { %4105 = vmatpush.bf16.msrb.mxu3 %v4838_v36  ;;  %v5074_v36 = vor.u32 %v5332_v11, %v5073_v39  ;;  %v5062_v41 = vor.u32 %v5326_v3, %v5059_v2  ;;  %v5285_v3 = vld [vmem:[%s8110_s5 + $0x184] sm:$0xf]  ;;  %v4891_v2 = vld [vmem:[%s8110_s5 + $0x190] sm:$0xf0] }
 0x459   : > { %v3084_v54 = vadd.f32 %v3083_v55, %v3082_v1  ;;  %v3112_v20 = vadd.f32 %v3111_v32, %v2879_v47  ;;  %v2945_v33 = vmax.f32 %v2550_v6, 0.0  ;;  %v5317_v32 = vld [vmem:[%s8110_s5 + $0x284] sm:$0xf]  ;;  %v4974_v47 = vor.u32 %v5305_v22, %v4971_v14 }
 0x45a   : > { %v5022_v27 = vor.u32 %v5317_v32, %v5019_v17  ;;  %v5359_v32 = vld [vmem:[%s8110_s5 + $0x3cc] sm:$0xf0] }
 0x45b   : > { %v3085_v9 = vrot.slane %v3084_v54, 2  ;;  %v3035_v62 = vadd.f32 %v3034_v28, %v2945_v33  ;;  %v4955_v28 = vld [vmem:[%s8110_s5 + $0x210] sm:$0xf0] }
 0x45c   : > { %v2737_v42 = vpop.f32.mrf.mxu3 }
 0x45d   : > { %v3086_v43 = vadd.f32 %v3085_v9, %v3084_v54  ;;  %v3036_v10 = vrot.slane %v3035_v62, 4  ;;  %v2738_v50 = vadd.f32 %v2737_v42, %v7015_v56  ;;  %v5057_v9 = vld [vmem:[%s8110_s5 + $0x2c8] sm:$0xf] }
 0x45f   : > { %v3087_v18 = vrot.slane %v3086_v43, 1  ;;  %v3037_v44 = vadd.f32 %v3036_v10, %v3035_v62  ;;  %v2883_v57 = vmax.f32 %v2738_v50, 0.0  ;;  %v5328_v62 = vld [vmem:[%s8110_s5 + $0x2d4] sm:$0xf0]  ;;  %v5041_v50 = vld [vmem:[%s8110_s5 + $0x2a8] sm:$0xf] }
 0x460   : > { %v5058_v10 = vor.u32 %v5328_v62, %v5057_v9 }
 0x461   : > { %v3088_v13 = vadd.f32 %v3087_v18, %v3086_v43  ;;  %v3038_v0 = vrot.slane %v3037_v44, 2  ;;  %v3113_v5 = vadd.f32 %v3112_v20, %v2883_v57  ;;  %v5324_v18 = vld [vmem:[%s8110_s5 + $0x2b4] sm:$0xf0] }
 0x463   : > { %v3145_v8 = vmul.f32 %v7406_v25, %v3088_v13  ;;  %v3039_v23 = vadd.f32 %v3038_v0, %v3037_v44  ;;  %v5042_v13 = vor.u32 %v5324_v18, %v5041_v50  ;;  %v5025_v0 = vld [vmem:[%s8110_s5 + $0x288] sm:$0xf]  ;;  %v5097_v50 = vld [vmem:[%s8110_s5 + $0x320] sm:$0xf]  ;;  %v5339_v18 = vld [vmem:[%s8110_s5 + $0x32c] sm:$0xf0] }
 0x464   : > { %v2740_v15 = vpop.f32.mrf.mxu3 }
 0x465   : > { %v7627_v45 = vpack.c.bf16 %v3145_v8, %v3145_v8  ;;  %v3040_v59 = vrot.slane %v3039_v23, 1  ;;  %v2741_v48 = vadd.f32 %v2740_v15, %v7015_v56  ;;  %v5009_v8 = vld [vmem:[%s8110_s5 + $0x268] sm:$0xf] }
 0x467   : > { %v3041_v29 = vadd.f32 %v3040_v59, %v3039_v23  ;;  %v2887_v38 = vmax.f32 %v2741_v48, 0.0  ;;  %3963 = vmatmul.bf16.vlgmr.msra.gmra.mxu0 %v7627_v45  ;;  %v5316_v23 = vld [vmem:[%s8110_s5 + $0x274] sm:$0xf0] }
 0x468   : > { %4007 = vmatpush.bf16.msra.mxu0 %v5070_v37  ;;  %v5010_v15 = vor.u32 %v5316_v23, %v5009_v8  ;;  %v4993_v37 = vld [vmem:[%s8110_s5 + $0x248] sm:$0xf]  ;;  %v5312_v59 = vld [vmem:[%s8110_s5 + $0x254] sm:$0xf0]  ;;  %v4979_v8 = vld [vmem:[%s8110_s5 + $0x238] sm:$0xf0] }
 0x469   : > { %v3144_v4 = vmul.f32 %v7406_v25, %v3041_v29  ;;  %v3114_v58 = vadd.f32 %v3113_v5, %v2887_v38  ;;  %v5320_v5 = vld [vmem:[%s8110_s5 + $0x294] sm:$0xf0]  ;;  %v4994_v30 = vor.u32 %v5312_v59, %v4993_v37  ;;  %v5193_v38 = vld [vmem:[%s8110_s5 + $0x3e0] sm:$0xf] }
 0x46a   : > { %v5026_v49 = vor.u32 %v5320_v5, %v5025_v0  ;;  %v5308_v29 = vld [vmem:[%s8110_s5 + $0x234] sm:$0xf0]  ;;  %v5081_v23 = vld [vmem:[%s8110_s5 + $0x300] sm:$0xf] }
 0x46b   : > { %v7644_v24 = vpack.c.bf16 %v3144_v4, %v3144_v4 }
 0x46c   : > { %4008 = vmatpush.bf16.msra.mxu0 %v5054_v46  ;;  %v2742_v31 = vpop.f32.mrf.mxu3  ;;  %v5363_v46 = vld [vmem:[%s8110_s5 + $0x3ec] sm:$0xf0] }
 0x46d   : > { %v2743_v7 = vadd.f32 %v2742_v31, %v7015_v56  ;;  %3950 = vmatmul.bf16.vlgmr.msrb.gmra.mxu2 %v7644_v24  ;;  %4054 = vmatmul.bf16.vlgmr.msra.gmra.mxu3 %v7644_v24  ;;  %v5194_v4 = vor.u32 %v5363_v46, %v5193_v38  ;;  %v5330_v31 = vld [vmem:[%s8110_s5 + $0x2ec] sm:$0xf] }
 0x46e   : > { %v5302_v46 = vld [vmem:[%s8110_s5 + $0x20c] sm:$0xf] }
 0x46f   : > { %v2891_v35 = vmax.f32 %v2743_v7, 0.0  ;;  %3968 = vmatpush.bf16.msra.mxu2 %v5194_v4  ;;  %v5177_v7 = vld [vmem:[%s8110_s5 + $0x3c0] sm:$0xf]  ;;  %v4963_v4 = vld [vmem:[%s8110_s5 + $0x218] sm:$0xf0] }
 0x470   : > { %4009 = vmatpush.bf16.msra.mxu0 %v5038_v34  ;;  %v5075_v34 = vld [vmem:[%s8110_s5 + $0x2f8] sm:$0xf0] }
 0x471   : > { %v3115_v53 = vadd.f32 %v3114_v58, %v2891_v35  ;;  %v4978_v58 = vor.u32 %v5308_v29, %v4977_v51  ;;  %v5178_v35 = vor.u32 %v5359_v32, %v5177_v7  ;;  %v4939_v51 = vld [vmem:[%s8110_s5 + $0x1f0] sm:$0xf0]  ;;  %v4966_v7 = vor.u32 %v5302_v46, %v4963_v4 }
 0x473   : > { %3969 = vmatpush.bf16.msra.mxu2 %v5178_v35  ;;  %v5289_v35 = vld [vmem:[%s8110_s5 + $0x1a4] sm:$0xf] }
 0x474   : > { %4010 = vmatpush.bf16.msra.mxu0 %v5022_v27  ;;  %v2745_v21 = vpop.f32.mrf.mxu3  ;;  %v4962_v27 = vor.u32 %v5304_v16, %v4961_v12  ;;  %v4923_v12 = vld [vmem:[%s8110_s5 + $0x1d0] sm:$0xf0] }
 0x475   : > { %v2746_v61 = vadd.f32 %v2745_v21, %v7015_v56  ;;  %v5161_v21 = vld [vmem:[%s8110_s5 + $0x3a0] sm:$0xf] }
 0x477   : > { %v2895_v1 = vmax.f32 %v2746_v61, 0.0  ;;  %3989 = vmatmul.bf16.vlgmr.msrb.gmra.mxu0 %v7433_v40  ;;  %v5301_v40 = vld [vmem:[%s8110_s5 + $0x204] sm:$0xf] }
 0x478   : > { %4011 = vmatpush.bf16.msra.mxu0 %v5006_v26  ;;  %v4958_v20 = vor.u32 %v5301_v40, %v4955_v28  ;;  %v5355_v26 = vld [vmem:[%s8110_s5 + $0x3ac] sm:$0xf0]  ;;  %v5129_v40 = vld [vmem:[%s8110_s5 + $0x360] sm:$0xf] }
 0x479   : > { %v3116_v19 = vadd.f32 %v3115_v53, %v2895_v1  ;;  %v5078_v53 = vor.u32 %v5330_v31, %v5075_v34  ;;  %v5162_v61 = vor.u32 %v5355_v26, %v5161_v21  ;;  %v5043_v1 = vld [vmem:[%s8110_s5 + $0x2b8] sm:$0xf0]  ;;  %v5347_v28 = vld [vmem:[%s8110_s5 + $0x36c] sm:$0xf0]  ;;  %v4894_v21 = vor.u32 %v5285_v3, %v4891_v2 }
 0x47a   : > { %v5130_v39 = vor.u32 %v5347_v28, %v5129_v40 }
 0x47b   : > { %3970 = vmatpush.bf16.msra.mxu2 %v5162_v61 }
 0x47c   : > { %4012 = vmatpush.bf16.msra.mxu0 %v4990_v63  ;;  %v2747_v55 = vpop.f32.mrf.mxu3  ;;  %v5145_v63 = vld [vmem:[%s8110_s5 + $0x380] sm:$0xf] }
 0x47d   : > { %v2748_v6 = vadd.f32 %v2747_v55, %v7015_v56  ;;  %4106 = vmatmul.bf16.vlgmr.msrb.gmra.mxu3 %v7644_v24  ;;  %v5046_v55 = vor.u32 %v5322_v60, %v5043_v1  ;;  %v4875_v60 = vld [vmem:[%s8110_s5 + $0x170] sm:$0xf0] }
 0x47f   : > { %v2899_v54 = vmax.f32 %v2748_v6, 0.0  ;;  %v5027_v6 = vld [vmem:[%s8110_s5 + $0x298] sm:$0xf0] }
 0x480   : > { %4013 = vmatpush.bf16.msra.mxu0 %v4974_v47  ;;  %v5318_v47 = vld [vmem:[%s8110_s5 + $0x28c] sm:$0xf] }
 0x481   : > { %v3117_v33 = vadd.f32 %v3116_v19, %v2899_v54  ;;  %v5351_v19 = vld [vmem:[%s8110_s5 + $0x38c] sm:$0xf0]  ;;  %v5030_v11 = vor.u32 %v5318_v47, %v5027_v6  ;;  %v5314_v54 = vld [vmem:[%s8110_s5 + $0x26c] sm:$0xf] }
 0x482   : > { %v5146_v14 = vor.u32 %v5351_v19, %v5145_v63  ;;  %v5277_v19 = vld [vmem:[%s8110_s5 + $0x144] sm:$0xf] }
 0x484   : > { %4014 = vmatpush.bf16.msra.mxu0 %v4958_v20  ;;  %v2750_v42 = vpop.f32.mrf.mxu3  ;;  %3971 = vmatpush.bf16.msra.mxu2 %v5146_v14  ;;  %v5011_v20 = vld [vmem:[%s8110_s5 + $0x278] sm:$0xf0]  ;;  %v4859_v14 = vld [vmem:[%s8110_s5 + $0x150] sm:$0xf0] }
 0x485   : > { %v2751_v43 = vadd.f32 %v2750_v42, %v7015_v56  ;;  %v5014_v42 = vor.u32 %v5314_v54, %v5011_v20  ;;  %v4862_v6 = vor.u32 %v5277_v19, %v4859_v14 }
 0x487   : > { %v2903_v44 = vmax.f32 %v2751_v43, 0.0  ;;  %4015 = vmatmul.bf16.vlgmr.msra.gmra.mxu0 %v7627_v45  ;;  %v5310_v43 = vld [vmem:[%s8110_s5 + $0x24c] sm:$0xf] }
 0x488   : > { %4059 = vmatpush.bf16.msrb.mxu0 %v5074_v36  ;;  %3972 = vmatpush.bf16.msra.mxu2 %v5130_v39  ;;  %v5343_v36 = vld [vmem:[%s8110_s5 + $0x34c] sm:$0xf0]  ;;  %v5273_v39 = vld [vmem:[%s8110_s5 + $0x124] sm:$0xf] }
 0x489   : > { %v7703_v57 = vadd.f32 %v3117_v33, %v2903_v44  ;;  %v5113_v33 = vld [vmem:[%s8110_s5 + $0x340] sm:$0xf]  ;;  %v5098_v44 = vor.u32 %v5339_v18, %v5097_v50 }
 0x48a   : > { %v5114_v62 = vor.u32 %v5343_v36, %v5113_v33 }
 0x48c   : > { %4060 = vmatpush.bf16.msrb.mxu0 %v5058_v10  ;;  %v7711_v52 = vpop.f32.mrf.mxu3  ;;  %3973 = vmatpush.bf16.msra.mxu2 %v5114_v62  ;;  %v4995_v10 = vld [vmem:[%s8110_s5 + $0x258] sm:$0xf0] }
 0x48d   : > { %v4998_v5 = vor.u32 %v5310_v43, %v4995_v10  ;;  %v2753_v1 = vadd.f32 %v7711_v52, %v7015_v56  ;;  %v4827_v43 = vld [vmem:[%s8110_s5 + $0x110] sm:$0xf0] }
 0x490   : > { %4061 = vmatpush.bf16.msrb.mxu0 %v5042_v13  ;;  %3974 = vmatpush.bf16.msra.mxu2 %v5098_v44 }
 0x494   : > { %4062 = vmatpush.bf16.msrb.mxu0 %v5026_v49  ;;  %v7725_v48 = vpop.f32.mrf.mxu3  ;;  %v5306_v49 = vld [vmem:[%s8110_s5 + $0x22c] sm:$0xf] }
 0x495   : > { %v4982_v38 = vor.u32 %v5306_v49, %v4979_v8 }
 0x498   : > { %4063 = vmatpush.bf16.msrb.mxu0 %v5010_v15  ;;  %v5335_v15 = vld [vmem:[%s8110_s5 + $0x30c] sm:$0xf0] }
 0x499   : > { %v5082_v59 = vor.u32 %v5335_v15, %v5081_v23 }
 0x49b   : > { %3975 = vmatpush.bf16.msra.mxu2 %v5082_v59 }
 0x49c   : > { %4064 = vmatpush.bf16.msrb.mxu0 %v4994_v30  ;;  %v7757_v17 = vpop.f32.mrf.mxu3  ;;  %v5297_v30 = vld [vmem:[%s8110_s5 + $0x1e4] sm:$0xf] }
 0x49d   : > { %v4942_v29 = vor.u32 %v5297_v30, %v4939_v51  ;;  %v2758_v47 = vadd.f32 %v7757_v17, %v7015_v56 }
 0x49f   : > { %3994 = vmatpush.bf16.msrb.mxu2 %v4942_v29  ;;  %v2915_v20 = vmax.f32 %v2758_v47, 0.0 }
 0x4a0   : > { %4065 = vmatpush.bf16.msrb.mxu0 %v4978_v58  ;;  %v5293_v58 = vld [vmem:[%s8110_s5 + $0x1c4] sm:$0xf] }
 0x4a1   : > { %v4926_v16 = vor.u32 %v5293_v58, %v4923_v12 }
 0x4a3   : > { %3995 = vmatpush.bf16.msrb.mxu2 %v4926_v16 }
 0x4a4   : > { %4066 = vmatpush.bf16.msrb.mxu0 %v4962_v27  ;;  %v7784_v22 = vpop.f32.mrf.mxu3  ;;  %v4907_v27 = vld [vmem:[%s8110_s5 + $0x1b0] sm:$0xf0] }
 0x4a5   : > { %v2761_v28 = vadd.f32 %v7784_v22, %v7015_v56 }
 0x4a7   : > { %4067 = vmatmul.bf16.vlgmr.msrb.gmra.mxu0 %v7627_v45  ;;  %v2919_v62 = vmax.f32 %v2761_v28, 0.0  ;;  %v5357_v28 = vld [vmem:[%s8110_s5 + $0x3c4] sm:$0xf] }
 0x4a8   : > { %4111 = vmatpush.bf16.msra.mxu0 %v5078_v53  ;;  %v4910_v53 = vor.u32 %v5289_v35, %v4907_v27 }
 0x4aa   : > { %3996 = vmatpush.bf16.msrb.mxu2 %v4910_v53  ;;  %v7917_v53 = vld [vmem:[%s8111_s6] sm:$0xf] }
 0x4ab   : > { %v3921_v2 = vperm.slane %v7917_v53, 0 }
 0x4ac   : > { %4112 = vmatpush.bf16.msra.mxu0 %v5062_v41  ;;  %v7810_v9 = vpop.f32.mrf.mxu3  ;;  %v5281_v41 = vld [vmem:[%s8110_s5 + $0x164] sm:$0xf] }
 0x4ad   : > { %v4878_v63 = vor.u32 %v5281_v41, %v4875_v60  ;;  %v2763_v17 = vadd.f32 %v7810_v9, %v7015_v56  ;;  %v5361_v60 = vld [vmem:[%s8110_s5 + $0x3e4] sm:$0xf] }
 0x4ae   : > { %3997 = vmatpush.bf16.msrb.mxu2 %v4894_v21  ;;  %v3923_v21 = vperm.slane %v7917_v53, 2 }
 0x4b0   : > { %4113 = vmatpush.bf16.msra.mxu0 %v5046_v55  ;;  %v2907_v55 = vmax.f32 %v2753_v1, 0.0  ;;  %v5195_v1 = vld [vmem:[%s8110_s5 + $0x3f0] sm:$0xf0] }
 0x4b1   : > { %v5198_v47 = vor.u32 %v5361_v60, %v5195_v1  ;;  %v5105_v1 = vld [vmem:[%s8110_s5 + $0x328] sm:$0xf] }
 0x4b2   : > { %v7824_v13 = vpop.f32.mrf.mxu0  ;;  %v7826_v0 = vpop.f32.mrf.mxu1  ;;  %3998 = vmatpush.bf16.msrb.mxu2 %v4878_v63  ;;  %v3119_v54 = vadd.f32 %v7703_v57, %v2907_v55  ;;  %v2923_v57 = vmax.f32 %v2763_v17, 0.0 }
 0x4b3   : > { %v3939_v63 = vadd.f32 %v7824_v13, %v3921_v2  ;;  %v5179_v13 = vld [vmem:[%s8110_s5 + $0x3d0] sm:$0xf0] }
 0x4b4   : > { %4114 = vmatpush.bf16.msra.mxu0 %v5030_v11  ;;  %v2765_v37 = vpop.f32.mrf.mxu3  ;;  %v4843_v11 = vld [vmem:[%s8110_s5 + $0x130] sm:$0xf0] }
 0x4b5   : > { %v4846_v33 = vor.u32 %v5273_v39, %v4843_v11  ;;  %v2766_v22 = vadd.f32 %v2765_v37, %v7015_v56  ;;  %v5353_v39 = vld [vmem:[%s8110_s5 + $0x3a4] sm:$0xf]  ;;  %v5163_v11 = vld [vmem:[%s8110_s5 + $0x3b0] sm:$0xf0] }
 0x4b6   : > { %3999 = vmatpush.bf16.msrb.mxu2 %v4862_v6  ;;  %v5166_v17 = vor.u32 %v5353_v39, %v5163_v11  ;;  %v5354_v11 = vld [vmem:[%s8110_s5 + $0x3ac] sm:$0xf] }
 0x4b7   : > { %v2927_v44 = vmax.f32 %v2766_v22, 0.0 }
 0x4b8   : > { %4115 = vmatpush.bf16.msra.mxu0 %v5014_v42  ;;  %v5269_v42 = vld [vmem:[%s8110_s5 + $0x104] sm:$0xf] }
 0x4b9   : > { %v4830_v18 = vor.u32 %v5269_v42, %v4827_v43  ;;  %v5345_v43 = vld [vmem:[%s8110_s5 + $0x364] sm:$0xf] }
 0x4ba   : > { %v3940_v31 = vpop.f32.mrf.mxu0  ;;  %v4044_v34 = vpop.f32.mrf.mxu1  ;;  %4000 = vmatpush.bf16.msrb.mxu2 %v4846_v33  ;;  %v5349_v33 = vld [vmem:[%s8110_s5 + $0x384] sm:$0xf] }
 0x4bc   : > { %4116 = vmatpush.bf16.msra.mxu0 %v4998_v5  ;;  %v2767_v32 = vpop.f32.mrf.mxu3 }
 0x4bd   : > { %v2768_v50 = vadd.f32 %v2767_v32, %v7015_v56 }
 0x4be   : > { %4001 = vmatpush.bf16.msrb.mxu2 %v4830_v18 }
 0x4bf   : > { %v2931_v23 = vmax.f32 %v2768_v50, 0.0 }
 0x4c0   : > { %4117 = vmatpush.bf16.msra.mxu0 %v4982_v38 }
 0x4c2   : > { %v7871_v26 = vpop.f32.mrf.mxu1 }
 0x4c4   : > { %4118 = vmatpush.bf16.msra.mxu0 %v4966_v7  ;;  %v2770_v61 = vpop.f32.mrf.mxu3 }
 0x4c5   : > { %v2771_v5 = vadd.f32 %v2770_v61, %v7015_v56 }
 0x4c7   : > { %4119 = vmatmul.bf16.vlgmr.msra.gmra.mxu0 %v7627_v45  ;;  %v2756_v45 = vadd.f32 %v7725_v48, %v7015_v56  ;;  %v2935_v59 = vmax.f32 %v2771_v5, 0.0  ;;  %v5115_v5 = vld [vmem:[%s8110_s5 + $0x350] sm:$0xf0] }
 0x4c9   : > { %v2911_v52 = vmax.f32 %v2756_v45, 0.0  ;;  %v4043_v45 = vadd.f32 %v7826_v0, %v3923_v21  ;;  %v5121_v21 = vld [vmem:[%s8110_s5 + $0x348] sm:$0xf] }
 0x4ca   : > { %v4096_v40 = vpop.f32.mrf.mxu1 }
 0x4cb   : > { %v3120_v36 = vadd.f32 %v3119_v54, %v2911_v52 }
 0x4cc   : > { %v2772_v48 = vpop.f32.mrf.mxu3 }
 0x4cd   : > { %v3121_v10 = vadd.f32 %v3120_v36, %v2915_v20  ;;  %v2773_v15 = vadd.f32 %v2772_v48, %v7015_v56  ;;  %v5182_v48 = vor.u32 %v5357_v28, %v5179_v13  ;;  %v5147_v36 = vld [vmem:[%s8110_s5 + $0x390] sm:$0xf0]  ;;  %v5358_v13 = vld [vmem:[%s8110_s5 + $0x3cc] sm:$0xf] }
 0x4ce   : > { %v5150_v42 = vor.u32 %v5349_v33, %v5147_v36  ;;  %v5155_v33 = vld [vmem:[%s8110_s5 + $0x398] sm:$0xf0] }
 0x4cf   : > { %v3122_v9 = vadd.f32 %v3121_v10, %v2919_v62  ;;  %v2939_v29 = vmax.f32 %v2773_v15, 0.0  ;;  %v3924_v62 = vperm.slane %v7917_v53, 3  ;;  %v5131_v10 = vld [vmem:[%s8110_s5 + $0x370] sm:$0xf0] }
 0x4d0   : > { %v5134_v18 = vor.u32 %v5345_v43, %v5131_v10  ;;  %v5342_v43 = vld [vmem:[%s8110_s5 + $0x34c] sm:$0xf]  ;;  %v5123_v10 = vld [vmem:[%s8110_s5 + $0x358] sm:$0xf0] }
 0x4d1   : > { %v3123_v8 = vadd.f32 %v3122_v9, %v2923_v57  ;;  %v4095_v57 = vadd.f32 %v7871_v26, %v3924_v62  ;;  %v5337_v26 = vld [vmem:[%s8110_s5 + $0x324] sm:$0xf]  ;;  %v5346_v62 = vld [vmem:[%s8110_s5 + $0x36c] sm:$0xf] }
 0x4d3   : > { %v3124_v37 = vadd.f32 %v3123_v8, %v2927_v44  ;;  %v5341_v44 = vld [vmem:[%s8110_s5 + $0x344] sm:$0xf] }
 0x4d4   : > { %v2775_v49 = vpop.f32.mrf.mxu3  ;;  %v5118_v8 = vor.u32 %v5341_v44, %v5115_v5  ;;  %v5338_v44 = vld [vmem:[%s8110_s5 + $0x32c] sm:$0xf]  ;;  %v5107_v5 = vld [vmem:[%s8110_s5 + $0x338] sm:$0xf0] }
 0x4d5   : > { %v2776_v30 = vadd.f32 %v2775_v49, %v7015_v56  ;;  %v3125_v51 = vadd.f32 %v3124_v37, %v2931_v23  ;;  %v5099_v23 = vld [vmem:[%s8110_s5 + $0x330] sm:$0xf0] }
 0x4d6   : > { %v5102_v37 = vor.u32 %v5337_v26, %v5099_v23  ;;  %v5334_v26 = vld [vmem:[%s8110_s5 + $0x30c] sm:$0xf]  ;;  %v5091_v23 = vld [vmem:[%s8110_s5 + $0x318] sm:$0xf0] }
 0x4d7   : > { %v3126_v38 = vadd.f32 %v3125_v51, %v2935_v59  ;;  %v2943_v46 = vmax.f32 %v2776_v30, 0.0  ;;  %v5333_v59 = vld [vmem:[%s8110_s5 + $0x304] sm:$0xf]  ;;  %v5201_v30 = vld [vmem:[%s8110_s5 + $0x3e8] sm:$0xf] }
 0x4d8   : > { %v5364_v51 = vld [vmem:[%s8110_s5 + $0x3f4] sm:$0xf0] }
 0x4d9   : > { %v3127_v58 = vadd.f32 %v3126_v38, %v2939_v29 }
 0x4db   : > { %v3128_v16 = vadd.f32 %v3127_v58, %v2943_v46  ;;  %v5202_v46 = vor.u32 %v5364_v51, %v5201_v30  ;;  %v5360_v58 = vld [vmem:[%s8110_s5 + $0x3d4] sm:$0xf0]  ;;  %v3922_v30 = vperm.slane %v7917_v53, 1 }
 0x4dc   : > { %v2777_v4 = vpop.f32.mrf.mxu3 }
 0x4dd   : > { %v2778_v12 = vadd.f32 %v2777_v4, %v7015_v56  ;;  %v5185_v4 = vld [vmem:[%s8110_s5 + $0x3c8] sm:$0xf] }
 0x4df   : > { %v2947_v31 = vmax.f32 %v2778_v12, 0.0  ;;  %v5186_v12 = vor.u32 %v5360_v58, %v5185_v4 }
 0x4e1   : > { %v3129_v34 = vadd.f32 %v3128_v16, %v2947_v31  ;;  %v5169_v16 = vld [vmem:[%s8110_s5 + $0x3a8] sm:$0xf]  ;;  %v5356_v31 = vld [vmem:[%s8110_s5 + $0x3b4] sm:$0xf0] }
 0x4e3   : > { %v3130_v7 = vrot.slane %v3129_v34, 4 }
 0x4e4   : > { %v3964_v32 = vpop.f32.mrf.mxu0 }
 0x4e5   : > { %v3131_v35 = vadd.f32 %v3130_v7, %v3129_v34  ;;  %v5170_v34 = vor.u32 %v5356_v31, %v5169_v16  ;;  %v5153_v7 = vld [vmem:[%s8110_s5 + $0x388] sm:$0xf] }
 0x4e7   : > { %v3132_v27 = vrot.slane %v3131_v35, 2 }
 0x4e9   : > { %v3133_v3 = vadd.f32 %v3132_v27, %v3131_v35  ;;  %v5137_v27 = vld [vmem:[%s8110_s5 + $0x368] sm:$0xf] }
 0x4eb   : > { %v3134_v61 = vrot.slane %v3133_v3, 1 }
 0x4ec   : > { %v3966_v41 = vpop.f32.mrf.mxu0 }
 0x4ed   : > { %v3135_v56 = vadd.f32 %v3134_v61, %v3133_v3  ;;  %v5348_v3 = vld [vmem:[%s8110_s5 + $0x374] sm:$0xf0] }
 0x4ee   : > { %v5138_v2 = vor.u32 %v5348_v3, %v5137_v27  ;;  %v5344_v61 = vld [vmem:[%s8110_s5 + $0x354] sm:$0xf0] }
 0x4ef   : > { %v3146_v19 = vmul.f32 %v7406_v25, %v3135_v56  ;;  %v5122_v56 = vor.u32 %v5344_v61, %v5121_v21 }
 0x4f0   : > { %v3951_v14 = vpop.f32.mrf.mxu2  ;;  %v4055_v55 = vpop.f32.mrf.mxu3 }
 0x4f1   : > { %v7930_v6 = vpack.c.bf16 %v3146_v19, %v3146_v19  ;;  %v3952_v40 = vadd.f32 %v3951_v14, %v3939_v63  ;;  %v7932_v52 = vadd.f32 %v4055_v55, %v4043_v45  ;;  %v5340_v63 = vld [vmem:[%s8110_s5 + $0x334] sm:$0xf0]  ;;  %v5089_v19 = vld [vmem:[%s8110_s5 + $0x308] sm:$0xf]  ;;  %v5362_v55 = vld [vmem:[%s8110_s5 + $0x3ec] sm:$0xf] }
 0x4f2   : > { %v5106_v45 = vor.u32 %v5340_v63, %v5105_v1  ;;  %v5336_v14 = vld [vmem:[%s8110_s5 + $0x314] sm:$0xf0] }
 0x4f3   : > { %3976 = vmatmul.bf16.vlgmr.msra.gmra.mxu2 %v7930_v6  ;;  %v7941_v0 = vadd.f32 %v3964_v32, %v3952_v40  ;;  %v5352_v32 = vld [vmem:[%s8110_s5 + $0x394] sm:$0xf0] }
 0x4f4   : > { %4020 = vmatpush.bf16.msra.mxu2 %v5198_v47  ;;  %v7943_v25 = vpop.f32.mrf.mxu0  ;;  %v5154_v35 = vor.u32 %v5352_v32, %v5153_v7  ;;  %v5203_v47 = vld [vmem:[%s8110_s5 + $0x3f8] sm:$0xf0] }
 0x4f5   : > { %v5206_v28 = vor.u32 %v5362_v55, %v5203_v47  ;;  %v3991_v51 = vadd.f32 %v7943_v25, %v3922_v30 }
 0x4f8   : > { %4021 = vmatpush.bf16.msra.mxu2 %v5182_v48  ;;  %v3953_v54 = vpop.f32.mrf.mxu2  ;;  %v4057_v20 = vpop.f32.mrf.mxu3  ;;  %v5187_v48 = vld [vmem:[%s8110_s5 + $0x3d8] sm:$0xf0] }
 0x4f9   : > { %v5190_v39 = vor.u32 %v5358_v13, %v5187_v48  ;;  %v5171_v54 = vld [vmem:[%s8110_s5 + $0x3b8] sm:$0xf0] }
 0x4fa   : > { %v5174_v20 = vor.u32 %v5354_v11, %v5171_v54 }
 0x4fc   : > { %4022 = vmatpush.bf16.msra.mxu2 %v5166_v17  ;;  %v3992_v22 = vpop.f32.mrf.mxu0  ;;  %v5350_v17 = vld [vmem:[%s8110_s5 + $0x38c] sm:$0xf] }
 0x4fd   : > { %v5158_v36 = vor.u32 %v5350_v17, %v5155_v33  ;;  %v5139_v22 = vld [vmem:[%s8110_s5 + $0x378] sm:$0xf0] }
 0x500   : > { %4023 = vmatpush.bf16.msra.mxu2 %v5150_v42  ;;  %v4107_v50 = vpop.f32.mrf.mxu3  ;;  %v5142_v42 = vor.u32 %v5346_v62, %v5139_v22 }
 0x501   : > { %v7965_v9 = vadd.f32 %v4107_v50, %v4095_v57  ;;  %v5126_v50 = vor.u32 %v5342_v43, %v5123_v10 }
 0x503   : > { %4002 = vmatmul.bf16.vlgmr.msrb.gmra.mxu2 %v7644_v24  ;;  %v5083_v24 = vld [vmem:[%s8110_s5 + $0x310] sm:$0xf0] }
 0x504   : > { %4024 = vmatpush.bf16.msra.mxu2 %v5134_v18  ;;  %v7974_v49 = vpop.f32.mrf.mxu0  ;;  %v5086_v38 = vor.u32 %v5333_v59, %v5083_v24 }
 0x508   : > { %4025 = vmatpush.bf16.msra.mxu2 %v5118_v8  ;;  %v4109_v15 = vpop.f32.mrf.mxu3  ;;  %v5110_v8 = vor.u32 %v5338_v44, %v5107_v5 }
 0x50c   : > { %4026 = vmatpush.bf16.msra.mxu2 %v5102_v37  ;;  %v4018_v29 = vpop.f32.mrf.mxu0 }
 0x510   : > { %4027 = vmatpush.bf16.msra.mxu2 %v5086_v38 }
 0x513   : > { %4028 = vmatmul.bf16.vlgmr.msra.gmra.mxu2 %v7930_v6 }
 0x514   : > { %4072 = vmatpush.bf16.msrb.mxu2 %v5202_v46 }
 0x518   : > { %4073 = vmatpush.bf16.msrb.mxu2 %v5186_v12 }
 0x51c   : > { %4074 = vmatpush.bf16.msrb.mxu2 %v5170_v34 }
 0x520   : > { %4075 = vmatpush.bf16.msrb.mxu2 %v5154_v35 }
 0x524   : > { %v4068_v41 = vpop.f32.mrf.mxu0  ;;  %4076 = vmatpush.bf16.msrb.mxu2 %v5138_v2 }
 0x525   : > { %v4069_v60 = vadd.f32 %v4068_v41, %v7932_v52  ;;  %v5090_v52 = vor.u32 %v5336_v14, %v5089_v19 }
 0x528   : > { %4077 = vmatpush.bf16.msrb.mxu2 %v5122_v56 }
 0x52c   : > { %v4070_v40 = vpop.f32.mrf.mxu0  ;;  %4078 = vmatpush.bf16.msrb.mxu2 %v5106_v45 }
 0x530   : > { %4079 = vmatpush.bf16.msrb.mxu2 %v5090_v52  ;;  %v4179_v52 = vlaneseq }
 0x532   : > { %vm4181_vm10 = vcmp.lt.s32.totalorder %v4179_v52, 512 }
 0x533   : > { %4080 = vmatmul.bf16.vlgmr.msrb.gmra.mxu2 %v7930_v6 }
 0x534   : > { %4124 = vmatpush.bf16.msra.mxu2 %v5206_v28 }
 0x538   : > { %4125 = vmatpush.bf16.msra.mxu2 %v5190_v39 }
 0x53c   : > { %4126 = vmatpush.bf16.msra.mxu2 %v5174_v20 }
 0x540   : > { %4127 = vmatpush.bf16.msra.mxu2 %v5158_v36 }
 0x544   : > { %v4120_v57 = vpop.f32.mrf.mxu0  ;;  %4128 = vmatpush.bf16.msra.mxu2 %v5142_v42 }
 0x545   : > { %v4121_v18 = vadd.f32 %v4120_v57, %v7965_v9  ;;  %v5094_v9 = vor.u32 %v5334_v26, %v5091_v23 }
 0x548   : > { %4129 = vmatpush.bf16.msra.mxu2 %v5126_v50 }
 0x54c   : > { %v4122_v15 = vpop.f32.mrf.mxu0  ;;  %4130 = vmatpush.bf16.msra.mxu2 %v5110_v8 }
 0x550   : > { %4131 = vmatpush.bf16.msra.mxu2 %v5094_v9 }
 0x553   : > { %4132 = vmatmul.bf16.vlgmr.msra.gmra.mxu2 %v7930_v6 }
 0x576   : > { %v3977_v37 = vpop.f32.mrf.mxu2 }
 0x577   : > { %v3978_v59 = vadd.f32 %v3977_v37, %v7941_v0 }
 0x579   : > { %v4137_v32 = vmul.f32 %v3978_v59, %v3978_v59 }
 0x57b   : > { %v4142_v25 = vsel %vm4141_vm4, %v4137_v32, 0.0 }
 0x57e   : > { %v3979_v24 = vpop.f32.mrf.mxu2 }
 0x586   : > { %v4003_v29 = vpop.f32.mrf.mxu2 }
 0x587   : > { %v4004_v38 = vadd.f32 %v4003_v29, %v3991_v51 }
 0x589   : > { %v4017_v31 = vadd.f32 %v7974_v49, %v4004_v38 }
 0x58e   : > { %v4005_v46 = vpop.f32.mrf.mxu2 }
 0x596   : > { %v4029_v4 = vpop.f32.mrf.mxu2 }
 0x597   : > { %v4030_v34 = vadd.f32 %v4029_v4, %v4017_v31 }
 0x599   : > { %v4138_v6 = vmul.f32 %v4030_v34, %v4030_v34 }
 0x59b   : > { %v4143_v0 = vsel %vm4141_vm4, %v4138_v6, 0.0 }
 0x59c   : > { %v4144_v2 = vadd.f32 %v4143_v0, %v4142_v25 }
 0x59e   : > { %v4031_v58 = vpop.f32.mrf.mxu2 }
 0x5b6   : > { %v4081_v12 = vpop.f32.mrf.mxu2 }
 0x5b7   : > { %v4082_v7 = vadd.f32 %v4081_v12, %v4069_v60 }
 0x5b9   : > { %v4139_v35 = vmul.f32 %v4082_v7, %v4082_v7 }
 0x5bb   : > { %v4145_v3 = vsel %vm4141_vm4, %v4139_v35, 0.0 }
 0x5bc   : > { %v4146_v61 = vadd.f32 %v4145_v3, %v4144_v2 }
 0x5be   : > { %v4083_v16 = vpop.f32.mrf.mxu2 }
 0x5d6   : > { %v4133_v53 = vpop.f32.mrf.mxu2 }
 0x5d7   : > { %v4134_v27 = vadd.f32 %v4133_v53, %v4121_v18 }
 0x5d9   : > { %v4140_v21 = vmul.f32 %v4134_v27, %v4134_v27 }
 0x5db   : > { %v4147_v41 = vsel %vm4141_vm4, %v4140_v21, 0.0 }
 0x5dc   : > { %v4148_v49 = vadd.f32 %v4147_v41, %v4146_v61 }
 0x5de   : > { %v4135_v56 = vpop.f32.mrf.mxu2  ;;  %4149 = vadd.xlane.f32.xlu0 %v4148_v49 }
 0x651   : > { %v4150_v60 = vpop.xlane.xlu0 %4149 }
 0x652   : > { %v4151_v1 = vadd.f32 1e-12, %v4150_v60 }
 0x654   : > { %5377 = vrsqrt.f32 %v4151_v1  ;;  %vm4158_vm6 = vweird.f32 %v4151_v1 }
 0x65a   : > { %v5378_v63 = vpop.eup %5377 }
 0x65b   : > { %v4153_v45 = vmul.f32 %v5378_v63, %v4151_v1  ;;  %vm4159_vm5 = vweird.f32 %v5378_v63 }
 0x65c   : > { %vm4160_vm7 = vmor %vm4158_vm6, %vm4159_vm5 }
 0x65d   : > { %v4154_v19 = vmul.f32 %v5378_v63, %v4153_v45 }
 0x65f   : > { %v4155_v14 = vmul.f32 0.5, %v4154_v19 }
 0x661   : > { %v4156_v55 = vsub.f32 1.5, %v4155_v14 }
 0x663   : > { %v4157_v47 = vmul.f32 %v5378_v63, %v4156_v55 }
 0x665   : > { %v4161_v40 = vsel %vm4160_vm7, %v5378_v63, %v4157_v47 }
 0x666   : > { %v4163_v28 = vmul.f32 %v4161_v40, %v4030_v34  ;;  %v4164_v13 = vmul.f32 %v4161_v40, %v4082_v7  ;;  %v4165_v48 = vmul.f32 %v4161_v40, %v4134_v27  ;;  %v4162_v39 = vmul.f32 %v4161_v40, %v3978_v59 }
 0x668   : > { %v4170_v11 = vrot.slane %v4163_v28, 7  ;;  %v4171_v54 = vrot.slane %v4164_v13, 6  ;;  %v4172_v20 = vrot.slane %v4165_v48, 5 }
 0x66a   : > { %v4173_v17 = vsel %vm4141_vm4, %v4162_v39, %v4170_v11  ;;  %v4175_v33 = vsel %vm4174_vm8, %v4171_v54, %v4172_v20 }
 0x66b   : > { %v4177_v36 = vsel %vm4176_vm9, %v4173_v17, %v4175_v33 }
 0x66c   : > { %4183 = vst.msk [vmem:[%s276_s22] sm:$0xf] %vm4181_vm10, %v4177_v36 }
 0x66d PF: > { %s17_s24 = sadd.s32 1, %s5385_s24  }
 0x66e   : > { %p14_p4 = scmp.ge.s32.totalorder %s17_s24, 6  }
 0x670   :  { %16 = sbr.rel (!%p14_p4) target bundleno = 1 (0x1), region = 80 }

</bundles_post_ra>
